<compile_context>
chip_gen: v6e
topology: v6e:2x2x1
jax: 0.10.0
libtpu: 0.0.40
codegen_flags: <defaults>
</compile_context>

<pallas_src>
import math
import functools

import jax
import jax.numpy as jnp
from jax.experimental import pallas as pl
from jax.experimental.pallas import tpu as pltpu


# --------------------------------- kernel -----------------------------------


def _perceiver_attention_kernel(x_ref, lat_ref, nrm_ref, wq_ref, wkv_ref,
                                wout_ref, o_ref, *, heads, dim_head):
    f32 = jnp.float32
    cdt = wq_ref.dtype                       # MXU operand dtype (bf16 weights)
    inner = heads * dim_head
    Bt, n1, D = x_ref.shape
    n2 = lat_ref.shape[1]

    g1, b1 = nrm_ref[0:1, :], nrm_ref[1:2, :]
    g2, b2 = nrm_ref[2:3, :], nrm_ref[3:4, :]

    def layer_norm(v, g, b, eps=1e-5):       # two-pass variance, f32 statistics
        mu = jnp.mean(v, axis=-1, keepdims=True)
        c = v - mu
        var = jnp.mean(c * c, axis=-1, keepdims=True)
        return c * jax.lax.rsqrt(var + eps) * g + b

    xn = layer_norm(x_ref[...].reshape(Bt * n1, D).astype(f32), g1, b1).astype(cdt)
    latn = layer_norm(lat_ref[...].reshape(Bt * n2, D).astype(f32), g2, b2).astype(cdt)

    # TODO(synk): adaLN shift/scale modulation of `latents` (optional forward()
    # args, default None in the reference module) is not implemented.

    # Row-blocked projections (Bt * tokens rows per MXU call).  The attention
    # scale is pre-folded into wq and the K half of wkv; the reference's
    # kv_input concat is never materialised (x / latent rows projected apart).
    q = jnp.dot(latn, wq_ref[...], preferred_element_type=f32)       # (Bt*n2, inner)
    kv_l = jnp.dot(latn, wkv_ref[...], preferred_element_type=f32)   # (Bt*n2, 2*inner)
    kv_x = jnp.dot(xn, wkv_ref[...], preferred_element_type=f32)     # (Bt*n1, 2*inner)

    q3 = q.reshape(Bt, n2, inner).astype(cdt)
    kx = kv_x[:, :inner].reshape(Bt, n1, inner).astype(cdt)
    vx = kv_x[:, inner:].reshape(Bt, n1, inner).astype(cdt)
    kl = kv_l[:, :inner].reshape(Bt, n2, inner).astype(cdt)
    vl = kv_l[:, inner:].reshape(Bt, n2, inner).astype(cdt)

    # Attention: loop heads over lane slices of the inner axis (no reshape /
    # transpose of the lane dim => no sublane relayouts).  x-keys and latent-
    # keys share one softmax normaliser; the head merge is folded into the
    # out-projection via per-head row slices of Wout, accumulated in f32.
    y = jnp.zeros((Bt * n2, D), f32)
    for h in range(heads):
        lo = h * dim_head
        hs = slice(lo, lo + dim_head)
        q_h = q3[:, :, hs]                                            # (Bt, n2, Dh)
        s_x = jnp.einsum('bqd,bkd->bqk', q_h, kx[:, :, hs],
                         preferred_element_type=f32)                  # (Bt, n2, n1)
        s_l = jnp.einsum('bqd,bkd->bqk', q_h, kl[:, :, hs],
                         preferred_element_type=f32)                  # (Bt, n2, n2)
        m = jnp.maximum(jnp.max(s_x, axis=-1, keepdims=True),
                        jnp.max(s_l, axis=-1, keepdims=True))
        p_x = jnp.exp(s_x - m)
        p_l = jnp.exp(s_l - m)
        inv = pl.reciprocal(jnp.sum(p_x, axis=-1, keepdims=True)
                            + jnp.sum(p_l, axis=-1, keepdims=True), approx=True)
        o_h = jnp.einsum('bqk,bkd->bqd', p_x.astype(cdt), vx[:, :, hs],
                         preferred_element_type=f32)
        o_h = o_h + jnp.einsum('bqk,bkd->bqd', p_l.astype(cdt), vl[:, :, hs],
                               preferred_element_type=f32)
        o_h = (o_h * inv).reshape(Bt * n2, dim_head)
        y = y + jnp.dot(o_h.astype(cdt), wout_ref[lo:lo + dim_head, :],
                        preferred_element_type=f32)

    o_ref[...] = y.reshape(Bt, n2, D).astype(o_ref.dtype)


# ------------------------------ param prep -----------------------------------


def prepare_params(*, dim, dim_head, heads, norm1_g, norm1_b, norm2_g, norm2_b,
                   to_q_w, to_kv_w, to_out_w, compute_dtype=jnp.bfloat16):
    """Pack/cast parameters once: bf16 weights (native MXU path), attention
    scale folded into Wq and the K half of Wkv, norm vectors packed (4, D)."""
    inner = heads * dim_head
    assert to_q_w.shape == (dim, inner)
    assert to_kv_w.shape == (dim, 2 * inner)
    assert to_out_w.shape == (inner, dim)
    scale = 1.0 / math.sqrt(math.sqrt(dim_head))
    wq = (to_q_w * scale).astype(compute_dtype)
    wkv = jnp.concatenate([to_kv_w[:, :inner] * scale, to_kv_w[:, inner:]],
                          axis=1).astype(compute_dtype)
    wout = jnp.asarray(to_out_w).astype(compute_dtype)
    norms = jnp.stack([norm1_g, norm1_b, norm2_g, norm2_b],
                      axis=0).astype(jnp.float32)                     # (4, D)
    return {"heads": heads, "dim_head": dim_head,
            "wq": wq, "wkv": wkv, "wout": wout, "norms": norms}


# -------------------------------- wrapper ------------------------------------


def _pick_block_b(B, n2, target_rows=128):
    """Batch elements per grid step: enough query rows to fill MXU rows, but
    keep >=2 grid steps when possible so both v7x TensorCores get work."""
    divisors = [d for d in range(1, B + 1) if B % d == 0]
    bt = divisors[-1]
    for d in divisors:
        if d * n2 >= target_rows:
            bt = d
            break
    if bt == B and B > 1:
        bt = max(d for d in divisors if d < B)
    return bt


def _vmem_limit_bytes(Bt, n1, n2, D, inner, in_itemsize, w_itemsize):
    mib = 1 << 20
    try:
        physical = int(pltpu.get_tpu_info().vmem_capacity_bytes)
    except Exception:
        physical = 64 * mib                      # v7x floor (v5e/v6e: 128 MiB)
    cap = (physical * 3) // 4
    S = n1 + n2
    weights = (D * inner + D * 2 * inner + inner * D) * w_itemsize + 4 * D * 4
    blocks = 2 * (Bt * n1 * D + 2 * Bt * n2 * D) * in_itemsize       # dbl-buffered I/O
    interm = 4 * (Bt * S * D                     # normalised activations
                  + Bt * n2 * 3 * inner          # q + kv(latents)
                  + Bt * n1 * 2 * inner          # kv(x)
                  + Bt * n2 * D                  # f32 output accumulator
                  + 4 * Bt * n2 * S)             # per-head score/prob temps
    est = 2 * weights + blocks + 2 * interm + 8 * mib
    return int(max(32 * mib, min(cap, est)))


def perceiver_attention(params, x, latents, *, block_b=None):
    """x: (B, n1, D) image features, latents: (B, n2, D) -> (B, n2, D)."""
    B, n1, D = x.shape
    Bl, n2, Dl = latents.shape
    assert Bl == B and Dl == D
    heads, dim_head = params["heads"], params["dim_head"]
    inner = heads * dim_head
    wq, wkv, wout, norms = params["wq"], params["wkv"], params["wout"], params["norms"]
    assert wq.shape == (D, inner)
    assert wkv.shape == (D, 2 * inner)
    assert wout.shape == (inner, D)
    assert norms.shape == (4, D)

    Bt = block_b if block_b is not None else _pick_block_b(B, n2)
    assert B % Bt == 0, "block_b must divide the batch size"
    S = n1 + n2

    kernel = functools.partial(_perceiver_attention_kernel,
                               heads=heads, dim_head=dim_head)

    flops = 2 * B * (n2 * D * inner + n2 * D * 2 * inner + n1 * D * 2 * inner
                     + heads * n2 * S * dim_head * 2 + n2 * inner * D)
    transcendentals = B * heads * n2 * S
    bytes_accessed = int(x.size * x.dtype.itemsize
                         + latents.size * latents.dtype.itemsize
                         + norms.size * norms.dtype.itemsize
                         + (wq.size + wkv.size + wout.size) * wq.dtype.itemsize
                         + B * n2 * D * x.dtype.itemsize)
    cost = pl.CostEstimate(flops=int(flops), transcendentals=int(transcendentals),
                           bytes_accessed=bytes_accessed)

    vmem_limit = _vmem_limit_bytes(Bt, n1, n2, D, inner,
                                   in_itemsize=x.dtype.itemsize,
                                   w_itemsize=wq.dtype.itemsize)

    def build(single_buffer_weights):
        # Grid-invariant operands: constant index_map; single-buffer when the
        # installed jax supports pipeline_mode=pl.Buffered(1).
        wmode = ({"pipeline_mode": pl.Buffered(1)} if single_buffer_weights else {})
        in_specs = [
            pl.BlockSpec((Bt, n1, D), lambda b: (b, 0, 0)),            # x
            pl.BlockSpec((Bt, n2, D), lambda b: (b, 0, 0)),            # latents
            pl.BlockSpec((4, D), lambda b: (0, 0), **wmode),           # packed norms
            pl.BlockSpec((D, inner), lambda b: (0, 0), **wmode),       # Wq (scaled)
            pl.BlockSpec((D, 2 * inner), lambda b: (0, 0), **wmode),   # Wkv (K scaled)
            pl.BlockSpec((inner, D), lambda b: (0, 0), **wmode),       # Wout
        ]
        return pl.pallas_call(
            kernel,
            grid=(B // Bt,),
            out_shape=jax.ShapeDtypeStruct((B, n2, D), x.dtype),
            in_specs=in_specs,
            out_specs=pl.BlockSpec((Bt, n2, D), lambda b: (b, 0, 0)),
            compiler_params=pltpu.CompilerParams(
                dimension_semantics=("parallel",),
                vmem_limit_bytes=vmem_limit),
            cost_estimate=cost,
        )

    args = (x, latents, norms, wq, wkv, wout)
    try:
        return build(single_buffer_weights=True)(*args)
    except Exception:
        # pl.Buffered(1) not supported by this jax/Mosaic version:
        # fall back to default double-buffering of the invariant operands.
        return build(single_buffer_weights=False)(*args)


# --------------------------- pure-JAX reference ------------------------------


def perceiver_attention_ref(raw, x, latents):
    """Exact PyTorch-module math in f32 from raw (unfolded) parameters."""
    heads, dim_head = raw["heads"], raw["dim_head"]

    def ln(t, g, b):
        mu = jnp.mean(t, -1, keepdims=True)
        var = jnp.mean((t - mu) ** 2, -1, keepdims=True)
        return (t - mu) / jnp.sqrt(var + 1e-5) * g + b

    xn = ln(x, raw["norm1_g"], raw["norm1_b"])
    lt = ln(latents, raw["norm2_g"], raw["norm2_b"])
    B, n2, _ = lt.shape

    q = lt @ raw["to_q_w"].astype(jnp.float32)
    kv_in = jnp.concatenate([xn, lt], axis=1)
    kv = kv_in @ raw["to_kv_w"].astype(jnp.float32)
    k, v = jnp.split(kv, 2, axis=-1)

    def rh(t):
        b, l, w = t.shape
        return t.reshape(b, l, heads, w // heads).transpose(0, 2, 1, 3)

    qh, kh, vh = rh(q), rh(k), rh(v)
    scale = 1.0 / math.sqrt(math.sqrt(dim_head))
    w_ = jnp.einsum('bhqd,bhkd->bhqk', qh * scale, kh * scale)
    w_ = jax.nn.softmax(w_, axis=-1)
    out = jnp.einsum('bhqk,bhkd->bhqd', w_, vh)
    out = out.transpose(0, 2, 1, 3).reshape(B, n2, heads * dim_head)
    return out @ raw["to_out_w"].astype(jnp.float32)


# ----------------------------------- main ------------------------------------


if __name__ == "__main__":
    B, N1, N2 = 2, 16, 8               # batch, image tokens, latent queries
    DIM, HEADS, DIM_HEAD = 128, 4, 32
    INNER = HEADS * DIM_HEAD

    key = jax.random.PRNGKey(0)
    k1, k2, k3, k4, k5 = jax.random.split(key, 5)

    def w(shape, k):
        return (jax.random.normal(k, shape) / math.sqrt(shape[0])).astype(jnp.float32)

    raw = {
        "heads": HEADS, "dim_head": DIM_HEAD,
        "norm1_g": jnp.ones((DIM,), jnp.float32),
        "norm1_b": jnp.zeros((DIM,), jnp.float32),
        "norm2_g": jnp.ones((DIM,), jnp.float32),
        "norm2_b": jnp.zeros((DIM,), jnp.float32),
        # torch Linear weights are (out, in); stored here pre-transposed (in, out).
        "to_q_w": w((DIM, INNER), k1),
        "to_kv_w": w((DIM, 2 * INNER), k2),
        "to_out_w": w((INNER, DIM), k3),
    }

    params = prepare_params(
        dim=DIM, dim_head=DIM_HEAD, heads=HEADS,
        norm1_g=raw["norm1_g"], norm1_b=raw["norm1_b"],
        norm2_g=raw["norm2_g"], norm2_b=raw["norm2_b"],
        to_q_w=raw["to_q_w"], to_kv_w=raw["to_kv_w"], to_out_w=raw["to_out_w"],
        compute_dtype=jnp.bfloat16)

    x = jax.random.normal(k4, (B, N1, DIM), dtype=jnp.float32)
    latents = jax.random.normal(k5, (B, N2, DIM), dtype=jnp.float32)

    out = jax.block_until_ready(perceiver_attention(params, x, latents))
    assert out.shape == (B, N2, DIM)

    # Check 1: torch-exact math with the SAME bf16-quantised weights
    # (isolates kernel-internal error: bf16 activations, approx reciprocal).
    raw_q = dict(raw)
    for name in ("to_q_w", "to_kv_w", "to_out_w"):
        raw_q[name] = raw[name].astype(jnp.bfloat16).astype(jnp.float32)
    err_kernel = float(jnp.max(jnp.abs(out - perceiver_attention_ref(raw_q, x, latents))))

    # Check 2: torch-exact f32 reference (total error dominated by the bf16
    # weight quantisation chosen for the native MXU path).
    err_total = float(jnp.max(jnp.abs(out - perceiver_attention_ref(raw, x, latents))))

    assert err_kernel < 3e-2, f"kernel-internal max abs err: {err_kernel}"
    assert err_total < 6e-2, f"total max abs err vs f32 reference: {err_total}"

    print("KERNEL_OK")
</pallas_src>

<mosaic_0001>
module attributes {stable_mosaic.version = 11 : i64} {
  func.func @_perceiver_attention_kernel(%arg0: i32, %arg1: memref<1x16x128xf32, #tpu.memory_space<vmem>>, %arg2: memref<1x8x128xf32, #tpu.memory_space<vmem>>, %arg3: memref<4x128xf32, #tpu.memory_space<vmem>>, %arg4: memref<128x128xbf16, #tpu.memory_space<vmem>>, %arg5: memref<128x256xbf16, #tpu.memory_space<vmem>>, %arg6: memref<128x128xbf16, #tpu.memory_space<vmem>>, %arg7: memref<1x8x128xf32, #tpu.memory_space<vmem>>) attributes {dimension_semantics = [#tpu.dimension_semantics<parallel>], iteration_bounds = array<i64: 2>, scalar_prefetch = 0 : i64, scratch_operands = 0 : i64, tpu.core_type = #tpu.core_type<tc>, window_params = [{transform_indices = @transform_0, window_bounds = array<i64: 1, 16, 128>}, {transform_indices = @transform_1, window_bounds = array<i64: 1, 8, 128>}, {pipeline_mode = #tpu.pipeline_mode<synchronous>, transform_indices = @transform_2, window_bounds = array<i64: 4, 128>}, {pipeline_mode = #tpu.pipeline_mode<synchronous>, transform_indices = @transform_3, window_bounds = array<i64: 128, 128>}, {pipeline_mode = #tpu.pipeline_mode<synchronous>, transform_indices = @transform_4, window_bounds = array<i64: 128, 256>}, {pipeline_mode = #tpu.pipeline_mode<synchronous>, transform_indices = @transform_5, window_bounds = array<i64: 128, 128>}, {transform_indices = @transform_6, window_bounds = array<i64: 1, 8, 128>}]} {
    %c0 = arith.constant 0 : index
    %c0_0 = arith.constant 0 : index
    %0 = vector.load %arg3[%c0, %c0_0] : memref<4x128xf32, #tpu.memory_space<vmem>>, vector<1x128xf32>
    %c1 = arith.constant 1 : index
    %c0_1 = arith.constant 0 : index
    %1 = vector.load %arg3[%c1, %c0_1] : memref<4x128xf32, #tpu.memory_space<vmem>>, vector<1x128xf32>
    %c2 = arith.constant 2 : index
    %c0_2 = arith.constant 0 : index
    %2 = vector.load %arg3[%c2, %c0_2] : memref<4x128xf32, #tpu.memory_space<vmem>>, vector<1x128xf32>
    %c3 = arith.constant 3 : index
    %c0_3 = arith.constant 0 : index
    %3 = vector.load %arg3[%c3, %c0_3] : memref<4x128xf32, #tpu.memory_space<vmem>>, vector<1x128xf32>
    %c0_4 = arith.constant 0 : index
    %c0_5 = arith.constant 0 : index
    %c0_6 = arith.constant 0 : index
    %4 = vector.load %arg1[%c0_4, %c0_5, %c0_6] : memref<1x16x128xf32, #tpu.memory_space<vmem>>, vector<1x16x128xf32>
    %5 = vector.shape_cast %4 : vector<1x16x128xf32> to vector<16x128xf32>
    %cst = arith.constant dense<0.000000e+00> : vector<16xf32>
    %6 = vector.multi_reduction <add>, %5, %cst [1] : vector<16x128xf32> to vector<16xf32>
    %7 = vector.shape_cast %6 : vector<16xf32> to vector<16x1xf32>
    %cst_7 = arith.constant 1.280000e+02 : f32
    %8 = vector.broadcast %cst_7 : f32 to vector<16x1xf32>
    %9 = arith.divf %7, %8 : vector<16x1xf32>
    %10 = vector.broadcast %9 : vector<16x1xf32> to vector<16x128xf32>
    %11 = arith.subf %5, %10 : vector<16x128xf32>
    %12 = arith.mulf %11, %11 : vector<16x128xf32>
    %cst_8 = arith.constant dense<0.000000e+00> : vector<16xf32>
    %13 = vector.multi_reduction <add>, %12, %cst_8 [1] : vector<16x128xf32> to vector<16xf32>
    %14 = vector.shape_cast %13 : vector<16xf32> to vector<16x1xf32>
    %cst_9 = arith.constant 1.280000e+02 : f32
    %15 = vector.broadcast %cst_9 : f32 to vector<16x1xf32>
    %16 = arith.divf %14, %15 : vector<16x1xf32>
    %cst_10 = arith.constant 9.99999974E-6 : f32
    %17 = vector.broadcast %cst_10 : f32 to vector<16x1xf32>
    %18 = arith.addf %16, %17 : vector<16x1xf32>
    %19 = math.rsqrt %18 : vector<16x1xf32>
    %20 = vector.broadcast %19 : vector<16x1xf32> to vector<16x128xf32>
    %21 = arith.mulf %11, %20 : vector<16x128xf32>
    %22 = vector.broadcast %0 : vector<1x128xf32> to vector<16x128xf32>
    %23 = arith.mulf %21, %22 : vector<16x128xf32>
    %24 = vector.broadcast %1 : vector<1x128xf32> to vector<16x128xf32>
    %25 = arith.addf %23, %24 : vector<16x128xf32>
    %26 = arith.truncf %25 : vector<16x128xf32> to vector<16x128xbf16>
    %c0_11 = arith.constant 0 : index
    %c0_12 = arith.constant 0 : index
    %c0_13 = arith.constant 0 : index
    %27 = vector.load %arg2[%c0_11, %c0_12, %c0_13] : memref<1x8x128xf32, #tpu.memory_space<vmem>>, vector<1x8x128xf32>
    %28 = vector.shape_cast %27 : vector<1x8x128xf32> to vector<8x128xf32>
    %cst_14 = arith.constant dense<0.000000e+00> : vector<8xf32>
    %29 = vector.multi_reduction <add>, %28, %cst_14 [1] : vector<8x128xf32> to vector<8xf32>
    %30 = vector.shape_cast %29 : vector<8xf32> to vector<8x1xf32>
    %cst_15 = arith.constant 1.280000e+02 : f32
    %31 = vector.broadcast %cst_15 : f32 to vector<8x1xf32>
    %32 = arith.divf %30, %31 : vector<8x1xf32>
    %33 = vector.broadcast %32 : vector<8x1xf32> to vector<8x128xf32>
    %34 = arith.subf %28, %33 : vector<8x128xf32>
    %35 = arith.mulf %34, %34 : vector<8x128xf32>
    %cst_16 = arith.constant dense<0.000000e+00> : vector<8xf32>
    %36 = vector.multi_reduction <add>, %35, %cst_16 [1] : vector<8x128xf32> to vector<8xf32>
    %37 = vector.shape_cast %36 : vector<8xf32> to vector<8x1xf32>
    %cst_17 = arith.constant 1.280000e+02 : f32
    %38 = vector.broadcast %cst_17 : f32 to vector<8x1xf32>
    %39 = arith.divf %37, %38 : vector<8x1xf32>
    %cst_18 = arith.constant 9.99999974E-6 : f32
    %40 = vector.broadcast %cst_18 : f32 to vector<8x1xf32>
    %41 = arith.addf %39, %40 : vector<8x1xf32>
    %42 = math.rsqrt %41 : vector<8x1xf32>
    %43 = vector.broadcast %42 : vector<8x1xf32> to vector<8x128xf32>
    %44 = arith.mulf %34, %43 : vector<8x128xf32>
    %45 = vector.broadcast %2 : vector<1x128xf32> to vector<8x128xf32>
    %46 = arith.mulf %44, %45 : vector<8x128xf32>
    %47 = vector.broadcast %3 : vector<1x128xf32> to vector<8x128xf32>
    %48 = arith.addf %46, %47 : vector<8x128xf32>
    %49 = arith.truncf %48 : vector<8x128xf32> to vector<8x128xbf16>
    %c0_19 = arith.constant 0 : index
    %c0_20 = arith.constant 0 : index
    %50 = vector.load %arg4[%c0_19, %c0_20] : memref<128x128xbf16, #tpu.memory_space<vmem>>, vector<128x128xbf16>
    %cst_21 = arith.constant dense<0.000000e+00> : vector<8x128xf32>
    %51 = tpu.matmul %49, %50, %cst_21 {dimension_numbers = #tpu.dot_dimension_numbers<[1], [0], [0], [1], [0, 0, 1, 1], [], []>} : vector<8x128xbf16>, vector<128x128xbf16>, vector<8x128xf32> -> vector<8x128xf32>
    %c0_22 = arith.constant 0 : index
    %c0_23 = arith.constant 0 : index
    %52 = vector.load %arg5[%c0_22, %c0_23] : memref<128x256xbf16, #tpu.memory_space<vmem>>, vector<128x256xbf16>
    %cst_24 = arith.constant dense<0.000000e+00> : vector<8x256xf32>
    %53 = tpu.matmul %49, %52, %cst_24 {dimension_numbers = #tpu.dot_dimension_numbers<[1], [0], [0], [1], [0, 0, 1, 1], [], []>} : vector<8x128xbf16>, vector<128x256xbf16>, vector<8x256xf32> -> vector<8x256xf32>
    %c0_25 = arith.constant 0 : index
    %c0_26 = arith.constant 0 : index
    %54 = vector.load %arg5[%c0_25, %c0_26] : memref<128x256xbf16, #tpu.memory_space<vmem>>, vector<128x256xbf16>
    %cst_27 = arith.constant dense<0.000000e+00> : vector<16x256xf32>
    %55 = tpu.matmul %26, %54, %cst_27 {dimension_numbers = #tpu.dot_dimension_numbers<[1], [0], [0], [1], [0, 0, 1, 1], [], []>} : vector<16x128xbf16>, vector<128x256xbf16>, vector<16x256xf32> -> vector<16x256xf32>
    %56 = vector.shape_cast %51 : vector<8x128xf32> to vector<1x8x128xf32>
    %57 = arith.truncf %56 : vector<1x8x128xf32> to vector<1x8x128xbf16>
    %58 = vector.extract_strided_slice %55 {offsets = [0, 0], sizes = [16, 128], strides = [1, 1]} : vector<16x256xf32> to vector<16x128xf32>
    %59 = vector.shape_cast %58 : vector<16x128xf32> to vector<1x16x128xf32>
    %60 = arith.truncf %59 : vector<1x16x128xf32> to vector<1x16x128xbf16>
    %61 = vector.extract_strided_slice %55 {offsets = [0, 128], sizes = [16, 128], strides = [1, 1]} : vector<16x256xf32> to vector<16x128xf32>
    %62 = vector.shape_cast %61 : vector<16x128xf32> to vector<1x16x128xf32>
    %63 = arith.truncf %62 : vector<1x16x128xf32> to vector<1x16x128xbf16>
    %64 = vector.extract_strided_slice %53 {offsets = [0, 0], sizes = [8, 128], strides = [1, 1]} : vector<8x256xf32> to vector<8x128xf32>
    %65 = vector.shape_cast %64 : vector<8x128xf32> to vector<1x8x128xf32>
    %66 = arith.truncf %65 : vector<1x8x128xf32> to vector<1x8x128xbf16>
    %67 = vector.extract_strided_slice %53 {offsets = [0, 128], sizes = [8, 128], strides = [1, 1]} : vector<8x256xf32> to vector<8x128xf32>
    %68 = vector.shape_cast %67 : vector<8x128xf32> to vector<1x8x128xf32>
    %69 = arith.truncf %68 : vector<1x8x128xf32> to vector<1x8x128xbf16>
    %cst_28 = arith.constant 0.000000e+00 : f32
    %70 = vector.broadcast %cst_28 : f32 to vector<8x128xf32>
    %71 = vector.extract_strided_slice %57 {offsets = [0, 0, 0], sizes = [1, 8, 32], strides = [1, 1, 1]} : vector<1x8x128xbf16> to vector<1x8x32xbf16>
    %72 = vector.extract_strided_slice %60 {offsets = [0, 0, 0], sizes = [1, 16, 32], strides = [1, 1, 1]} : vector<1x16x128xbf16> to vector<1x16x32xbf16>
    "tpu.trace_start"() <{level = 10 : i32, message = "bqd,bkd->bqk"}> : () -> ()
    %cst_29 = arith.constant dense<0.000000e+00> : vector<1x8x16xf32>
    %73 = tpu.matmul %71, %72, %cst_29 {dimension_numbers = #tpu.dot_dimension_numbers<[2], [2], [1], [1], [0, 0, 0, 1, 1, 1], [0], [0]>} : vector<1x8x32xbf16>, vector<1x16x32xbf16>, vector<1x8x16xf32> -> vector<1x8x16xf32>
    "tpu.trace_stop"() : () -> ()
    %74 = vector.extract_strided_slice %66 {offsets = [0, 0, 0], sizes = [1, 8, 32], strides = [1, 1, 1]} : vector<1x8x128xbf16> to vector<1x8x32xbf16>
    "tpu.trace_start"() <{level = 10 : i32, message = "bqd,bkd->bqk"}> : () -> ()
    %cst_30 = arith.constant dense<0.000000e+00> : vector<1x8x8xf32>
    %75 = tpu.matmul %71, %74, %cst_30 {dimension_numbers = #tpu.dot_dimension_numbers<[2], [2], [1], [1], [0, 0, 0, 1, 1, 1], [0], [0]>} : vector<1x8x32xbf16>, vector<1x8x32xbf16>, vector<1x8x8xf32> -> vector<1x8x8xf32>
    "tpu.trace_stop"() : () -> ()
    %cst_31 = arith.constant dense<0xFF800000> : vector<1x8xf32>
    %76 = vector.multi_reduction <maximumf>, %73, %cst_31 [2] : vector<1x8x16xf32> to vector<1x8xf32>
    %77 = vector.shape_cast %76 : vector<1x8xf32> to vector<1x8x1xf32>
    %cst_32 = arith.constant dense<0xFF800000> : vector<1x8xf32>
    %78 = vector.multi_reduction <maximumf>, %75, %cst_32 [2] : vector<1x8x8xf32> to vector<1x8xf32>
    %79 = vector.shape_cast %78 : vector<1x8xf32> to vector<1x8x1xf32>
    %80 = arith.maximumf %77, %79 : vector<1x8x1xf32>
    %81 = vector.broadcast %80 : vector<1x8x1xf32> to vector<1x8x16xf32>
    %82 = arith.subf %73, %81 : vector<1x8x16xf32>
    %83 = math.exp %82 : vector<1x8x16xf32>
    %84 = vector.broadcast %80 : vector<1x8x1xf32> to vector<1x8x8xf32>
    %85 = arith.subf %75, %84 : vector<1x8x8xf32>
    %86 = math.exp %85 : vector<1x8x8xf32>
    %cst_33 = arith.constant dense<0.000000e+00> : vector<1x8xf32>
    %87 = vector.multi_reduction <add>, %83, %cst_33 [2] : vector<1x8x16xf32> to vector<1x8xf32>
    %88 = vector.shape_cast %87 : vector<1x8xf32> to vector<1x8x1xf32>
    %cst_34 = arith.constant dense<0.000000e+00> : vector<1x8xf32>
    %89 = vector.multi_reduction <add>, %86, %cst_34 [2] : vector<1x8x8xf32> to vector<1x8xf32>
    %90 = vector.shape_cast %89 : vector<1x8xf32> to vector<1x8x1xf32>
    %91 = arith.addf %88, %90 : vector<1x8x1xf32>
    %92 = tpu.reciprocal %91 {approx = true} : vector<1x8x1xf32> -> vector<1x8x1xf32>
    %93 = arith.truncf %83 : vector<1x8x16xf32> to vector<1x8x16xbf16>
    %94 = vector.extract_strided_slice %63 {offsets = [0, 0, 0], sizes = [1, 16, 32], strides = [1, 1, 1]} : vector<1x16x128xbf16> to vector<1x16x32xbf16>
    "tpu.trace_start"() <{level = 10 : i32, message = "bqk,bkd->bqd"}> : () -> ()
    %cst_35 = arith.constant dense<0.000000e+00> : vector<1x8x32xf32>
    %95 = tpu.matmul %93, %94, %cst_35 {dimension_numbers = #tpu.dot_dimension_numbers<[2], [1], [1], [2], [0, 0, 0, 1, 1, 2], [0], [0]>} : vector<1x8x16xbf16>, vector<1x16x32xbf16>, vector<1x8x32xf32> -> vector<1x8x32xf32>
    "tpu.trace_stop"() : () -> ()
    %96 = arith.truncf %86 : vector<1x8x8xf32> to vector<1x8x8xbf16>
    %97 = vector.extract_strided_slice %69 {offsets = [0, 0, 0], sizes = [1, 8, 32], strides = [1, 1, 1]} : vector<1x8x128xbf16> to vector<1x8x32xbf16>
    "tpu.trace_start"() <{level = 10 : i32, message = "bqk,bkd->bqd"}> : () -> ()
    %cst_36 = arith.constant dense<0.000000e+00> : vector<1x8x32xf32>
    %98 = tpu.matmul %96, %97, %cst_36 {dimension_numbers = #tpu.dot_dimension_numbers<[2], [1], [1], [2], [0, 0, 0, 1, 1, 2], [0], [0]>} : vector<1x8x8xbf16>, vector<1x8x32xbf16>, vector<1x8x32xf32> -> vector<1x8x32xf32>
    "tpu.trace_stop"() : () -> ()
    %99 = arith.addf %95, %98 : vector<1x8x32xf32>
    %100 = vector.broadcast %92 : vector<1x8x1xf32> to vector<1x8x32xf32>
    %101 = arith.mulf %99, %100 : vector<1x8x32xf32>
    %102 = vector.shape_cast %101 : vector<1x8x32xf32> to vector<8x32xf32>
    %103 = arith.truncf %102 : vector<8x32xf32> to vector<8x32xbf16>
    %c0_37 = arith.constant 0 : index
    %c0_38 = arith.constant 0 : index
    %104 = vector.load %arg6[%c0_37, %c0_38] : memref<128x128xbf16, #tpu.memory_space<vmem>>, vector<32x128xbf16>
    %cst_39 = arith.constant dense<0.000000e+00> : vector<8x128xf32>
    %105 = tpu.matmul %103, %104, %cst_39 {dimension_numbers = #tpu.dot_dimension_numbers<[1], [0], [0], [1], [0, 0, 1, 1], [], []>} : vector<8x32xbf16>, vector<32x128xbf16>, vector<8x128xf32> -> vector<8x128xf32>
    %106 = arith.addf %70, %105 : vector<8x128xf32>
    %107 = vector.extract_strided_slice %57 {offsets = [0, 0, 32], sizes = [1, 8, 32], strides = [1, 1, 1]} : vector<1x8x128xbf16> to vector<1x8x32xbf16>
    %108 = vector.extract_strided_slice %60 {offsets = [0, 0, 32], sizes = [1, 16, 32], strides = [1, 1, 1]} : vector<1x16x128xbf16> to vector<1x16x32xbf16>
    "tpu.trace_start"() <{level = 10 : i32, message = "bqd,bkd->bqk"}> : () -> ()
    %cst_40 = arith.constant dense<0.000000e+00> : vector<1x8x16xf32>
    %109 = tpu.matmul %107, %108, %cst_40 {dimension_numbers = #tpu.dot_dimension_numbers<[2], [2], [1], [1], [0, 0, 0, 1, 1, 1], [0], [0]>} : vector<1x8x32xbf16>, vector<1x16x32xbf16>, vector<1x8x16xf32> -> vector<1x8x16xf32>
    "tpu.trace_stop"() : () -> ()
    %110 = vector.extract_strided_slice %66 {offsets = [0, 0, 32], sizes = [1, 8, 32], strides = [1, 1, 1]} : vector<1x8x128xbf16> to vector<1x8x32xbf16>
    "tpu.trace_start"() <{level = 10 : i32, message = "bqd,bkd->bqk"}> : () -> ()
    %cst_41 = arith.constant dense<0.000000e+00> : vector<1x8x8xf32>
    %111 = tpu.matmul %107, %110, %cst_41 {dimension_numbers = #tpu.dot_dimension_numbers<[2], [2], [1], [1], [0, 0, 0, 1, 1, 1], [0], [0]>} : vector<1x8x32xbf16>, vector<1x8x32xbf16>, vector<1x8x8xf32> -> vector<1x8x8xf32>
    "tpu.trace_stop"() : () -> ()
    %cst_42 = arith.constant dense<0xFF800000> : vector<1x8xf32>
    %112 = vector.multi_reduction <maximumf>, %109, %cst_42 [2] : vector<1x8x16xf32> to vector<1x8xf32>
    %113 = vector.shape_cast %112 : vector<1x8xf32> to vector<1x8x1xf32>
    %cst_43 = arith.constant dense<0xFF800000> : vector<1x8xf32>
    %114 = vector.multi_reduction <maximumf>, %111, %cst_43 [2] : vector<1x8x8xf32> to vector<1x8xf32>
    %115 = vector.shape_cast %114 : vector<1x8xf32> to vector<1x8x1xf32>
    %116 = arith.maximumf %113, %115 : vector<1x8x1xf32>
    %117 = vector.broadcast %116 : vector<1x8x1xf32> to vector<1x8x16xf32>
    %118 = arith.subf %109, %117 : vector<1x8x16xf32>
    %119 = math.exp %118 : vector<1x8x16xf32>
    %120 = vector.broadcast %116 : vector<1x8x1xf32> to vector<1x8x8xf32>
    %121 = arith.subf %111, %120 : vector<1x8x8xf32>
    %122 = math.exp %121 : vector<1x8x8xf32>
    %cst_44 = arith.constant dense<0.000000e+00> : vector<1x8xf32>
    %123 = vector.multi_reduction <add>, %119, %cst_44 [2] : vector<1x8x16xf32> to vector<1x8xf32>
    %124 = vector.shape_cast %123 : vector<1x8xf32> to vector<1x8x1xf32>
    %cst_45 = arith.constant dense<0.000000e+00> : vector<1x8xf32>
    %125 = vector.multi_reduction <add>, %122, %cst_45 [2] : vector<1x8x8xf32> to vector<1x8xf32>
    %126 = vector.shape_cast %125 : vector<1x8xf32> to vector<1x8x1xf32>
    %127 = arith.addf %124, %126 : vector<1x8x1xf32>
    %128 = tpu.reciprocal %127 {approx = true} : vector<1x8x1xf32> -> vector<1x8x1xf32>
    %129 = arith.truncf %119 : vector<1x8x16xf32> to vector<1x8x16xbf16>
    %130 = vector.extract_strided_slice %63 {offsets = [0, 0, 32], sizes = [1, 16, 32], strides = [1, 1, 1]} : vector<1x16x128xbf16> to vector<1x16x32xbf16>
    "tpu.trace_start"() <{level = 10 : i32, message = "bqk,bkd->bqd"}> : () -> ()
    %cst_46 = arith.constant dense<0.000000e+00> : vector<1x8x32xf32>
    %131 = tpu.matmul %129, %130, %cst_46 {dimension_numbers = #tpu.dot_dimension_numbers<[2], [1], [1], [2], [0, 0, 0, 1, 1, 2], [0], [0]>} : vector<1x8x16xbf16>, vector<1x16x32xbf16>, vector<1x8x32xf32> -> vector<1x8x32xf32>
    "tpu.trace_stop"() : () -> ()
    %132 = arith.truncf %122 : vector<1x8x8xf32> to vector<1x8x8xbf16>
    %133 = vector.extract_strided_slice %69 {offsets = [0, 0, 32], sizes = [1, 8, 32], strides = [1, 1, 1]} : vector<1x8x128xbf16> to vector<1x8x32xbf16>
    "tpu.trace_start"() <{level = 10 : i32, message = "bqk,bkd->bqd"}> : () -> ()
    %cst_47 = arith.constant dense<0.000000e+00> : vector<1x8x32xf32>
    %134 = tpu.matmul %132, %133, %cst_47 {dimension_numbers = #tpu.dot_dimension_numbers<[2], [1], [1], [2], [0, 0, 0, 1, 1, 2], [0], [0]>} : vector<1x8x8xbf16>, vector<1x8x32xbf16>, vector<1x8x32xf32> -> vector<1x8x32xf32>
    "tpu.trace_stop"() : () -> ()
    %135 = arith.addf %131, %134 : vector<1x8x32xf32>
    %136 = vector.broadcast %128 : vector<1x8x1xf32> to vector<1x8x32xf32>
    %137 = arith.mulf %135, %136 : vector<1x8x32xf32>
    %138 = vector.shape_cast %137 : vector<1x8x32xf32> to vector<8x32xf32>
    %139 = arith.truncf %138 : vector<8x32xf32> to vector<8x32xbf16>
    %c32 = arith.constant 32 : index
    %c0_48 = arith.constant 0 : index
    %140 = vector.load %arg6[%c32, %c0_48] : memref<128x128xbf16, #tpu.memory_space<vmem>>, vector<32x128xbf16>
    %cst_49 = arith.constant dense<0.000000e+00> : vector<8x128xf32>
    %141 = tpu.matmul %139, %140, %cst_49 {dimension_numbers = #tpu.dot_dimension_numbers<[1], [0], [0], [1], [0, 0, 1, 1], [], []>} : vector<8x32xbf16>, vector<32x128xbf16>, vector<8x128xf32> -> vector<8x128xf32>
    %142 = arith.addf %106, %141 : vector<8x128xf32>
    %143 = vector.extract_strided_slice %57 {offsets = [0, 0, 64], sizes = [1, 8, 32], strides = [1, 1, 1]} : vector<1x8x128xbf16> to vector<1x8x32xbf16>
    %144 = vector.extract_strided_slice %60 {offsets = [0, 0, 64], sizes = [1, 16, 32], strides = [1, 1, 1]} : vector<1x16x128xbf16> to vector<1x16x32xbf16>
    "tpu.trace_start"() <{level = 10 : i32, message = "bqd,bkd->bqk"}> : () -> ()
    %cst_50 = arith.constant dense<0.000000e+00> : vector<1x8x16xf32>
    %145 = tpu.matmul %143, %144, %cst_50 {dimension_numbers = #tpu.dot_dimension_numbers<[2], [2], [1], [1], [0, 0, 0, 1, 1, 1], [0], [0]>} : vector<1x8x32xbf16>, vector<1x16x32xbf16>, vector<1x8x16xf32> -> vector<1x8x16xf32>
    "tpu.trace_stop"() : () -> ()
    %146 = vector.extract_strided_slice %66 {offsets = [0, 0, 64], sizes = [1, 8, 32], strides = [1, 1, 1]} : vector<1x8x128xbf16> to vector<1x8x32xbf16>
    "tpu.trace_start"() <{level = 10 : i32, message = "bqd,bkd->bqk"}> : () -> ()
    %cst_51 = arith.constant dense<0.000000e+00> : vector<1x8x8xf32>
    %147 = tpu.matmul %143, %146, %cst_51 {dimension_numbers = #tpu.dot_dimension_numbers<[2], [2], [1], [1], [0, 0, 0, 1, 1, 1], [0], [0]>} : vector<1x8x32xbf16>, vector<1x8x32xbf16>, vector<1x8x8xf32> -> vector<1x8x8xf32>
    "tpu.trace_stop"() : () -> ()
    %cst_52 = arith.constant dense<0xFF800000> : vector<1x8xf32>
    %148 = vector.multi_reduction <maximumf>, %145, %cst_52 [2] : vector<1x8x16xf32> to vector<1x8xf32>
    %149 = vector.shape_cast %148 : vector<1x8xf32> to vector<1x8x1xf32>
    %cst_53 = arith.constant dense<0xFF800000> : vector<1x8xf32>
    %150 = vector.multi_reduction <maximumf>, %147, %cst_53 [2] : vector<1x8x8xf32> to vector<1x8xf32>
    %151 = vector.shape_cast %150 : vector<1x8xf32> to vector<1x8x1xf32>
    %152 = arith.maximumf %149, %151 : vector<1x8x1xf32>
    %153 = vector.broadcast %152 : vector<1x8x1xf32> to vector<1x8x16xf32>
    %154 = arith.subf %145, %153 : vector<1x8x16xf32>
    %155 = math.exp %154 : vector<1x8x16xf32>
    %156 = vector.broadcast %152 : vector<1x8x1xf32> to vector<1x8x8xf32>
    %157 = arith.subf %147, %156 : vector<1x8x8xf32>
    %158 = math.exp %157 : vector<1x8x8xf32>
    %cst_54 = arith.constant dense<0.000000e+00> : vector<1x8xf32>
    %159 = vector.multi_reduction <add>, %155, %cst_54 [2] : vector<1x8x16xf32> to vector<1x8xf32>
    %160 = vector.shape_cast %159 : vector<1x8xf32> to vector<1x8x1xf32>
    %cst_55 = arith.constant dense<0.000000e+00> : vector<1x8xf32>
    %161 = vector.multi_reduction <add>, %158, %cst_55 [2] : vector<1x8x8xf32> to vector<1x8xf32>
    %162 = vector.shape_cast %161 : vector<1x8xf32> to vector<1x8x1xf32>
    %163 = arith.addf %160, %162 : vector<1x8x1xf32>
    %164 = tpu.reciprocal %163 {approx = true} : vector<1x8x1xf32> -> vector<1x8x1xf32>
    %165 = arith.truncf %155 : vector<1x8x16xf32> to vector<1x8x16xbf16>
    %166 = vector.extract_strided_slice %63 {offsets = [0, 0, 64], sizes = [1, 16, 32], strides = [1, 1, 1]} : vector<1x16x128xbf16> to vector<1x16x32xbf16>
    "tpu.trace_start"() <{level = 10 : i32, message = "bqk,bkd->bqd"}> : () -> ()
    %cst_56 = arith.constant dense<0.000000e+00> : vector<1x8x32xf32>
    %167 = tpu.matmul %165, %166, %cst_56 {dimension_numbers = #tpu.dot_dimension_numbers<[2], [1], [1], [2], [0, 0, 0, 1, 1, 2], [0], [0]>} : vector<1x8x16xbf16>, vector<1x16x32xbf16>, vector<1x8x32xf32> -> vector<1x8x32xf32>
    "tpu.trace_stop"() : () -> ()
    %168 = arith.truncf %158 : vector<1x8x8xf32> to vector<1x8x8xbf16>
    %169 = vector.extract_strided_slice %69 {offsets = [0, 0, 64], sizes = [1, 8, 32], strides = [1, 1, 1]} : vector<1x8x128xbf16> to vector<1x8x32xbf16>
    "tpu.trace_start"() <{level = 10 : i32, message = "bqk,bkd->bqd"}> : () -> ()
    %cst_57 = arith.constant dense<0.000000e+00> : vector<1x8x32xf32>
    %170 = tpu.matmul %168, %169, %cst_57 {dimension_numbers = #tpu.dot_dimension_numbers<[2], [1], [1], [2], [0, 0, 0, 1, 1, 2], [0], [0]>} : vector<1x8x8xbf16>, vector<1x8x32xbf16>, vector<1x8x32xf32> -> vector<1x8x32xf32>
    "tpu.trace_stop"() : () -> ()
    %171 = arith.addf %167, %170 : vector<1x8x32xf32>
    %172 = vector.broadcast %164 : vector<1x8x1xf32> to vector<1x8x32xf32>
    %173 = arith.mulf %171, %172 : vector<1x8x32xf32>
    %174 = vector.shape_cast %173 : vector<1x8x32xf32> to vector<8x32xf32>
    %175 = arith.truncf %174 : vector<8x32xf32> to vector<8x32xbf16>
    %c64 = arith.constant 64 : index
    %c0_58 = arith.constant 0 : index
    %176 = vector.load %arg6[%c64, %c0_58] : memref<128x128xbf16, #tpu.memory_space<vmem>>, vector<32x128xbf16>
    %cst_59 = arith.constant dense<0.000000e+00> : vector<8x128xf32>
    %177 = tpu.matmul %175, %176, %cst_59 {dimension_numbers = #tpu.dot_dimension_numbers<[1], [0], [0], [1], [0, 0, 1, 1], [], []>} : vector<8x32xbf16>, vector<32x128xbf16>, vector<8x128xf32> -> vector<8x128xf32>
    %178 = arith.addf %142, %177 : vector<8x128xf32>
    %179 = vector.extract_strided_slice %57 {offsets = [0, 0, 96], sizes = [1, 8, 32], strides = [1, 1, 1]} : vector<1x8x128xbf16> to vector<1x8x32xbf16>
    %180 = vector.extract_strided_slice %60 {offsets = [0, 0, 96], sizes = [1, 16, 32], strides = [1, 1, 1]} : vector<1x16x128xbf16> to vector<1x16x32xbf16>
    "tpu.trace_start"() <{level = 10 : i32, message = "bqd,bkd->bqk"}> : () -> ()
    %cst_60 = arith.constant dense<0.000000e+00> : vector<1x8x16xf32>
    %181 = tpu.matmul %179, %180, %cst_60 {dimension_numbers = #tpu.dot_dimension_numbers<[2], [2], [1], [1], [0, 0, 0, 1, 1, 1], [0], [0]>} : vector<1x8x32xbf16>, vector<1x16x32xbf16>, vector<1x8x16xf32> -> vector<1x8x16xf32>
    "tpu.trace_stop"() : () -> ()
    %182 = vector.extract_strided_slice %66 {offsets = [0, 0, 96], sizes = [1, 8, 32], strides = [1, 1, 1]} : vector<1x8x128xbf16> to vector<1x8x32xbf16>
    "tpu.trace_start"() <{level = 10 : i32, message = "bqd,bkd->bqk"}> : () -> ()
    %cst_61 = arith.constant dense<0.000000e+00> : vector<1x8x8xf32>
    %183 = tpu.matmul %179, %182, %cst_61 {dimension_numbers = #tpu.dot_dimension_numbers<[2], [2], [1], [1], [0, 0, 0, 1, 1, 1], [0], [0]>} : vector<1x8x32xbf16>, vector<1x8x32xbf16>, vector<1x8x8xf32> -> vector<1x8x8xf32>
    "tpu.trace_stop"() : () -> ()
    %cst_62 = arith.constant dense<0xFF800000> : vector<1x8xf32>
    %184 = vector.multi_reduction <maximumf>, %181, %cst_62 [2] : vector<1x8x16xf32> to vector<1x8xf32>
    %185 = vector.shape_cast %184 : vector<1x8xf32> to vector<1x8x1xf32>
    %cst_63 = arith.constant dense<0xFF800000> : vector<1x8xf32>
    %186 = vector.multi_reduction <maximumf>, %183, %cst_63 [2] : vector<1x8x8xf32> to vector<1x8xf32>
    %187 = vector.shape_cast %186 : vector<1x8xf32> to vector<1x8x1xf32>
    %188 = arith.maximumf %185, %187 : vector<1x8x1xf32>
    %189 = vector.broadcast %188 : vector<1x8x1xf32> to vector<1x8x16xf32>
    %190 = arith.subf %181, %189 : vector<1x8x16xf32>
    %191 = math.exp %190 : vector<1x8x16xf32>
    %192 = vector.broadcast %188 : vector<1x8x1xf32> to vector<1x8x8xf32>
    %193 = arith.subf %183, %192 : vector<1x8x8xf32>
    %194 = math.exp %193 : vector<1x8x8xf32>
    %cst_64 = arith.constant dense<0.000000e+00> : vector<1x8xf32>
    %195 = vector.multi_reduction <add>, %191, %cst_64 [2] : vector<1x8x16xf32> to vector<1x8xf32>
    %196 = vector.shape_cast %195 : vector<1x8xf32> to vector<1x8x1xf32>
    %cst_65 = arith.constant dense<0.000000e+00> : vector<1x8xf32>
    %197 = vector.multi_reduction <add>, %194, %cst_65 [2] : vector<1x8x8xf32> to vector<1x8xf32>
    %198 = vector.shape_cast %197 : vector<1x8xf32> to vector<1x8x1xf32>
    %199 = arith.addf %196, %198 : vector<1x8x1xf32>
    %200 = tpu.reciprocal %199 {approx = true} : vector<1x8x1xf32> -> vector<1x8x1xf32>
    %201 = arith.truncf %191 : vector<1x8x16xf32> to vector<1x8x16xbf16>
    %202 = vector.extract_strided_slice %63 {offsets = [0, 0, 96], sizes = [1, 16, 32], strides = [1, 1, 1]} : vector<1x16x128xbf16> to vector<1x16x32xbf16>
    "tpu.trace_start"() <{level = 10 : i32, message = "bqk,bkd->bqd"}> : () -> ()
    %cst_66 = arith.constant dense<0.000000e+00> : vector<1x8x32xf32>
    %203 = tpu.matmul %201, %202, %cst_66 {dimension_numbers = #tpu.dot_dimension_numbers<[2], [1], [1], [2], [0, 0, 0, 1, 1, 2], [0], [0]>} : vector<1x8x16xbf16>, vector<1x16x32xbf16>, vector<1x8x32xf32> -> vector<1x8x32xf32>
    "tpu.trace_stop"() : () -> ()
    %204 = arith.truncf %194 : vector<1x8x8xf32> to vector<1x8x8xbf16>
    %205 = vector.extract_strided_slice %69 {offsets = [0, 0, 96], sizes = [1, 8, 32], strides = [1, 1, 1]} : vector<1x8x128xbf16> to vector<1x8x32xbf16>
    "tpu.trace_start"() <{level = 10 : i32, message = "bqk,bkd->bqd"}> : () -> ()
    %cst_67 = arith.constant dense<0.000000e+00> : vector<1x8x32xf32>
    %206 = tpu.matmul %204, %205, %cst_67 {dimension_numbers = #tpu.dot_dimension_numbers<[2], [1], [1], [2], [0, 0, 0, 1, 1, 2], [0], [0]>} : vector<1x8x8xbf16>, vector<1x8x32xbf16>, vector<1x8x32xf32> -> vector<1x8x32xf32>
    "tpu.trace_stop"() : () -> ()
    %207 = arith.addf %203, %206 : vector<1x8x32xf32>
    %208 = vector.broadcast %200 : vector<1x8x1xf32> to vector<1x8x32xf32>
    %209 = arith.mulf %207, %208 : vector<1x8x32xf32>
    %210 = vector.shape_cast %209 : vector<1x8x32xf32> to vector<8x32xf32>
    %211 = arith.truncf %210 : vector<8x32xf32> to vector<8x32xbf16>
    %c96 = arith.constant 96 : index
    %c0_68 = arith.constant 0 : index
    %212 = vector.load %arg6[%c96, %c0_68] : memref<128x128xbf16, #tpu.memory_space<vmem>>, vector<32x128xbf16>
    %cst_69 = arith.constant dense<0.000000e+00> : vector<8x128xf32>
    %213 = tpu.matmul %211, %212, %cst_69 {dimension_numbers = #tpu.dot_dimension_numbers<[1], [0], [0], [1], [0, 0, 1, 1], [], []>} : vector<8x32xbf16>, vector<32x128xbf16>, vector<8x128xf32> -> vector<8x128xf32>
    %214 = arith.addf %178, %213 : vector<8x128xf32>
    %215 = vector.shape_cast %214 : vector<8x128xf32> to vector<1x8x128xf32>
    %c0_70 = arith.constant 0 : index
    %c0_71 = arith.constant 0 : index
    %c0_72 = arith.constant 0 : index
    %216 = vector.load %arg7[%c0_70, %c0_71, %c0_72] : memref<1x8x128xf32, #tpu.memory_space<vmem>>, vector<1x8x128xf32>
    tpu.vector_store %arg7[%c0_70, %c0_71, %c0_72], %215 {strides = array<i32>} : memref<1x8x128xf32, #tpu.memory_space<vmem>>, vector<1x8x128xf32>,
    return
  }
  func.func @transform_0(%arg0: i32) -> (i32, i32, i32) {
    %c0_i32 = arith.constant 0 : i32
    %c0_i32_0 = arith.constant 0 : i32
    %c0_i32_1 = arith.constant 0 : i32
    return %arg0, %c0_i32, %c0_i32_0 : i32, i32, i32
  }
  func.func @transform_1(%arg0: i32) -> (i32, i32, i32) {
    %c0_i32 = arith.constant 0 : i32
    %c0_i32_0 = arith.constant 0 : i32
    %c0_i32_1 = arith.constant 0 : i32
    return %arg0, %c0_i32, %c0_i32_0 : i32, i32, i32
  }
  func.func @transform_2(%arg0: i32) -> (i32, i32) {
    %c0_i32 = arith.constant 0 : i32
    %c0_i32_0 = arith.constant 0 : i32
    %c0_i32_1 = arith.constant 0 : i32
    return %c0_i32, %c0_i32_0 : i32, i32
  }
  func.func @transform_3(%arg0: i32) -> (i32, i32) {
    %c0_i32 = arith.constant 0 : i32
    %c0_i32_0 = arith.constant 0 : i32
    %c0_i32_1 = arith.constant 0 : i32
    return %c0_i32, %c0_i32_0 : i32, i32
  }
  func.func @transform_4(%arg0: i32) -> (i32, i32) {
    %c0_i32 = arith.constant 0 : i32
    %c0_i32_0 = arith.constant 0 : i32
    %c0_i32_1 = arith.constant 0 : i32
    return %c0_i32, %c0_i32_0 : i32, i32
  }
  func.func @transform_5(%arg0: i32) -> (i32, i32) {
    %c0_i32 = arith.constant 0 : i32
    %c0_i32_0 = arith.constant 0 : i32
    %c0_i32_1 = arith.constant 0 : i32
    return %c0_i32, %c0_i32_0 : i32, i32
  }
  func.func @transform_6(%arg0: i32) -> (i32, i32, i32) {
    %c0_i32 = arith.constant 0 : i32
    %c0_i32_0 = arith.constant 0 : i32
    %c0_i32_1 = arith.constant 0 : i32
    return %arg0, %c0_i32, %c0_i32_0 : i32, i32, i32
  }
}

module attributes {stable_mosaic.version = 11 : i64} {
  func.func @_perceiver_attention_kernel(%arg0: i32, %arg1: memref<1x16x128xf32, #tpu.memory_space<vmem>>, %arg2: memref<1x8x128xf32, #tpu.memory_space<vmem>>, %arg3: memref<4x128xf32, #tpu.memory_space<vmem>>, %arg4: memref<128x128xbf16, #tpu.memory_space<vmem>>, %arg5: memref<128x256xbf16, #tpu.memory_space<vmem>>, %arg6: memref<128x128xbf16, #tpu.memory_space<vmem>>, %arg7: memref<1x8x128xf32, #tpu.memory_space<vmem>>) attributes {dimension_semantics = [#tpu.dimension_semantics<parallel>], iteration_bounds = array<i64: 2>, scalar_prefetch = 0 : i64, scratch_operands = 0 : i64, tpu.core_type = #tpu.core_type<tc>, window_params = [{transform_indices = @transform_0, window_bounds = array<i64: 1, 16, 128>}, {transform_indices = @transform_1, window_bounds = array<i64: 1, 8, 128>}, {pipeline_mode = #tpu.pipeline_mode<synchronous>, transform_indices = @transform_2, window_bounds = array<i64: 4, 128>}, {pipeline_mode = #tpu.pipeline_mode<synchronous>, transform_indices = @transform_3, window_bounds = array<i64: 128, 128>}, {pipeline_mode = #tpu.pipeline_mode<synchronous>, transform_indices = @transform_4, window_bounds = array<i64: 128, 256>}, {pipeline_mode = #tpu.pipeline_mode<synchronous>, transform_indices = @transform_5, window_bounds = array<i64: 128, 128>}, {transform_indices = @transform_6, window_bounds = array<i64: 1, 8, 128>}]} {
    %c0 = arith.constant 0 : index
    %c0_0 = arith.constant 0 : index
    %0 = vector.load %arg3[%c0, %c0_0] : memref<4x128xf32, #tpu.memory_space<vmem>>, vector<1x128xf32>
    %c1 = arith.constant 1 : index
    %c0_1 = arith.constant 0 : index
    %1 = vector.load %arg3[%c1, %c0_1] : memref<4x128xf32, #tpu.memory_space<vmem>>, vector<1x128xf32>
    %c2 = arith.constant 2 : index
    %c0_2 = arith.constant 0 : index
    %2 = vector.load %arg3[%c2, %c0_2] : memref<4x128xf32, #tpu.memory_space<vmem>>, vector<1x128xf32>
    %c3 = arith.constant 3 : index
    %c0_3 = arith.constant 0 : index
    %3 = vector.load %arg3[%c3, %c0_3] : memref<4x128xf32, #tpu.memory_space<vmem>>, vector<1x128xf32>
    %c0_4 = arith.constant 0 : index
    %c0_5 = arith.constant 0 : index
    %c0_6 = arith.constant 0 : index
    %4 = vector.load %arg1[%c0_4, %c0_5, %c0_6] : memref<1x16x128xf32, #tpu.memory_space<vmem>>, vector<1x16x128xf32>
    %5 = vector.shape_cast %4 : vector<1x16x128xf32> to vector<16x128xf32>
    %cst = arith.constant dense<0.000000e+00> : vector<16xf32>
    %6 = vector.multi_reduction <add>, %5, %cst [1] : vector<16x128xf32> to vector<16xf32>
    %7 = vector.shape_cast %6 : vector<16xf32> to vector<16x1xf32>
    %cst_7 = arith.constant 1.280000e+02 : f32
    %8 = vector.broadcast %cst_7 : f32 to vector<16x1xf32>
    %9 = arith.divf %7, %8 : vector<16x1xf32>
    %10 = vector.broadcast %9 : vector<16x1xf32> to vector<16x128xf32>
    %11 = arith.subf %5, %10 : vector<16x128xf32>
    %12 = arith.mulf %11, %11 : vector<16x128xf32>
    %cst_8 = arith.constant dense<0.000000e+00> : vector<16xf32>
    %13 = vector.multi_reduction <add>, %12, %cst_8 [1] : vector<16x128xf32> to vector<16xf32>
    %14 = vector.shape_cast %13 : vector<16xf32> to vector<16x1xf32>
    %cst_9 = arith.constant 1.280000e+02 : f32
    %15 = vector.broadcast %cst_9 : f32 to vector<16x1xf32>
    %16 = arith.divf %14, %15 : vector<16x1xf32>
    %cst_10 = arith.constant 9.99999974E-6 : f32
    %17 = vector.broadcast %cst_10 : f32 to vector<16x1xf32>
    %18 = arith.addf %16, %17 : vector<16x1xf32>
    %19 = math.rsqrt %18 : vector<16x1xf32>
    %20 = vector.broadcast %19 : vector<16x1xf32> to vector<16x128xf32>
    %21 = arith.mulf %11, %20 : vector<16x128xf32>
    %22 = vector.broadcast %0 : vector<1x128xf32> to vector<16x128xf32>
    %23 = arith.mulf %21, %22 : vector<16x128xf32>
    %24 = vector.broadcast %1 : vector<1x128xf32> to vector<16x128xf32>
    %25 = arith.addf %23, %24 : vector<16x128xf32>
    %26 = arith.truncf %25 : vector<16x128xf32> to vector<16x128xbf16>
    %c0_11 = arith.constant 0 : index
    %c0_12 = arith.constant 0 : index
    %c0_13 = arith.constant 0 : index
    %27 = vector.load %arg2[%c0_11, %c0_12, %c0_13] : memref<1x8x128xf32, #tpu.memory_space<vmem>>, vector<1x8x128xf32>
    %28 = vector.shape_cast %27 : vector<1x8x128xf32> to vector<8x128xf32>
    %cst_14 = arith.constant dense<0.000000e+00> : vector<8xf32>
    %29 = vector.multi_reduction <add>, %28, %cst_14 [1] : vector<8x128xf32> to vector<8xf32>
    %30 = vector.shape_cast %29 : vector<8xf32> to vector<8x1xf32>
    %cst_15 = arith.constant 1.280000e+02 : f32
    %31 = vector.broadcast %cst_15 : f32 to vector<8x1xf32>
    %32 = arith.divf %30, %31 : vector<8x1xf32>
    %33 = vector.broadcast %32 : vector<8x1xf32> to vector<8x128xf32>
    %34 = arith.subf %28, %33 : vector<8x128xf32>
    %35 = arith.mulf %34, %34 : vector<8x128xf32>
    %cst_16 = arith.constant dense<0.000000e+00> : vector<8xf32>
    %36 = vector.multi_reduction <add>, %35, %cst_16 [1] : vector<8x128xf32> to vector<8xf32>
    %37 = vector.shape_cast %36 : vector<8xf32> to vector<8x1xf32>
    %cst_17 = arith.constant 1.280000e+02 : f32
    %38 = vector.broadcast %cst_17 : f32 to vector<8x1xf32>
    %39 = arith.divf %37, %38 : vector<8x1xf32>
    %cst_18 = arith.constant 9.99999974E-6 : f32
    %40 = vector.broadcast %cst_18 : f32 to vector<8x1xf32>
    %41 = arith.addf %39, %40 : vector<8x1xf32>
    %42 = math.rsqrt %41 : vector<8x1xf32>
    %43 = vector.broadcast %42 : vector<8x1xf32> to vector<8x128xf32>
    %44 = arith.mulf %34, %43 : vector<8x128xf32>
    %45 = vector.broadcast %2 : vector<1x128xf32> to vector<8x128xf32>
    %46 = arith.mulf %44, %45 : vector<8x128xf32>
    %47 = vector.broadcast %3 : vector<1x128xf32> to vector<8x128xf32>
    %48 = arith.addf %46, %47 : vector<8x128xf32>
    %49 = arith.truncf %48 : vector<8x128xf32> to vector<8x128xbf16>
    %c0_19 = arith.constant 0 : index
    %c0_20 = arith.constant 0 : index
    %50 = vector.load %arg4[%c0_19, %c0_20] : memref<128x128xbf16, #tpu.memory_space<vmem>>, vector<128x128xbf16>
    %cst_21 = arith.constant dense<0.000000e+00> : vector<8x128xf32>
    %51 = tpu.matmul %49, %50, %cst_21 {dimension_numbers = #tpu.dot_dimension_numbers<[1], [0], [0], [1], [0, 0, 1, 1], [], []>} : vector<8x128xbf16>, vector<128x128xbf16>, vector<8x128xf32> -> vector<8x128xf32>
    %c0_22 = arith.constant 0 : index
    %c0_23 = arith.constant 0 : index
    %52 = vector.load %arg5[%c0_22, %c0_23] : memref<128x256xbf16, #tpu.memory_space<vmem>>, vector<128x256xbf16>
    %cst_24 = arith.constant dense<0.000000e+00> : vector<8x256xf32>
    %53 = tpu.matmul %49, %52, %cst_24 {dimension_numbers = #tpu.dot_dimension_numbers<[1], [0], [0], [1], [0, 0, 1, 1], [], []>} : vector<8x128xbf16>, vector<128x256xbf16>, vector<8x256xf32> -> vector<8x256xf32>
    %c0_25 = arith.constant 0 : index
    %c0_26 = arith.constant 0 : index
    %54 = vector.load %arg5[%c0_25, %c0_26] : memref<128x256xbf16, #tpu.memory_space<vmem>>, vector<128x256xbf16>
    %cst_27 = arith.constant dense<0.000000e+00> : vector<16x256xf32>
    %55 = tpu.matmul %26, %54, %cst_27 {dimension_numbers = #tpu.dot_dimension_numbers<[1], [0], [0], [1], [0, 0, 1, 1], [], []>} : vector<16x128xbf16>, vector<128x256xbf16>, vector<16x256xf32> -> vector<16x256xf32>
    %56 = vector.shape_cast %51 : vector<8x128xf32> to vector<1x8x128xf32>
    %57 = arith.truncf %56 : vector<1x8x128xf32> to vector<1x8x128xbf16>
    %58 = vector.extract_strided_slice %55 {offsets = [0, 0], sizes = [16, 128], strides = [1, 1]} : vector<16x256xf32> to vector<16x128xf32>
    %59 = vector.shape_cast %58 : vector<16x128xf32> to vector<1x16x128xf32>
    %60 = arith.truncf %59 : vector<1x16x128xf32> to vector<1x16x128xbf16>
    %61 = vector.extract_strided_slice %55 {offsets = [0, 128], sizes = [16, 128], strides = [1, 1]} : vector<16x256xf32> to vector<16x128xf32>
    %62 = vector.shape_cast %61 : vector<16x128xf32> to vector<1x16x128xf32>
    %63 = arith.truncf %62 : vector<1x16x128xf32> to vector<1x16x128xbf16>
    %64 = vector.extract_strided_slice %53 {offsets = [0, 0], sizes = [8, 128], strides = [1, 1]} : vector<8x256xf32> to vector<8x128xf32>
    %65 = vector.shape_cast %64 : vector<8x128xf32> to vector<1x8x128xf32>
    %66 = arith.truncf %65 : vector<1x8x128xf32> to vector<1x8x128xbf16>
    %67 = vector.extract_strided_slice %53 {offsets = [0, 128], sizes = [8, 128], strides = [1, 1]} : vector<8x256xf32> to vector<8x128xf32>
    %68 = vector.shape_cast %67 : vector<8x128xf32> to vector<1x8x128xf32>
    %69 = arith.truncf %68 : vector<1x8x128xf32> to vector<1x8x128xbf16>
    %cst_28 = arith.constant 0.000000e+00 : f32
    %70 = vector.broadcast %cst_28 : f32 to vector<8x128xf32>
    %71 = vector.extract_strided_slice %57 {offsets = [0, 0, 0], sizes = [1, 8, 32], strides = [1, 1, 1]} : vector<1x8x128xbf16> to vector<1x8x32xbf16>
    %72 = vector.extract_strided_slice %60 {offsets = [0, 0, 0], sizes = [1, 16, 32], strides = [1, 1, 1]} : vector<1x16x128xbf16> to vector<1x16x32xbf16>
    "tpu.trace_start"() <{level = 10 : i32, message = "bqd,bkd->bqk"}> : () -> ()
    %cst_29 = arith.constant dense<0.000000e+00> : vector<1x8x16xf32>
    %73 = tpu.matmul %71, %72, %cst_29 {dimension_numbers = #tpu.dot_dimension_numbers<[2], [2], [1], [1], [0, 0, 0, 1, 1, 1], [0], [0]>} : vector<1x8x32xbf16>, vector<1x16x32xbf16>, vector<1x8x16xf32> -> vector<1x8x16xf32>
    "tpu.trace_stop"() : () -> ()
    %74 = vector.extract_strided_slice %66 {offsets = [0, 0, 0], sizes = [1, 8, 32], strides = [1, 1, 1]} : vector<1x8x128xbf16> to vector<1x8x32xbf16>
    "tpu.trace_start"() <{level = 10 : i32, message = "bqd,bkd->bqk"}> : () -> ()
    %cst_30 = arith.constant dense<0.000000e+00> : vector<1x8x8xf32>
    %75 = tpu.matmul %71, %74, %cst_30 {dimension_numbers = #tpu.dot_dimension_numbers<[2], [2], [1], [1], [0, 0, 0, 1, 1, 1], [0], [0]>} : vector<1x8x32xbf16>, vector<1x8x32xbf16>, vector<1x8x8xf32> -> vector<1x8x8xf32>
    "tpu.trace_stop"() : () -> ()
    %cst_31 = arith.constant dense<0xFF800000> : vector<1x8xf32>
    %76 = vector.multi_reduction <maximumf>, %73, %cst_31 [2] : vector<1x8x16xf32> to vector<1x8xf32>
    %77 = vector.shape_cast %76 : vector<1x8xf32> to vector<1x8x1xf32>
    %cst_32 = arith.constant dense<0xFF800000> : vector<1x8xf32>
    %78 = vector.multi_reduction <maximumf>, %75, %cst_32 [2] : vector<1x8x8xf32> to vector<1x8xf32>
    %79 = vector.shape_cast %78 : vector<1x8xf32> to vector<1x8x1xf32>
    %80 = arith.maximumf %77, %79 : vector<1x8x1xf32>
    %81 = vector.broadcast %80 : vector<1x8x1xf32> to vector<1x8x16xf32>
    %82 = arith.subf %73, %81 : vector<1x8x16xf32>
    %83 = math.exp %82 : vector<1x8x16xf32>
    %84 = vector.broadcast %80 : vector<1x8x1xf32> to vector<1x8x8xf32>
    %85 = arith.subf %75, %84 : vector<1x8x8xf32>
    %86 = math.exp %85 : vector<1x8x8xf32>
    %cst_33 = arith.constant dense<0.000000e+00> : vector<1x8xf32>
    %87 = vector.multi_reduction <add>, %83, %cst_33 [2] : vector<1x8x16xf32> to vector<1x8xf32>
    %88 = vector.shape_cast %87 : vector<1x8xf32> to vector<1x8x1xf32>
    %cst_34 = arith.constant dense<0.000000e+00> : vector<1x8xf32>
    %89 = vector.multi_reduction <add>, %86, %cst_34 [2] : vector<1x8x8xf32> to vector<1x8xf32>
    %90 = vector.shape_cast %89 : vector<1x8xf32> to vector<1x8x1xf32>
    %91 = arith.addf %88, %90 : vector<1x8x1xf32>
    %92 = tpu.reciprocal %91 {approx = true} : vector<1x8x1xf32> -> vector<1x8x1xf32>
    %93 = arith.truncf %83 : vector<1x8x16xf32> to vector<1x8x16xbf16>
    %94 = vector.extract_strided_slice %63 {offsets = [0, 0, 0], sizes = [1, 16, 32], strides = [1, 1, 1]} : vector<1x16x128xbf16> to vector<1x16x32xbf16>
    "tpu.trace_start"() <{level = 10 : i32, message = "bqk,bkd->bqd"}> : () -> ()
    %cst_35 = arith.constant dense<0.000000e+00> : vector<1x8x32xf32>
    %95 = tpu.matmul %93, %94, %cst_35 {dimension_numbers = #tpu.dot_dimension_numbers<[2], [1], [1], [2], [0, 0, 0, 1, 1, 2], [0], [0]>} : vector<1x8x16xbf16>, vector<1x16x32xbf16>, vector<1x8x32xf32> -> vector<1x8x32xf32>
    "tpu.trace_stop"() : () -> ()
    %96 = arith.truncf %86 : vector<1x8x8xf32> to vector<1x8x8xbf16>
    %97 = vector.extract_strided_slice %69 {offsets = [0, 0, 0], sizes = [1, 8, 32], strides = [1, 1, 1]} : vector<1x8x128xbf16> to vector<1x8x32xbf16>
    "tpu.trace_start"() <{level = 10 : i32, message = "bqk,bkd->bqd"}> : () -> ()
    %cst_36 = arith.constant dense<0.000000e+00> : vector<1x8x32xf32>
    %98 = tpu.matmul %96, %97, %cst_36 {dimension_numbers = #tpu.dot_dimension_numbers<[2], [1], [1], [2], [0, 0, 0, 1, 1, 2], [0], [0]>} : vector<1x8x8xbf16>, vector<1x8x32xbf16>, vector<1x8x32xf32> -> vector<1x8x32xf32>
    "tpu.trace_stop"() : () -> ()
    %99 = arith.addf %95, %98 : vector<1x8x32xf32>
    %100 = vector.broadcast %92 : vector<1x8x1xf32> to vector<1x8x32xf32>
    %101 = arith.mulf %99, %100 : vector<1x8x32xf32>
    %102 = vector.shape_cast %101 : vector<1x8x32xf32> to vector<8x32xf32>
    %103 = arith.truncf %102 : vector<8x32xf32> to vector<8x32xbf16>
    %c0_37 = arith.constant 0 : index
    %c0_38 = arith.constant 0 : index
    %104 = vector.load %arg6[%c0_37, %c0_38] : memref<128x128xbf16, #tpu.memory_space<vmem>>, vector<32x128xbf16>
    %cst_39 = arith.constant dense<0.000000e+00> : vector<8x128xf32>
    %105 = tpu.matmul %103, %104, %cst_39 {dimension_numbers = #tpu.dot_dimension_numbers<[1], [0], [0], [1], [0, 0, 1, 1], [], []>} : vector<8x32xbf16>, vector<32x128xbf16>, vector<8x128xf32> -> vector<8x128xf32>
    %106 = arith.addf %70, %105 : vector<8x128xf32>
    %107 = vector.extract_strided_slice %57 {offsets = [0, 0, 32], sizes = [1, 8, 32], strides = [1, 1, 1]} : vector<1x8x128xbf16> to vector<1x8x32xbf16>
    %108 = vector.extract_strided_slice %60 {offsets = [0, 0, 32], sizes = [1, 16, 32], strides = [1, 1, 1]} : vector<1x16x128xbf16> to vector<1x16x32xbf16>
    "tpu.trace_start"() <{level = 10 : i32, message = "bqd,bkd->bqk"}> : () -> ()
    %cst_40 = arith.constant dense<0.000000e+00> : vector<1x8x16xf32>
    %109 = tpu.matmul %107, %108, %cst_40 {dimension_numbers = #tpu.dot_dimension_numbers<[2], [2], [1], [1], [0, 0, 0, 1, 1, 1], [0], [0]>} : vector<1x8x32xbf16>, vector<1x16x32xbf16>, vector<1x8x16xf32> -> vector<1x8x16xf32>
    "tpu.trace_stop"() : () -> ()
    %110 = vector.extract_strided_slice %66 {offsets = [0, 0, 32], sizes = [1, 8, 32], strides = [1, 1, 1]} : vector<1x8x128xbf16> to vector<1x8x32xbf16>
    "tpu.trace_start"() <{level = 10 : i32, message = "bqd,bkd->bqk"}> : () -> ()
    %cst_41 = arith.constant dense<0.000000e+00> : vector<1x8x8xf32>
    %111 = tpu.matmul %107, %110, %cst_41 {dimension_numbers = #tpu.dot_dimension_numbers<[2], [2], [1], [1], [0, 0, 0, 1, 1, 1], [0], [0]>} : vector<1x8x32xbf16>, vector<1x8x32xbf16>, vector<1x8x8xf32> -> vector<1x8x8xf32>
    "tpu.trace_stop"() : () -> ()
    %cst_42 = arith.constant dense<0xFF800000> : vector<1x8xf32>
    %112 = vector.multi_reduction <maximumf>, %109, %cst_42 [2] : vector<1x8x16xf32> to vector<1x8xf32>
    %113 = vector.shape_cast %112 : vector<1x8xf32> to vector<1x8x1xf32>
    %cst_43 = arith.constant dense<0xFF800000> : vector<1x8xf32>
    %114 = vector.multi_reduction <maximumf>, %111, %cst_43 [2] : vector<1x8x8xf32> to vector<1x8xf32>
    %115 = vector.shape_cast %114 : vector<1x8xf32> to vector<1x8x1xf32>
    %116 = arith.maximumf %113, %115 : vector<1x8x1xf32>
    %117 = vector.broadcast %116 : vector<1x8x1xf32> to vector<1x8x16xf32>
    %118 = arith.subf %109, %117 : vector<1x8x16xf32>
    %119 = math.exp %118 : vector<1x8x16xf32>
    %120 = vector.broadcast %116 : vector<1x8x1xf32> to vector<1x8x8xf32>
    %121 = arith.subf %111, %120 : vector<1x8x8xf32>
    %122 = math.exp %121 : vector<1x8x8xf32>
    %cst_44 = arith.constant dense<0.000000e+00> : vector<1x8xf32>
    %123 = vector.multi_reduction <add>, %119, %cst_44 [2] : vector<1x8x16xf32> to vector<1x8xf32>
    %124 = vector.shape_cast %123 : vector<1x8xf32> to vector<1x8x1xf32>
    %cst_45 = arith.constant dense<0.000000e+00> : vector<1x8xf32>
    %125 = vector.multi_reduction <add>, %122, %cst_45 [2] : vector<1x8x8xf32> to vector<1x8xf32>
    %126 = vector.shape_cast %125 : vector<1x8xf32> to vector<1x8x1xf32>
    %127 = arith.addf %124, %126 : vector<1x8x1xf32>
    %128 = tpu.reciprocal %127 {approx = true} : vector<1x8x1xf32> -> vector<1x8x1xf32>
    %129 = arith.truncf %119 : vector<1x8x16xf32> to vector<1x8x16xbf16>
    %130 = vector.extract_strided_slice %63 {offsets = [0, 0, 32], sizes = [1, 16, 32], strides = [1, 1, 1]} : vector<1x16x128xbf16> to vector<1x16x32xbf16>
    "tpu.trace_start"() <{level = 10 : i32, message = "bqk,bkd->bqd"}> : () -> ()
    %cst_46 = arith.constant dense<0.000000e+00> : vector<1x8x32xf32>
    %131 = tpu.matmul %129, %130, %cst_46 {dimension_numbers = #tpu.dot_dimension_numbers<[2], [1], [1], [2], [0, 0, 0, 1, 1, 2], [0], [0]>} : vector<1x8x16xbf16>, vector<1x16x32xbf16>, vector<1x8x32xf32> -> vector<1x8x32xf32>
    "tpu.trace_stop"() : () -> ()
    %132 = arith.truncf %122 : vector<1x8x8xf32> to vector<1x8x8xbf16>
    %133 = vector.extract_strided_slice %69 {offsets = [0, 0, 32], sizes = [1, 8, 32], strides = [1, 1, 1]} : vector<1x8x128xbf16> to vector<1x8x32xbf16>
    "tpu.trace_start"() <{level = 10 : i32, message = "bqk,bkd->bqd"}> : () -> ()
    %cst_47 = arith.constant dense<0.000000e+00> : vector<1x8x32xf32>
    %134 = tpu.matmul %132, %133, %cst_47 {dimension_numbers = #tpu.dot_dimension_numbers<[2], [1], [1], [2], [0, 0, 0, 1, 1, 2], [0], [0]>} : vector<1x8x8xbf16>, vector<1x8x32xbf16>, vector<1x8x32xf32> -> vector<1x8x32xf32>
    "tpu.trace_stop"() : () -> ()
    %135 = arith.addf %131, %134 : vector<1x8x32xf32>
    %136 = vector.broadcast %128 : vector<1x8x1xf32> to vector<1x8x32xf32>
    %137 = arith.mulf %135, %136 : vector<1x8x32xf32>
    %138 = vector.shape_cast %137 : vector<1x8x32xf32> to vector<8x32xf32>
    %139 = arith.truncf %138 : vector<8x32xf32> to vector<8x32xbf16>
    %c32 = arith.constant 32 : index
    %c0_48 = arith.constant 0 : index
    %140 = vector.load %arg6[%c32, %c0_48] : memref<128x128xbf16, #tpu.memory_space<vmem>>, vector<32x128xbf16>
    %cst_49 = arith.constant dense<0.000000e+00> : vector<8x128xf32>
    %141 = tpu.matmul %139, %140, %cst_49 {dimension_numbers = #tpu.dot_dimension_numbers<[1], [0], [0], [1], [0, 0, 1, 1], [], []>} : vector<8x32xbf16>, vector<32x128xbf16>, vector<8x128xf32> -> vector<8x128xf32>
    %142 = arith.addf %106, %141 : vector<8x128xf32>
    %143 = vector.extract_strided_slice %57 {offsets = [0, 0, 64], sizes = [1, 8, 32], strides = [1, 1, 1]} : vector<1x8x128xbf16> to vector<1x8x32xbf16>
    %144 = vector.extract_strided_slice %60 {offsets = [0, 0, 64], sizes = [1, 16, 32], strides = [1, 1, 1]} : vector<1x16x128xbf16> to vector<1x16x32xbf16>
    "tpu.trace_start"() <{level = 10 : i32, message = "bqd,bkd->bqk"}> : () -> ()
    %cst_50 = arith.constant dense<0.000000e+00> : vector<1x8x16xf32>
    %145 = tpu.matmul %143, %144, %cst_50 {dimension_numbers = #tpu.dot_dimension_numbers<[2], [2], [1], [1], [0, 0, 0, 1, 1, 1], [0], [0]>} : vector<1x8x32xbf16>, vector<1x16x32xbf16>, vector<1x8x16xf32> -> vector<1x8x16xf32>
    "tpu.trace_stop"() : () -> ()
    %146 = vector.extract_strided_slice %66 {offsets = [0, 0, 64], sizes = [1, 8, 32], strides = [1, 1, 1]} : vector<1x8x128xbf16> to vector<1x8x32xbf16>
    "tpu.trace_start"() <{level = 10 : i32, message = "bqd,bkd->bqk"}> : () -> ()
    %cst_51 = arith.constant dense<0.000000e+00> : vector<1x8x8xf32>
    %147 = tpu.matmul %143, %146, %cst_51 {dimension_numbers = #tpu.dot_dimension_numbers<[2], [2], [1], [1], [0, 0, 0, 1, 1, 1], [0], [0]>} : vector<1x8x32xbf16>, vector<1x8x32xbf16>, vector<1x8x8xf32> -> vector<1x8x8xf32>
    "tpu.trace_stop"() : () -> ()
    %cst_52 = arith.constant dense<0xFF800000> : vector<1x8xf32>
    %148 = vector.multi_reduction <maximumf>, %145, %cst_52 [2] : vector<1x8x16xf32> to vector<1x8xf32>
    %149 = vector.shape_cast %148 : vector<1x8xf32> to vector<1x8x1xf32>
    %cst_53 = arith.constant dense<0xFF800000> : vector<1x8xf32>
    %150 = vector.multi_reduction <maximumf>, %147, %cst_53 [2] : vector<1x8x8xf32> to vector<1x8xf32>
    %151 = vector.shape_cast %150 : vector<1x8xf32> to vector<1x8x1xf32>
    %152 = arith.maximumf %149, %151 : vector<1x8x1xf32>
    %153 = vector.broadcast %152 : vector<1x8x1xf32> to vector<1x8x16xf32>
    %154 = arith.subf %145, %153 : vector<1x8x16xf32>
    %155 = math.exp %154 : vector<1x8x16xf32>
    %156 = vector.broadcast %152 : vector<1x8x1xf32> to vector<1x8x8xf32>
    %157 = arith.subf %147, %156 : vector<1x8x8xf32>
    %158 = math.exp %157 : vector<1x8x8xf32>
    %cst_54 = arith.constant dense<0.000000e+00> : vector<1x8xf32>
    %159 = vector.multi_reduction <add>, %155, %cst_54 [2] : vector<1x8x16xf32> to vector<1x8xf32>
    %160 = vector.shape_cast %159 : vector<1x8xf32> to vector<1x8x1xf32>
    %cst_55 = arith.constant dense<0.000000e+00> : vector<1x8xf32>
    %161 = vector.multi_reduction <add>, %158, %cst_55 [2] : vector<1x8x8xf32> to vector<1x8xf32>
    %162 = vector.shape_cast %161 : vector<1x8xf32> to vector<1x8x1xf32>
    %163 = arith.addf %160, %162 : vector<1x8x1xf32>
    %164 = tpu.reciprocal %163 {approx = true} : vector<1x8x1xf32> -> vector<1x8x1xf32>
    %165 = arith.truncf %155 : vector<1x8x16xf32> to vector<1x8x16xbf16>
    %166 = vector.extract_strided_slice %63 {offsets = [0, 0, 64], sizes = [1, 16, 32], strides = [1, 1, 1]} : vector<1x16x128xbf16> to vector<1x16x32xbf16>
    "tpu.trace_start"() <{level = 10 : i32, message = "bqk,bkd->bqd"}> : () -> ()
    %cst_56 = arith.constant dense<0.000000e+00> : vector<1x8x32xf32>
    %167 = tpu.matmul %165, %166, %cst_56 {dimension_numbers = #tpu.dot_dimension_numbers<[2], [1], [1], [2], [0, 0, 0, 1, 1, 2], [0], [0]>} : vector<1x8x16xbf16>, vector<1x16x32xbf16>, vector<1x8x32xf32> -> vector<1x8x32xf32>
    "tpu.trace_stop"() : () -> ()
    %168 = arith.truncf %158 : vector<1x8x8xf32> to vector<1x8x8xbf16>
    %169 = vector.extract_strided_slice %69 {offsets = [0, 0, 64], sizes = [1, 8, 32], strides = [1, 1, 1]} : vector<1x8x128xbf16> to vector<1x8x32xbf16>
    "tpu.trace_start"() <{level = 10 : i32, message = "bqk,bkd->bqd"}> : () -> ()
    %cst_57 = arith.constant dense<0.000000e+00> : vector<1x8x32xf32>
    %170 = tpu.matmul %168, %169, %cst_57 {dimension_numbers = #tpu.dot_dimension_numbers<[2], [1], [1], [2], [0, 0, 0, 1, 1, 2], [0], [0]>} : vector<1x8x8xbf16>, vector<1x8x32xbf16>, vector<1x8x32xf32> -> vector<1x8x32xf32>
    "tpu.trace_stop"() : () -> ()
    %171 = arith.addf %167, %170 : vector<1x8x32xf32>
    %172 = vector.broadcast %164 : vector<1x8x1xf32> to vector<1x8x32xf32>
    %173 = arith.mulf %171, %172 : vector<1x8x32xf32>
    %174 = vector.shape_cast %173 : vector<1x8x32xf32> to vector<8x32xf32>
    %175 = arith.truncf %174 : vector<8x32xf32> to vector<8x32xbf16>
    %c64 = arith.constant 64 : index
    %c0_58 = arith.constant 0 : index
    %176 = vector.load %arg6[%c64, %c0_58] : memref<128x128xbf16, #tpu.memory_space<vmem>>, vector<32x128xbf16>
    %cst_59 = arith.constant dense<0.000000e+00> : vector<8x128xf32>
    %177 = tpu.matmul %175, %176, %cst_59 {dimension_numbers = #tpu.dot_dimension_numbers<[1], [0], [0], [1], [0, 0, 1, 1], [], []>} : vector<8x32xbf16>, vector<32x128xbf16>, vector<8x128xf32> -> vector<8x128xf32>
    %178 = arith.addf %142, %177 : vector<8x128xf32>
    %179 = vector.extract_strided_slice %57 {offsets = [0, 0, 96], sizes = [1, 8, 32], strides = [1, 1, 1]} : vector<1x8x128xbf16> to vector<1x8x32xbf16>
    %180 = vector.extract_strided_slice %60 {offsets = [0, 0, 96], sizes = [1, 16, 32], strides = [1, 1, 1]} : vector<1x16x128xbf16> to vector<1x16x32xbf16>
    "tpu.trace_start"() <{level = 10 : i32, message = "bqd,bkd->bqk"}> : () -> ()
    %cst_60 = arith.constant dense<0.000000e+00> : vector<1x8x16xf32>
    %181 = tpu.matmul %179, %180, %cst_60 {dimension_numbers = #tpu.dot_dimension_numbers<[2], [2], [1], [1], [0, 0, 0, 1, 1, 1], [0], [0]>} : vector<1x8x32xbf16>, vector<1x16x32xbf16>, vector<1x8x16xf32> -> vector<1x8x16xf32>
    "tpu.trace_stop"() : () -> ()
    %182 = vector.extract_strided_slice %66 {offsets = [0, 0, 96], sizes = [1, 8, 32], strides = [1, 1, 1]} : vector<1x8x128xbf16> to vector<1x8x32xbf16>
    "tpu.trace_start"() <{level = 10 : i32, message = "bqd,bkd->bqk"}> : () -> ()
    %cst_61 = arith.constant dense<0.000000e+00> : vector<1x8x8xf32>
    %183 = tpu.matmul %179, %182, %cst_61 {dimension_numbers = #tpu.dot_dimension_numbers<[2], [2], [1], [1], [0, 0, 0, 1, 1, 1], [0], [0]>} : vector<1x8x32xbf16>, vector<1x8x32xbf16>, vector<1x8x8xf32> -> vector<1x8x8xf32>
    "tpu.trace_stop"() : () -> ()
    %cst_62 = arith.constant dense<0xFF800000> : vector<1x8xf32>
    %184 = vector.multi_reduction <maximumf>, %181, %cst_62 [2] : vector<1x8x16xf32> to vector<1x8xf32>
    %185 = vector.shape_cast %184 : vector<1x8xf32> to vector<1x8x1xf32>
    %cst_63 = arith.constant dense<0xFF800000> : vector<1x8xf32>
    %186 = vector.multi_reduction <maximumf>, %183, %cst_63 [2] : vector<1x8x8xf32> to vector<1x8xf32>
    %187 = vector.shape_cast %186 : vector<1x8xf32> to vector<1x8x1xf32>
    %188 = arith.maximumf %185, %187 : vector<1x8x1xf32>
    %189 = vector.broadcast %188 : vector<1x8x1xf32> to vector<1x8x16xf32>
    %190 = arith.subf %181, %189 : vector<1x8x16xf32>
    %191 = math.exp %190 : vector<1x8x16xf32>
    %192 = vector.broadcast %188 : vector<1x8x1xf32> to vector<1x8x8xf32>
    %193 = arith.subf %183, %192 : vector<1x8x8xf32>
    %194 = math.exp %193 : vector<1x8x8xf32>
    %cst_64 = arith.constant dense<0.000000e+00> : vector<1x8xf32>
    %195 = vector.multi_reduction <add>, %191, %cst_64 [2] : vector<1x8x16xf32> to vector<1x8xf32>
    %196 = vector.shape_cast %195 : vector<1x8xf32> to vector<1x8x1xf32>
    %cst_65 = arith.constant dense<0.000000e+00> : vector<1x8xf32>
    %197 = vector.multi_reduction <add>, %194, %cst_65 [2] : vector<1x8x8xf32> to vector<1x8xf32>
    %198 = vector.shape_cast %197 : vector<1x8xf32> to vector<1x8x1xf32>
    %199 = arith.addf %196, %198 : vector<1x8x1xf32>
    %200 = tpu.reciprocal %199 {approx = true} : vector<1x8x1xf32> -> vector<1x8x1xf32>
    %201 = arith.truncf %191 : vector<1x8x16xf32> to vector<1x8x16xbf16>
    %202 = vector.extract_strided_slice %63 {offsets = [0, 0, 96], sizes = [1, 16, 32], strides = [1, 1, 1]} : vector<1x16x128xbf16> to vector<1x16x32xbf16>
    "tpu.trace_start"() <{level = 10 : i32, message = "bqk,bkd->bqd"}> : () -> ()
    %cst_66 = arith.constant dense<0.000000e+00> : vector<1x8x32xf32>
    %203 = tpu.matmul %201, %202, %cst_66 {dimension_numbers = #tpu.dot_dimension_numbers<[2], [1], [1], [2], [0, 0, 0, 1, 1, 2], [0], [0]>} : vector<1x8x16xbf16>, vector<1x16x32xbf16>, vector<1x8x32xf32> -> vector<1x8x32xf32>
    "tpu.trace_stop"() : () -> ()
    %204 = arith.truncf %194 : vector<1x8x8xf32> to vector<1x8x8xbf16>
    %205 = vector.extract_strided_slice %69 {offsets = [0, 0, 96], sizes = [1, 8, 32], strides = [1, 1, 1]} : vector<1x8x128xbf16> to vector<1x8x32xbf16>
    "tpu.trace_start"() <{level = 10 : i32, message = "bqk,bkd->bqd"}> : () -> ()
    %cst_67 = arith.constant dense<0.000000e+00> : vector<1x8x32xf32>
    %206 = tpu.matmul %204, %205, %cst_67 {dimension_numbers = #tpu.dot_dimension_numbers<[2], [1], [1], [2], [0, 0, 0, 1, 1, 2], [0], [0]>} : vector<1x8x8xbf16>, vector<1x8x32xbf16>, vector<1x8x32xf32> -> vector<1x8x32xf32>
    "tpu.trace_stop"() : () -> ()
    %207 = arith.addf %203, %206 : vector<1x8x32xf32>
    %208 = vector.broadcast %200 : vector<1x8x1xf32> to vector<1x8x32xf32>
    %209 = arith.mulf %207, %208 : vector<1x8x32xf32>
    %210 = vector.shape_cast %209 : vector<1x8x32xf32> to vector<8x32xf32>
    %211 = arith.truncf %210 : vector<8x32xf32> to vector<8x32xbf16>
    %c96 = arith.constant 96 : index
    %c0_68 = arith.constant 0 : index
    %212 = vector.load %arg6[%c96, %c0_68] : memref<128x128xbf16, #tpu.memory_space<vmem>>, vector<32x128xbf16>
    %cst_69 = arith.constant dense<0.000000e+00> : vector<8x128xf32>
    %213 = tpu.matmul %211, %212, %cst_69 {dimension_numbers = #tpu.dot_dimension_numbers<[1], [0], [0], [1], [0, 0, 1, 1], [], []>} : vector<8x32xbf16>, vector<32x128xbf16>, vector<8x128xf32> -> vector<8x128xf32>
    %214 = arith.addf %178, %213 : vector<8x128xf32>
    %215 = vector.shape_cast %214 : vector<8x128xf32> to vector<1x8x128xf32>
    %c0_70 = arith.constant 0 : index
    %c0_71 = arith.constant 0 : index
    %c0_72 = arith.constant 0 : index
    %216 = vector.load %arg7[%c0_70, %c0_71, %c0_72] : memref<1x8x128xf32, #tpu.memory_space<vmem>>, vector<1x8x128xf32>
    tpu.vector_store %arg7[%c0_70, %c0_71, %c0_72], %215 {strides = array<i32>} : memref<1x8x128xf32, #tpu.memory_space<vmem>>, vector<1x8x128xf32>,
    return
  }
  func.func @transform_0(%arg0: i32) -> (i32, i32, i32) {
    %c0_i32 = arith.constant 0 : i32
    %c0_i32_0 = arith.constant 0 : i32
    %c0_i32_1 = arith.constant 0 : i32
    return %arg0, %c0_i32, %c0_i32_0 : i32, i32, i32
  }
  func.func @transform_1(%arg0: i32) -> (i32, i32, i32) {
    %c0_i32 = arith.constant 0 : i32
    %c0_i32_0 = arith.constant 0 : i32
    %c0_i32_1 = arith.constant 0 : i32
    return %arg0, %c0_i32, %c0_i32_0 : i32, i32, i32
  }
  func.func @transform_2(%arg0: i32) -> (i32, i32) {
    %c0_i32 = arith.constant 0 : i32
    %c0_i32_0 = arith.constant 0 : i32
    %c0_i32_1 = arith.constant 0 : i32
    return %c0_i32, %c0_i32_0 : i32, i32
  }
  func.func @transform_3(%arg0: i32) -> (i32, i32) {
    %c0_i32 = arith.constant 0 : i32
    %c0_i32_0 = arith.constant 0 : i32
    %c0_i32_1 = arith.constant 0 : i32
    return %c0_i32, %c0_i32_0 : i32, i32
  }
  func.func @transform_4(%arg0: i32) -> (i32, i32) {
    %c0_i32 = arith.constant 0 : i32
    %c0_i32_0 = arith.constant 0 : i32
    %c0_i32_1 = arith.constant 0 : i32
    return %c0_i32, %c0_i32_0 : i32, i32
  }
  func.func @transform_5(%arg0: i32) -> (i32, i32) {
    %c0_i32 = arith.constant 0 : i32
    %c0_i32_0 = arith.constant 0 : i32
    %c0_i32_1 = arith.constant 0 : i32
    return %c0_i32, %c0_i32_0 : i32, i32
  }
  func.func @transform_6(%arg0: i32) -> (i32, i32, i32) {
    %c0_i32 = arith.constant 0 : i32
    %c0_i32_0 = arith.constant 0 : i32
    %c0_i32_1 = arith.constant 0 : i32
    return %arg0, %c0_i32, %c0_i32_0 : i32, i32, i32
  }
}

</mosaic_0001>

<bundles_post_ra>
// kernel: tpu_custom_call.1
= control target key start
LH: loop header
LB: loop body
LE: loop exit
PB: predicated region body
PF: predicated region fallthrough
CT: control target
= control target key end

     0   :  { %s3207_s0 = inlined_call_operand.hbm [shape: f32[2,16,128], index: 0, kind: input, shape index: {}]   ;;  %s3208_s1 = inlined_call_operand.hbm [shape: f32[2,8,128], index: 1, kind: input, shape index: {}]   ;;  %s3209_s2 = inlined_call_operand.hbm [shape: f32[4,128], index: 2, kind: input, shape index: {}]   ;;  %s3210_s3 = inlined_call_operand.hbm [shape: bf16[128,128], index: 3, kind: input, shape index: {}]   ;;  %s3211_s4 = inlined_call_operand.hbm [shape: bf16[128,256], index: 4, kind: input, shape index: {}]   ;;  %s3212_s5 = inlined_call_operand.hbm [shape: bf16[128,128], index: 5, kind: input, shape index: {}]   ;;  %s3213_s6 = inlined_call_operand.hbm [shape: f32[2,8,128], index: 6, kind: output, shape index: {}]  }
   0x1   :  { %3220 = sst [smem:[#allocation20_spill]] %s3207_s0 }
   0x2   :  { %3221 = sst [smem:[#allocation21_spill]] %s3209_s2 }
   0x3   :  { %3222 = sst [smem:[#allocation22_spill]] %s3210_s3 }
   0x4   :  { %3223 = sst [smem:[#allocation23_spill]] %s3211_s4 }
   0x5   :  { %11 = vsyncpa [#allocation3], 0 }
   0x6   :  { %13 = vsyncpa [#allocation3 + $0x1], 0 }
   0x7   :  { %14 = vsyncpa [#allocation6], 0 }
   0x8   :  { %16 = vsyncpa [#allocation6 + $0x1], 0 }
   0x9   :  { %17 = vsyncpa [#allocation9], 0 }
   0xa   :  { %18 = vsyncpa [#allocation12], 0 }
   0xb   :  { %19 = vsyncpa [#allocation4], 0 }
   0xc   :  { %21 = vsyncpa [#allocation4 + $0x1], 0  ;;  %s2704_s21 = smov 0   ;;  %s2706_s22 = smov 0  }
   0xd   :  { %s2708_s23 = smov 0   ;;  %s2710_s24 = smov 0  }
   0xe LB: > { %s2725_s25 = sadd.s32 4294967295, %s2650_s24   ;;  %s1956_s26 = sadd.s32 4294967294, %s2650_s24   ;;  %s2650_s24 = sphi %s2710_s24, %s3253_s24   ;;  %s2646_s23 = sphi %s2708_s23, %s3252_s23   ;;  %s2642_s22 = sphi %s2706_s22, %s3251_s22   ;;  %s2638_s21 = sphi %s2704_s21, %s3250_s21  }
   0xf   : > { %p47_p0 = scmp.ne.s32.totalorder %s2642_s22, %s2638_s21  ;;  %p3214_p1 = scmp.eq.s32.totalorder %s2725_s25, 0 }
  0x10   : > { %p187_p3 = scmp.eq.s32.totalorder %s1956_s26, 1  ;;  %p1957_p5 = scmp.ge.s32.totalorder %s2650_s24, 1 }
  0x11   : > { %p2734_p4 = por %p3214_p1, %p47_p0  ;;  %p194_p7 = scmp.lt.s32.totalorder %s2650_s24, 3 }
  0x12   : > { %p2739_p6 = por %p187_p3, %p47_p0  ;;  %s2652_s30 = smov [#allocation7]  }
  0x13   : > { %s3224_s27 = scalar_select %p2734_p4, 1, 0 }
  0x14   : > { %s3225_s28 = scalar_select %p2739_p6, 1, 0 }
  0x15   : > { %p2744_p8 = pnand %p1957_p5, %p194_p7  ;;  %s207_s7 = sshll.u32 %s2652_s30, 4  ;;  %s208_s7 = int_to_ptr.vmem [resolvable:$true] %s207_s7 }
  0x16   : > { %s2653_s8 = smov [#allocation8]   ;;  %s2654_s11 = smov [#allocation10]  }
  0x17   : > { %s3226_s29 = scalar_select %p2744_p8, 1, 0 }
  0x18   : > { %p2260_p10 = pneg %p2744_p8  ;;  %s217_s9 = sshll.u32 %s2653_s8, 4  ;;  %s218_s9 = int_to_ptr.vmem [resolvable:$true] %s217_s9 }
  0x19   : > { %s230_s12 = sshll.u32 %s2654_s11, 4  ;;  %s2421_s13 = scalar_lea.vmem %s208_s7, 64  ;;  %s231_s12 = int_to_ptr.vmem [resolvable:$true] %s230_s12 }
  0x1a   : > { %p2753_p11 = pnand %p2260_p10, %p3214_p1  ;;  %p2422_p13 = scmp.ne.s32.totalorder %s208_s7, %s2421_s13 }
  0x1b   : > { %p2429_p5 = scmp.lt.s32.totalorder %s208_s7, %s208_s7  ;;  %p2430_p7 = scmp.lt.s32.totalorder %s2421_s13, %s2421_s13 }
  0x1c   : > { %p2412_p12 = pneg %p2753_p11 }
  0x1d   : > { %p2431_p9 = por %p2430_p7, %p2429_p5 }
  0x1e   : > { %p2424_p0 = pnand %p2422_p13, %p2412_p12 }
  0x20   : > { %p2425_p3 = pneg %p2424_p0 }
  0x22   : > { %p2432_p10 = pnand %p2431_p9, %p2425_p3 }
  0x24   : > { %2435 = shalt.err (!%p2432_p10)
}
  0x25   : > { %s3228_s2 = sld [smem:[#allocation21_spill]]  ;;  %s2447_s16 = scalar_lea.vmem %s218_s9, 1024 }
  0x26   : > { %p2448_p1 = scmp.ne.s32.totalorder %s218_s9, %s2447_s16  ;;  %p2455_p13 = scmp.lt.s32.totalorder %s218_s9, %s218_s9 }
  0x27   : > { %p2456_p0 = scmp.lt.s32.totalorder %s2447_s16, %s2447_s16 }
  0x28   : > { %p2450_p2 = pnand %p2448_p1, %p2412_p12 }
  0x29   : > { %p2457_p4 = por %p2456_p0, %p2455_p13 }
  0x2a   : > { %p2451_p6 = pneg %p2450_p2 }
  0x2b   : > { %2263 = dma.hbm_to_vmem [thread:$0]  (!%p2753_p11), %s3228_s2, 64, %s208_s7, [#allocation6]  }
  0x2c   : > { %p2458_p8 = pnand %p2457_p4, %p2451_p6 }
  0x2e   : > { %2461 = shalt.err (!%p2458_p8)
}
  0x2f   : > { %s2655_s17 = smov 64   ;;  %s2656_s18 = smov 4  }
  0x30   : > { %s3229_s3 = sld [smem:[#allocation22_spill]]  ;;  %s2473_s26 = scalar_lea.vmem %s231_s12, 2048 }
  0x31   : > { %p2474_p1 = scmp.ne.s32.totalorder %s231_s12, %s2473_s26  ;;  %p2481_p6 = scmp.lt.s32.totalorder %s231_s12, %s231_s12 }
  0x32   : > { %p2482_p8 = scmp.lt.s32.totalorder %s2473_s26, %s2473_s26 }
  0x33   : > { %p2476_p2 = pnand %p2474_p1, %p2412_p12 }
  0x34   : > { %p2483_p9 = por %p2482_p8, %p2481_p6 }
  0x35   : > { %p2477_p4 = pneg %p2476_p2 }
  0x36   : > { %2266 = dma.hbm_to_vmem [thread:$0]  (!%p2753_p11), %s3229_s3, 1024, %s218_s9, [#allocation9], %s2655_s17, %s2655_s17, %s2656_s18  }
  0x37   : > { %p2484_p3 = pnand %p2483_p9, %p2477_p4 }
  0x39   : > { %2487 = shalt.err (!%p2484_p3)
}
  0x3a   : > { %s3217_s30 = smov 128   ;;  %s3218_s7 = smov 8  }
  0x3b   : > { %s3230_s4 = sld [smem:[#allocation23_spill]]  ;;  %s2659_s11 = smov [#allocation11]  }
  0x3c   : > { %s243_s13 = sshll.u32 %s2659_s11, 4  ;;  %s244_s13 = int_to_ptr.vmem [resolvable:$true] %s243_s13 }
  0x3d   : > { %s2499_s14 = scalar_lea.vmem %s244_s13, 1024  ;;  %p2507_p13 = scmp.lt.s32.totalorder %s244_s13, %s244_s13 }
  0x3e   : > { %p2500_p5 = scmp.ne.s32.totalorder %s244_s13, %s2499_s14  ;;  %p2508_p0 = scmp.lt.s32.totalorder %s2499_s14, %s2499_s14 }
  0x40   : > { %p2502_p7 = pnand %p2500_p5, %p2412_p12  ;;  %p2509_p1 = por %p2508_p0, %p2507_p13 }
  0x41   : > { %2269 = dma.hbm_to_vmem [thread:$0]  (!%p2753_p11), %s3230_s4, 2048, %s231_s12, [#allocation9], %s3217_s30, %s3217_s30, %s3218_s7  }
  0x42   : > { %p2503_p10 = pneg %p2502_p7 }
  0x44   : > { %p2510_p2 = pnand %p2509_p1, %p2503_p10 }
  0x46   : > { %2513 = shalt.err (!%p2510_p2)
}
  0x47   : > { %2272 = dma.hbm_to_vmem [thread:$0]  (!%p2753_p11), %s3212_s5, 1024, %s244_s13, [#allocation12], %s2655_s17, %s2655_s17, %s2656_s18  }
  0x48   : > { %s2801_s16 = sadd.s32 1, %s2650_s24   ;;  %s34_s10 = sadd.s32 1, %s2646_s23 }
  0x49   : > { %s31_s19 = ssub.s32 %s2650_s24, %s2801_s16  ;;  %p41_p12 = scmp.ne.s32.totalorder %s2646_s23, %s2642_s22 }
  0x4a   : > { %p32_p4 = scmp.eq.s32.totalorder %s31_s19, 0  ;;  %p42_p6 = scmp.eq.s32.totalorder %s2650_s24, 0 }
  0x4b   : > { %p3231_p8 = scmp.eq.s32.totalorder %s2725_s25, 1  ;;  %p2288_p3 = scmp.lt.s32.totalorder %s2650_s24, 2 }
  0x4c   : > { %s2817_s26 = scalar_select %p32_p4, %s2646_s23, %s34_s10  }
  0x4d   : > { %p2811_p9 = por %p3231_p8, %p41_p12  ;;  %p43_p5 = por %p42_p6, %p41_p12 }
  0x4e   : > { %s2820_s8 = sand.u32 1, %s2646_s23   ;;  %s2036_s18 = sshll.u32 %s2650_s24, 8 }
  0x4f   : > { %s3232_s20 = scalar_select %p2811_p9, 1, 0 }
  0x50   : > { %s1963_s17 = sshll.u32 %s2820_s8, 4  ;;  %s3233_s0 = sld [smem:[#allocation20_spill]] }
  0x51   : > { %s261_s14 = scalar_lea.vmem [#allocation2], %s1963_s17  ;;  %p2831_p11 = pnand %p2288_p3, %p43_p5 }
  0x52   : > { %s268_s12 = sshll.u32 %s261_s14, 4  ;;  %s258_s30 = scalar_lea.sflag [#allocation3], %s2820_s8  ;;  %s2829_s12 = int_to_ptr.vmem [resolvable:$true] %s268_s12 }
  0x53   : > { %p2516_p10 = pneg %p2831_p11 }
  0x56   : > { %s2827_s13 = scalar_lea.hbm %s3233_s0, %s2036_s18  ;;  %s2519_s9 = scalar_lea.hbm %s3233_s0, 512 }
  0x57   : > { %s2514_s7 = scalar_lea.hbm %s2827_s13, 256  ;;  %p2520_p1 = scmp.lt.s32.totalorder %s2827_s13, %s3233_s0 }
  0x58   : > { %p2515_p7 = scmp.ne.s32.totalorder %s2827_s13, %s2514_s7  ;;  %p2521_p2 = scmp.lt.s32.totalorder %s2519_s9, %s2514_s7 }
  0x5a   : > { %p2517_p13 = pnand %p2516_p10, %p2515_p7  ;;  %p2522_p12 = por %p2521_p2, %p2520_p1 }
  0x5c   : > { %p2518_p0 = pneg %p2517_p13 }
  0x5e   : > { %p2523_p4 = pnand %p2522_p12, %p2518_p0 }
  0x60   : > { %2526 = shalt.err (!%p2523_p4)
}
  0x61   : > { %s2527_s10 = scalar_lea.vmem %s2829_s12, 256  ;;  %s2660_s17 = smov [#allocation2]  }
  0x62   : > { %p2528_p6 = scmp.ne.s32.totalorder %s2829_s12, %s2527_s10  ;;  %s2532_s18 = sshll.u32 %s2660_s17, 4  ;;  %s2533_s18 = int_to_ptr.vmem [resolvable:$false] %s2532_s18 }
  0x63   : > { %s2534_s19 = scalar_lea.vmem %s2533_s18, 512  ;;  %p2535_p5 = scmp.lt.s32.totalorder %s2829_s12, %s2533_s18 }
  0x64   : > { %p2530_p8 = pnand %p2528_p6, %p2516_p10  ;;  %p2536_p7 = scmp.lt.s32.totalorder %s2534_s19, %s2527_s10 }
  0x66   : > { %p2531_p3 = pneg %p2530_p8  ;;  %p2537_p13 = por %p2536_p7, %p2535_p5 }
  0x68   : > { %p2538_p1 = pnand %p2537_p13, %p2531_p3 }
  0x6a   : > { %2541 = shalt.err (!%p2538_p1)
}
  0x6b   : > { %s3235_s7 = smov 8   ;;  %s3236_s9 = smov 128  }
  0x6c   : > { %2276 = dma.hbm_to_vmem [thread:$0]  (!%p2831_p11), %s2827_s13, 256, %s2829_s12, %s258_s30, %s3236_s9, %s3236_s9, %s3235_s7  }
  0x6d   : > { %s1967_s11 = sshll.u32 %s2650_s24, 7  ;;  %s3237_s17 = sshll.u32 %s2820_s8, 3 }
  0x6e   : > { %s2871_s19 = scalar_lea.hbm %s3208_s1, %s1967_s11  ;;  %s282_s18 = scalar_lea.vmem [#allocation5], %s3237_s17 }
  0x6f   : > { %s289_s0 = sshll.u32 %s282_s18, 4  ;;  %s3238_s2 = sand.u32 1, %s2650_s24   ;;  %s290_s0 = int_to_ptr.vmem [resolvable:$true] %s289_s0 }
  0x70   : > { %s279_s3 = scalar_lea.sflag [#allocation6], %s3238_s2  ;;  %s2542_s4 = scalar_lea.hbm %s2871_s19, 128 }
  0x71   : > { %p2543_p0 = scmp.ne.s32.totalorder %s2871_s19, %s2542_s4  ;;  %s2547_s12 = scalar_lea.hbm %s3208_s1, 256 }
  0x72   : > { %p2548_p4 = scmp.lt.s32.totalorder %s2871_s19, %s3208_s1  ;;  %p2549_p6 = scmp.lt.s32.totalorder %s2547_s12, %s2542_s4 }
  0x73   : > { %p2545_p2 = pnand %p2543_p0, %p2516_p10 }
  0x74   : > { %p2550_p8 = por %p2549_p6, %p2548_p4 }
  0x75   : > { %p2546_p12 = pneg %p2545_p2 }
  0x77   : > { %p2551_p3 = pnand %p2550_p8, %p2546_p12 }
  0x79   : > { %2554 = shalt.err (!%p2551_p3)
}
  0x7a   : > { %s2555_s9 = scalar_lea.vmem %s290_s0, 128  ;;  %s2661_s2 = smov [#allocation5]  }
  0x7b   : > { %p2556_p5 = scmp.ne.s32.totalorder %s290_s0, %s2555_s9  ;;  %s2560_s11 = sshll.u32 %s2661_s2, 4  ;;  %s2561_s11 = int_to_ptr.vmem [resolvable:$false] %s2560_s11 }
  0x7c   : > { %s2562_s14 = scalar_lea.vmem %s2561_s11, 256  ;;  %p2563_p1 = scmp.lt.s32.totalorder %s290_s0, %s2561_s11 }
  0x7d   : > { %p2558_p7 = pnand %p2556_p5, %p2516_p10  ;;  %p2564_p0 = scmp.lt.s32.totalorder %s2562_s14, %s2555_s9 }
  0x7f   : > { %p2559_p13 = pneg %p2558_p7  ;;  %p2565_p2 = por %p2564_p0, %p2563_p1 }
  0x81   : > { %p2566_p9 = pnand %p2565_p2, %p2559_p13 }
  0x83   : > { %2569 = shalt.err (!%p2566_p9)
}
  0x84   : > { %2279 = dma.hbm_to_vmem [thread:$0]  (!%p2831_p11), %s2871_s19, 128, %s290_s0, %s279_s3  }
  0x85   : > { %p3239_p12 = scmp.ne.s32.totalorder %s3226_s29, 0 }
  0x86   : > { %s2898_s4 = sand.u32 (!%p3239_p12), 1, %s2642_s22   ;;  %p3240_p10 = scmp.ne.s32.totalorder (!%p3239_p12), %s3224_s27, 0 }
  0x87   : > { %298 = sbr.rel (%p3239_p12) target bundleno = 2966 (0xb96), region = 44  ;;  %s1969_s10 = sshll.u32 (!%p3239_p12), %s2898_s4, 4 }
  0x88   : > { %s301_s17 = scalar_lea.sflag (!%p3239_p12), [#allocation3], %s2898_s4  ;;  %s304_s18 = scalar_lea.vmem (!%p3239_p12), [#allocation2], %s1969_s10 }
  0x8c   : > { %2613 = dma.done.wait (%p3240_p10), %s301_s17, 256  }
  0x8d   : > { %2615 = vsyncadd (%p3240_p10), %s301_s17, 4294967040  ;;  %s309_s0 = sand.u32 1, %s2725_s25   ;;  %s1970_s3 = sshll.u32 %s2898_s4, 3 }
  0x8e   : > { %s310_s29 = scalar_lea.sflag [#allocation6], %s309_s0  ;;  %s313_s15 = scalar_lea.vmem [#allocation5], %s1970_s3 }
  0x8f   : > { %2617 = dma.done.wait (%p3240_p10), %s310_s29, 128  }
  0x90   : > { %2619 = vsyncadd (%p3240_p10), %s310_s29, 4294967168  ;;  %p3241_p9 = scmp.eq.s32.totalorder %s2725_s25, 0 }
  0x92   : > { %2621 = dma.done.wait (%p3241_p9), [#allocation6], 64   ;;  %p3242_p11 = pmov %p3241_p9 }
  0x93   : > { %p3243_p4 = pmov %p3241_p9 }
  0x94   : > { %2623 = vsyncadd (%p3242_p11), [#allocation6], 4294967232 }
  0x95   : > { %2625 = dma.done.wait (%p3243_p4), [#allocation9], 3072   ;;  %p3244_p6 = pmov %p3243_p4 }
  0x96   : > { %p3245_p8 = pmov %p3243_p4 }
  0x97   : > { %2627 = vsyncadd (%p3244_p6), [#allocation9], 4294964224 }
  0x98   : > { %2629 = dma.done.wait (%p3245_p8), [#allocation12], 1024   ;;  %p3246_p3 = pmov %p3243_p4 }
  0x99   : > { %v406_v0 = vld [vmem:[%s313_s15] sm:$0xff]  ;;  %v369_v1 = vld [vmem:[%s304_s18 + $0x8] sm:$0xff]  ;;  %v2662_v6 = vmov 0.0   ;;  %vm2663_vm0 = vmmov 0   ;;  %v2664_v35 = vmov 0   ;;  %vm718_vm1 = vcmask 261120  }
  0x9a   : > { %2631 = vsyncadd (%p3246_p3), [#allocation12], 4294966272  ;;  %v368_v2 = vld [vmem:[%s304_s18] sm:$0xff]  ;;  %407 = vadd.xlane.f32.xlu0 %v406_v0  ;;  %372 = vadd.xlane.f32.xlu1 %v369_v1  ;;  %vm836_vm2 = vcmask 1043456   ;;  %vm808_vm3 = vcmask 130048   ;;  %vm812_vm4 = vcmask 64512  }
  0x9b   : > { %v2340_v3 = vld [vmem:[#allocation8 + $0x38] sm:$0xff]   ;;  %2090 = vmatprep.subr.bf16.mxu0 %v2662_v6  ;;  %v2931_v7 = vld [vmem:[#allocation10 + $0x64] ss:$8 sps:$4 sm:$0xff]   ;;  %v2344_v8 = vld [vmem:[#allocation8 + $0x30] sm:$0xff]   ;;  %2106 = vmatprep.mubr.msk.bf16.mxu0 %vm2663_vm0, %v2662_v6  ;;  %s2665_s27 = smov 96   ;;  %s2666_s19 = smov 64  }
  0x9c   : > { %v2926_v4 = vld [vmem:[#allocation10 + $0x74] ss:$8 sps:$4 sm:$0xff]   ;;  %v2928_v5 = vld [vmem:[#allocation10 + $0x70] ss:$8 sps:$4 sm:$0xff]   ;;  %2091 = vmatpush3.bf16.msra.mxu0 %v2340_v3  ;;  %v2936_v9 = vld [vmem:[#allocation10 + $0x60] ss:$8 sps:$4 sm:$0xff]   ;;  %661 = vmatprep.mubr.bf16.mxu1 %v2664_v35 }
  0x9d   : > { %629 = vmatprep.subr.bf16.mxu1 %v2926_v4  ;;  %2092 = vmatprep.subr.bf16.mxu0 %v2662_v6  ;;  %v2348_v22 = vld [vmem:[#allocation8 + $0x28] sm:$0xff]   ;;  %v2953_v23 = vld [vmem:[#allocation10 + $0x54] ss:$8 sps:$4 sm:$0xff]   ;;  %v2955_v24 = vld [vmem:[#allocation10 + $0x50] ss:$8 sps:$4 sm:$0xff]   ;;  %s2667_s30 = smov 32  }
  0x9e   : > { %370 = vadd.xlane.f32.xlu0 %v368_v2  ;;  %630 = vmatpush1.bf16.msra.mxu1 %v2928_v5  ;;  %v2352_v25 = vld [vmem:[#allocation8 + $0x20] sm:$0xff]   ;;  %v2356_v28 = vld [vmem:[#allocation8 + $0x18] sm:$0xff]   ;;  %v2360_v32 = vld [vmem:[#allocation8 + $0x10] sm:$0xff]   ;;  %s2033_s13 = sshll.u32 %s2725_s25, 7  ;;  %s362_s12 = scalar_lea.vmem [#allocation13], %s1970_s3 }
  0x9f   : > { %631 = vmatprep.subr.bf16.mxu1 %v2931_v7  ;;  %v2960_v26 = vld [vmem:[#allocation10 + $0x44] ss:$8 sps:$4 sm:$0xff]   ;;  %v2962_v27 = vld [vmem:[#allocation10 + $0x40] ss:$8 sps:$4 sm:$0xff]   ;;  %v2357_v29 = vld [vmem:[#allocation10 + $0x34] ss:$8 sps:$4 sm:$0xff]   ;;  %s3164_s2 = scalar_lea.hbm %s3213_s6, %s2033_s13 }
  0xa0   : > { %2093 = vmatpush3.bf16.msra.mxu0 %v2344_v8  ;;  %v2967_v30 = vld [vmem:[#allocation10 + $0x30] ss:$8 sps:$4 sm:$0xff]   ;;  %v2969_v31 = vld [vmem:[#allocation10 + $0x24] ss:$8 sps:$4 sm:$0xff]   ;;  %v2363_v33 = vld [vmem:[#allocation10 + $0x20] ss:$8 sps:$4 sm:$0xff]  }
  0xa1   : > { %2094 = vmatprep.subr.bf16.mxu0 %v2662_v6  ;;  %v2365_v34 = vld [vmem:[#allocation10 + $0x14] ss:$8 sps:$4 sm:$0xff]   ;;  %v2364_v36 = vld [vmem:[#allocation8 + $0x8] sm:$0xff]   ;;  %v2367_v37 = vld [vmem:[#allocation10 + $0x10] ss:$8 sps:$4 sm:$0xff]   ;;  %s1825_s7 = sshll.u32 %s362_s12, 4  ;;  %s3166_s7 = int_to_ptr.vmem [resolvable:$true] %s1825_s7 }
  0xa2   : > { %632 = vmatpush1.bf16.msra.mxu1 %v2936_v9  ;;  %v2369_v38 = vld [vmem:[#allocation10 + $0x4] ss:$8 sps:$4 sm:$0xff]   ;;  %v2371_v40 = vld [vmem:[#allocation10] ss:$8 sps:$4 sm:$0xff]   ;;  %v1978_v47 = vld [vmem:[#allocation7 + $0x2] ss:$0 sm:$0xff] }
  0xa3   : > { %633 = vmatprep.subr.bf16.mxu1 %v2953_v23  ;;  %v2368_v39 = vld [vmem:[#allocation8] sm:$0xff]   ;;  %v1979_v50 = vld [vmem:[#allocation7 + $0x3] ss:$0 sm:$0xff]  ;;  %v1976_v61 = vld [vmem:[#allocation7] ss:$0 sm:$0xff]  ;;  %s1812_s25 = scalar_lea.sflag [#allocation4], %s2898_s4 }
  0xa4   : > { %2095 = vmatpush3.bf16.msra.mxu0 %v2348_v22  ;;  %s2570_s11 = scalar_lea.vmem %s3166_s7, 128  ;;  %p3247_p7 = scmp.ne.s32.totalorder %s3232_s20, 0 }
  0xa5   : > { %2096 = vmatprep.subr.bf16.mxu0 %v2662_v6  ;;  %p2571_p5 = scmp.ne.s32.totalorder %s3166_s7, %s2570_s11  ;;  %s2668_s14 = smov [#allocation13]  }
  0xa6   : > { %634 = vmatpush1.bf16.msra.mxu1 %v2955_v24  ;;  %s2574_s10 = sshll.u32 %s2668_s14, 4  ;;  %s2575_s10 = int_to_ptr.vmem [resolvable:$false] %s2574_s10 }
  0xa7   : > { %635 = vmatprep.subr.bf16.mxu1 %v2960_v26  ;;  %p2572_p13 = pnand %p2571_p5, %p3247_p7  ;;  %s2576_s17 = scalar_lea.vmem %s2575_s10, 256 }
  0xa8   : > { %2097 = vmatpush3.bf16.msra.mxu0 %v2352_v25  ;;  %p2577_p0 = scmp.lt.s32.totalorder %s3166_s7, %s2575_s10  ;;  %p2578_p2 = scmp.lt.s32.totalorder %s2576_s17, %s2570_s11 }
  0xa9   : > { %2098 = vmatprep.subr.bf16.mxu0 %v2662_v6  ;;  %p2573_p1 = pneg %p2572_p13 }
  0xaa   : > { %636 = vmatpush1.bf16.msra.mxu1 %v2962_v27  ;;  %p2579_p12 = por %p2578_p2, %p2577_p0 }
  0xab   : > { %637 = vmatprep.subr.bf16.mxu1 %v2357_v29 }
  0xac   : > { %2099 = vmatpush3.bf16.msra.mxu0 %v2356_v28  ;;  %p2580_p10 = pnand %p2579_p12, %p2573_p1 }
  0xad   : > { %2100 = vmatprep.subr.bf16.mxu0 %v2662_v6 }
  0xae   : > { %638 = vmatpush1.bf16.msra.mxu1 %v2967_v30 }
  0xaf   : > { %639 = vmatprep.subr.bf16.mxu1 %v2969_v31 }
  0xb0   : > { %2101 = vmatpush3.bf16.msra.mxu0 %v2360_v32 }
  0xb1   : > { %2102 = vmatprep.subr.bf16.mxu0 %v2662_v6 }
  0xb2   : > { %640 = vmatpush1.bf16.msra.mxu1 %v2363_v33 }
  0xb3   : > { %641 = vmatprep.subr.bf16.mxu1 %v2365_v34 }
  0xb4   : > { %2103 = vmatpush3.bf16.msra.mxu0 %v2364_v36 }
  0xb5   : > { %2104 = vmatprep.subr.bf16.mxu0 %v2662_v6 }
  0xb6   : > { %642 = vmatpush1.bf16.msra.mxu1 %v2367_v37 }
  0xb7   : > { %643 = vmatprep.subr.bf16.mxu1 %v2369_v38 }
  0xb8   : > { %2105 = vmatpush3.bf16.msra.mxu0 %v2368_v39 }
  0xb9   : > { %670 = vmatprep.subr.bf16.mxu0 %v2926_v4 }
  0xba   : > { %644 = vmatpush1.bf16.msra.mxu1 %v2371_v40 }
  0xbb   : > { %2110 = vmatprep.subr.bf16.mxu1 %v2662_v6 }
 0x123   : > { %v408_v10 = vpop.xlane.xlu0 %407  ;;  %v373_v11 = vpop.xlane.xlu1 %372 }
 0x124   : > { %v409_v12 = vmul.f32 0.0078125, %v408_v10  ;;  %v376_v13 = vmul.f32 0.0078125, %v373_v11 }
 0x126   : > { %v2941_v14 = vsub.f32 %v406_v0, %v409_v12  ;;  %v2943_v15 = vsub.f32 %v369_v1, %v376_v13  ;;  %v1977_v0 = vld [vmem:[#allocation7 + $0x1] ss:$0 sm:$0xff] }
 0x127   : > { %v371_v16 = vpop.xlane.xlu0 %370 }
 0x128   : > { %v375_v17 = vmul.f32 0.0078125, %v371_v16  ;;  %v411_v18 = vmul.f32 %v2941_v14, %v2941_v14  ;;  %v380_v20 = vmul.f32 %v2943_v15, %v2943_v15 }
 0x12a   : > { %v2947_v19 = vsub.f32 %v368_v2, %v375_v17  ;;  %412 = vadd.xlane.f32.xlu1 %v411_v18 }
 0x12c   : > { %v379_v21 = vmul.f32 %v2947_v19, %v2947_v19 }
 0x12e   : > { %383 = vadd.xlane.f32.xlu1 %v380_v20  ;;  %381 = vadd.xlane.f32.xlu0 %v379_v21 }
 0x1b3   : > { %v413_v41 = vpop.xlane.xlu1 %412 }
 0x1b4   : > { %v414_v42 = vmul.f32 0.0078125, %v413_v41 }
 0x1b6   : > { %v415_v43 = vadd.f32 1e-05, %v414_v42 }
 0x1b7   : > { %v384_v44 = vpop.xlane.xlu1 %383  ;;  %v382_v46 = vpop.xlane.xlu0 %381 }
 0x1b8   : > { %2380 = vrsqrt.f32 %v415_v43  ;;  %v386_v49 = vmul.f32 0.0078125, %v384_v44  ;;  %v385_v51 = vmul.f32 0.0078125, %v382_v46 }
 0x1ba   : > { %v388_v54 = vadd.f32 1e-05, %v386_v49  ;;  %v387_v55 = vadd.f32 1e-05, %v385_v51 }
 0x1bc   : > { %2382 = vrsqrt.f32 %v388_v54 }
 0x1bd   : > { %2384 = vrsqrt.f32 %v387_v55 }
 0x1c5   : > { %v2381_v45 = vpop.eup %2380 }
 0x1c6   : > { %v417_v48 = vmul.f32 %v2381_v45, %v2941_v14 }
 0x1c8   : > { %v422_v52 = vmul.f32 %v1978_v47, %v417_v48 }
 0x1c9   : > { %v2383_v57 = vpop.eup %2382 }
 0x1ca   : > { %v427_v53 = vadd.f32 %v1979_v50, %v422_v52  ;;  %v2385_v58 = vpop.eup %2384  ;;  %v392_v60 = vmul.f32 %v2383_v57, %v2943_v15 }
 0x1cb   : > { %v391_v59 = vmul.f32 %v2385_v58, %v2947_v19 }
 0x1cc   : > { %v428_v56 = vpack.c.bf16 %v427_v53, %v427_v53  ;;  %v398_v63 = vmul.f32 %v1976_v61, %v392_v60 }
 0x1cd   : > { %v397_v62 = vmul.f32 %v1976_v61, %v391_v59 }
 0x1ce   : > { %2107 = vmatmul.mubr.bf16.vlgmr.msra.gmra.mxu0 %v428_v56  ;;  %662 = vmatmul.mubr.bf16.vlgmr.msra.gmra.mxu1 %v428_v56  ;;  %v404_v2 = vadd.f32 %v1977_v0, %v398_v63 }
 0x1cf   : > { %671 = vmatpush1.bf16.msra.mxu0 %v2928_v5  ;;  %702 = vmatprep.mubr.bf16.mxu0 %v2664_v35  ;;  %v403_v1 = vadd.f32 %v1977_v0, %v397_v62 }
 0x1d0   : > { %672 = vmatprep.subr.bf16.mxu0 %v2931_v7  ;;  %2112 = vmatprep.mubr.msk.bf16.mxu1 %vm2663_vm0, %v2662_v6 }
 0x1d1   : > { %v405_v3 = vpack.c.bf16 %v404_v2, %v403_v1 }
 0x1d3   : > { %673 = vmatpush1.bf16.msra.mxu0 %v2936_v9 }
 0x1d4   : > { %674 = vmatprep.subr.bf16.mxu0 %v2953_v23 }
 0x1d7   : > { %675 = vmatpush1.bf16.msra.mxu0 %v2955_v24 }
 0x1d8   : > { %676 = vmatprep.subr.bf16.mxu0 %v2960_v26 }
 0x1db   : > { %677 = vmatpush1.bf16.msra.mxu0 %v2962_v27 }
 0x1dc   : > { %678 = vmatprep.subr.bf16.mxu0 %v2357_v29 }
 0x1df   : > { %679 = vmatpush1.bf16.msra.mxu0 %v2967_v30 }
 0x1e0   : > { %680 = vmatprep.subr.bf16.mxu0 %v2969_v31 }
 0x1e3   : > { %681 = vmatpush1.bf16.msra.mxu0 %v2363_v33 }
 0x1e4   : > { %682 = vmatprep.subr.bf16.mxu0 %v2365_v34 }
 0x1e7   : > { %683 = vmatpush1.bf16.msra.mxu0 %v2367_v37 }
 0x1e8   : > { %684 = vmatprep.subr.bf16.mxu0 %v2369_v38 }
 0x1eb   : > { %685 = vmatpush1.bf16.msra.mxu0 %v2371_v40 }
 0x1ec   : > { %2134 = vmatprep.subr.bf16.mxu0 %v2662_v6 }
 0x1ee   : > { %703 = vmatmul.mubr.bf16.vlgmr.msra.gmra.mxu0 %v405_v3 }
 0x1ef   : > { %2136 = vmatprep.mubr.msk.bf16.mxu0 %vm2663_vm0, %v2662_v6 }
 0x28e   : > { %v527_v4 = vpop.f32.mrf.mxu0  ;;  %v663_v5 = vpop.f32.mrf.mxu1 }
 0x28f   : > { %v3002_v18 = vpack.c.bf16 %v663_v5, %v663_v5  ;;  %v3004_v19 = vpack.c.bf16 %v527_v4, %v527_v4 }
 0x290   : > { %v2108_v7 = vpop.f32.mrf.mxu0  ;;  %v665_v8 = vpop.f32.mrf.mxu1 }
 0x291   : > { %v766_v20 = vsel %vm718_vm1, %v3002_v18, 0  ;;  %v3013_v21 = vpack.c.bf16 %v665_v8, %v665_v8 }
 0x292   : > { %v530_v9 = vpop.f32.mrf.mxu0  ;;  %v667_v10 = vpop.f32.mrf.mxu1 }
 0x293   : > { %v838_v22 = vsel %vm836_vm2, %v3013_v21, 0 }
 0x294   : > { %v2109_v11 = vpop.f32.mrf.mxu0  ;;  %v668_v12 = vpop.f32.mrf.mxu1 }
 0x2ae   : > { %v704_v13 = vpop.f32.mrf.mxu0 }
 0x2b0   : > { %v706_v14 = vpop.f32.mrf.mxu0 }
 0x2b2   : > { %v708_v15 = vpop.f32.mrf.mxu0 }
 0x2b3   : > { %v2997_v16 = vpack.c.bf16 %v708_v15, %v704_v13 }
 0x2b4   : > { %v710_v44 = vpop.f32.mrf.mxu0 }
 0x2b5   : > { %v723_v17 = vsel %vm718_vm1, %v2997_v16, 0  ;;  %v3035_v47 = vpack.c.bf16 %v710_v44, %v706_v14 }
 0x2b6   : > { %2111 = vmatpush3.bf16.xpose.msra.mxu1 %v723_v17 }
 0x2b7   : > { %2116 = vmatprep.subr.bf16.mxu1 %v2662_v6 }
 0x2bd   : > { %2113 = vmatmul.mubr.msk.bf16.vlgmr.msra.gmra.mxu1 %vm718_vm1, %v3004_v19 }
 0x2be   : > { %2117 = vmatpush3.bf16.xpose.msra.mxu1 %v766_v20  ;;  %2118 = vmatprep.mubr.msk.bf16.mxu1 %vm2663_vm0, %v2662_v6 }
 0x2bf   : > { %2122 = vmatprep.subr.bf16.mxu1 %v2662_v6 }
 0x2c5   : > { %2119 = vmatmul.mubr.msk.bf16.vlgmr.msra.gmra.mxu1 %vm718_vm1, %v3004_v19 }
 0x2c6   : > { %2123 = vmatpush3.bf16.msra.mxu1 %v838_v22  ;;  %2124 = vmatprep.mubr.msk.bf16.mxu1 %vm2663_vm0, %v2662_v6 }
 0x2c7   : > { %2128 = vmatprep.subr.bf16.mxu1 %v2662_v6 }
 0x37d   : > { %v759_v23 = vpop.f32.mrf.mxu1 }
 0x37e   : > { %v809_v24 = vsel %vm808_vm3, %v759_v23, -inf }
 0x37f   : > { %810 = vmax.xlane.f32.xlu0 %v809_v24  ;;  %v2114_v25 = vpop.f32.mrf.mxu1  ;;  %v2372_v24 = vld [vmem:[#allocation11 + $0x8] sm:$0xff]  }
 0x381   : > { %v762_v26 = vpop.f32.mrf.mxu1 }
 0x383   : > { %v2115_v27 = vpop.f32.mrf.mxu1 }
 0x385   : > { %v802_v28 = vpop.f32.mrf.mxu1 }
 0x386   : > { %v813_v29 = vsel %vm812_vm4, %v802_v28, -inf }
 0x387   : > { %814 = vmax.xlane.f32.xlu1 %v813_v29  ;;  %v2120_v30 = vpop.f32.mrf.mxu1  ;;  %v2373_v29 = vld [vmem:[#allocation11] sm:$0xff]  }
 0x389   : > { %v805_v31 = vpop.f32.mrf.mxu1 }
 0x38a   : > { %v2374_v31 = vld [vmem:[#allocation11 + $0x18] sm:$0xff]  }
 0x38b   : > { %v2121_v32 = vpop.f32.mrf.mxu1 }
 0x395   : > { %933 = vrot.lane.b32.xlu0 %v2997_v16, %s2665_s27 }
 0x398   : > { %982 = vrot.lane.b32.xlu1 %v3002_v18, %s2665_s27 }
 0x39c   : > { %930 = vrot.lane.b32.xlu1 %v3004_v19, %s2665_s27 }
 0x408   : > { %v811_v33 = vpop.xlane.xlu0 %810 }
 0x40c   : > { %v934_v34 = vpop.permute.xlu0 %933 }
 0x40d   : > { %v939_v35 = vsel %vm718_vm1, %v934_v34, 0 }
 0x40e   : > { %2135 = vmatpush3.bf16.xpose.msra.mxu0 %v939_v35 }
 0x40f   : > { %2146 = vmatprep.subr.bf16.mxu0 %v2662_v6 }
 0x410   : > { %v815_v36 = vpop.xlane.xlu1 %814 }
 0x411   : > { %v816_v37 = vmax.f32 %v811_v33, %v815_v36 }
 0x413   : > { %v820_v38 = vsub.f32 %v802_v28, %v816_v37  ;;  %v817_v41 = vsub.f32 %v759_v23, %v816_v37 }
 0x414   : > { %v983_v39 = vpop.permute.xlu1 %982 }
 0x415   : > { %v821_v40 = vmul.f32 1.442695, %v820_v38  ;;  %v818_v43 = vmul.f32 1.442695, %v817_v41  ;;  %v985_v50 = vsel %vm718_vm1, %v983_v39, 0  ;;  %v2375_v38 = vld [vmem:[#allocation11 + $0x10] sm:$0xff]  }
 0x417   : > { %2386 = vpow2.f32 %v821_v40 }
 0x418   : > { %v931_v42 = vpop.permute.xlu1 %930  ;;  %2388 = vpow2.f32 %v818_v43 }
 0x419   : > { %2137 = vmatmul.mubr.msk.bf16.vlgmr.msra.gmra.mxu0 %vm718_vm1, %v931_v42 }
 0x41a   : > { %2148 = vmatprep.mubr.msk.bf16.mxu0 %vm2663_vm0, %v2662_v6 }
 0x424   : > { %v2387_v45 = vpop.eup %2386 }
 0x425   : > { %v832_v46 = vpack.c.bf16 %v2387_v45, %v2387_v45  ;;  %v2389_v48 = vpop.eup %2388  ;;  %v826_v8 = vsel %vm812_vm4, %v2387_v45, 0.0 }
 0x426   : > { %v831_v49 = vpack.c.bf16 %v2389_v48, %v2389_v48  ;;  %v823_v7 = vsel %vm808_vm3, %v2389_v48, 0.0 }
 0x427   : > { %2125 = vmatmul.mubr.msk.bf16.vlgmr.msra.gmra.mxu1 %vm812_vm4, %v832_v46 }
 0x428   : > { %2129 = vmatpush3.bf16.msra.mxu1 %v3035_v47  ;;  %2130 = vmatprep.mubr.msk.bf16.mxu1 %vm2663_vm0, %v2662_v6 }
 0x429   : > { %2140 = vmatprep.subr.bf16.mxu1 %v2662_v6 }
 0x42f   : > { %2131 = vmatmul.mubr.msk.bf16.vlgmr.msra.gmra.mxu1 %vm808_vm3, %v831_v49 }
 0x430   : > { %2141 = vmatpush3.bf16.xpose.msra.mxu1 %v985_v50  ;;  %2142 = vmatprep.mubr.msk.bf16.mxu1 %vm2663_vm0, %v2662_v6 }
 0x431   : > { %2152 = vmatprep.subr.bf16.mxu1 %v2662_v6 }
 0x437   : > { %2143 = vmatmul.mubr.msk.bf16.vlgmr.msra.gmra.mxu1 %vm718_vm1, %v931_v42 }
 0x438   : > { %2154 = vmatprep.mubr.msk.bf16.mxu1 %vm2663_vm0, %v2662_v6 }
 0x4d9   : > { %v975_v51 = vpop.f32.mrf.mxu0 }
 0x4da   : > { %v1027_v52 = vsel %vm808_vm3, %v975_v51, -inf }
 0x4db   : > { %1028 = vmax.xlane.f32.xlu1 %v1027_v52  ;;  %v2138_v53 = vpop.f32.mrf.mxu0 }
 0x4dd   : > { %v978_v54 = vpop.f32.mrf.mxu0 }
 0x4df   : > { %v2139_v55 = vpop.f32.mrf.mxu0 }
 0x4e7   : > { %v874_v56 = vpop.f32.mrf.mxu1 }
 0x4e9   : > { %v2126_v57 = vpop.f32.mrf.mxu1 }
 0x4eb   : > { %v877_v58 = vpop.f32.mrf.mxu1 }
 0x4ec   : > { %1100 = vrot.lane.b32.xlu1 %v3035_v47, %s2665_s27 }
 0x4ed   : > { %v2127_v59 = vpop.f32.mrf.mxu1 }
 0x4ef   : > { %v917_v60 = vpop.f32.mrf.mxu1 }
 0x4f0   : > { %v918_v61 = vadd.f32 %v917_v60, %v874_v56 }
 0x4f1   : > { %v2132_v62 = vpop.f32.mrf.mxu1 }
 0x4f3   : > { %v920_v63 = vpop.f32.mrf.mxu1 }
 0x4f5   : > { %v2133_v0 = vpop.f32.mrf.mxu1 }
 0x4f7   : > { %v1021_v1 = vpop.f32.mrf.mxu1 }
 0x4f8   : > { %v1030_v2 = vsel %vm812_vm4, %v1021_v1, -inf }
 0x4f9   : > { %1031 = vmax.xlane.f32.xlu0 %v1030_v2  ;;  %v2144_v3 = vpop.f32.mrf.mxu1 }
 0x4fb   : > { %v1024_v4 = vpop.f32.mrf.mxu1 }
 0x4fd   : > { %v2145_v5 = vpop.f32.mrf.mxu1 }
 0x50f   : > { %1051 = vrot.lane.b32.xlu0 %v3013_v21, %s2665_s27 }
 0x510   : > { %824 = vadd.xlane.f32.xlu1 %v823_v7 }
 0x521   : > { %1264 = vrot.lane.b32.xlu1 %v2997_v16, %s2666_s19 }
 0x525   : > { %1262 = vrot.lane.b32.xlu1 %v3004_v19, %s2666_s19 }
 0x52e   : > { %827 = vadd.xlane.f32.xlu0 %v826_v8 }
 0x564   : > { %v1029_v9 = vpop.xlane.xlu1 %1028 }
 0x568   : > { %v1101_v10 = vpop.permute.xlu1 %1100 }
 0x569   : > { %2153 = vmatpush3.bf16.msra.mxu1 %v1101_v10 }
 0x56a   : > { %2166 = vmatprep.subr.bf16.mxu1 %v2662_v6 }
 0x582   : > { %v1032_v11 = vpop.xlane.xlu0 %1031 }
 0x583   : > { %v1033_v12 = vmax.f32 %v1029_v9, %v1032_v11 }
 0x585   : > { %v1034_v13 = vsub.f32 %v975_v51, %v1033_v12  ;;  %v1037_v14 = vsub.f32 %v1021_v1, %v1033_v12 }
 0x586   : > { %v1052_v15 = vpop.permute.xlu0 %1051 }
 0x587   : > { %v1035_v17 = vmul.f32 1.442695, %v1034_v13  ;;  %v1038_v20 = vmul.f32 1.442695, %v1037_v14  ;;  %v1057_v22 = vsel %vm836_vm2, %v1052_v15, 0 }
 0x588   : > { %2147 = vmatpush3.bf16.msra.mxu0 %v1057_v22 }
 0x589   : > { %2390 = vpow2.f32 %v1035_v17  ;;  %2158 = vmatprep.subr.bf16.mxu0 %v2662_v6 }
 0x58a   : > { %2392 = vpow2.f32 %v1038_v20 }
 0x596   : > { %v2391_v23 = vpop.eup %2390 }
 0x597   : > { %v2393_v25 = vpop.eup %2392  ;;  %v1040_v26 = vsel %vm808_vm3, %v2391_v23, 0.0  ;;  %v1048_v27 = vpack.c.bf16 %v2391_v23, %v2391_v23 }
 0x598   : > { %1041 = vadd.xlane.f32.xlu0 %v1040_v26  ;;  %v1049_v28 = vpack.c.bf16 %v2393_v25, %v2393_v25  ;;  %v1043_v30 = vsel %vm812_vm4, %v2393_v25, 0.0 }
 0x599   : > { %2155 = vmatmul.mubr.msk.bf16.vlgmr.msra.gmra.mxu1 %vm808_vm3, %v1048_v27  ;;  %v825_v32 = vpop.xlane.xlu1 %824 }
 0x59a   : > { %2149 = vmatmul.mubr.msk.bf16.vlgmr.msra.gmra.mxu0 %vm812_vm4, %v1049_v28  ;;  %2167 = vmatpush3.bf16.msra.mxu1 %v2372_v24 }
 0x59b   : > { %2168 = vmatprep.subr.bf16.mxu1 %v2662_v6  ;;  %2170 = vmatprep.mubr.msk.bf16.mxu1 %vm2663_vm0, %v2662_v6 }
 0x59c   : > { %1044 = vadd.xlane.f32.xlu0 %v1043_v30  ;;  %2162 = vmatprep.mubr.msk.bf16.mxu0 %vm2663_vm0, %v2662_v6 }
 0x59d   : > { %2159 = vmatpush3.bf16.msra.mxu0 %v2374_v31  ;;  %v1265_v43 = vpop.permute.xlu1 %1264 }
 0x59e   : > { %2169 = vmatpush3.bf16.msra.mxu1 %v2373_v29  ;;  %2160 = vmatprep.subr.bf16.mxu0 %v2662_v6  ;;  %v1270_v59 = vsel %vm718_vm1, %v1265_v43, 0 }
 0x59f   : > { %2180 = vmatprep.subr.bf16.mxu1 %v2662_v6 }
 0x5a1   : > { %2161 = vmatpush3.bf16.msra.mxu0 %v2375_v38  ;;  %v1263_v44 = vpop.permute.xlu1 %1262 }
 0x5a2   : > { %2174 = vmatprep.subr.bf16.mxu0 %v2662_v6 }
 0x5b2   : > { %1312 = vrot.lane.b32.xlu0 %v3002_v18, %s2666_s19 }
 0x5b7   : > { %v828_v33 = vpop.xlane.xlu0 %827 }
 0x5b8   : > { %v829_v34 = vadd.f32 %v828_v33, %v825_v32 }
 0x5ba   : > { %2394 = vrcp.f32 %v829_v34 }
 0x5c7   : > { %v2395_v35 = vpop.eup %2394 }
 0x5c8   : > { %v923_v36 = vmul.f32 %v2395_v35, %v918_v61  ;;  %v2376_v35 = vld [vmem:[#allocation11 + $0x28] sm:$0xff]  }
 0x5ca   : > { %v924_v37 = vpack.c.bf16 %v923_v36, %v923_v36  ;;  %v2377_v36 = vld [vmem:[#allocation11 + $0x20] sm:$0xff]  }
 0x5cc   : > { %2171 = vmatmul.mubr.msk.bf16.vlgmr.msra.gmra.mxu1 %vm718_vm1, %v924_v37 }
 0x5cd   : > { %2182 = vmatprep.mubr.msk.bf16.mxu1 %vm2663_vm0, %v2662_v6 }
 0x621   : > { %v1042_v39 = vpop.xlane.xlu0 %1041 }
 0x625   : > { %v1045_v40 = vpop.xlane.xlu0 %1044 }
 0x626   : > { %v1046_v45 = vadd.f32 %v1045_v40, %v1042_v39 }
 0x628   : > { %2396 = vrcp.f32 %v1046_v45 }
 0x629   : > { %v1313_v41 = vpop.permute.xlu0 %1312 }
 0x62a   : > { %v1315_v42 = vsel %vm718_vm1, %v1313_v41, 0 }
 0x62b   : > { %2181 = vmatpush3.bf16.xpose.msra.mxu1 %v1315_v42 }
 0x62c   : > { %2192 = vmatprep.subr.bf16.mxu1 %v2662_v6 }
 0x632   : > { %2183 = vmatmul.mubr.msk.bf16.vlgmr.msra.gmra.mxu1 %vm718_vm1, %v1263_v44 }
 0x633   : > { %2194 = vmatprep.mubr.msk.bf16.mxu1 %vm2663_vm0, %v2662_v6 }
 0x635   : > { %v2397_v51 = vpop.eup %2396 }
 0x659   : > { %v1140_v46 = vpop.f32.mrf.mxu1 }
 0x65a   : > { %v1093_v48 = vpop.f32.mrf.mxu0 }
 0x65b   : > { %v1141_v49 = vadd.f32 %v1140_v46, %v1093_v48  ;;  %v2156_v50 = vpop.f32.mrf.mxu1 }
 0x65c   : > { %v2150_v52 = vpop.f32.mrf.mxu0 }
 0x65d   : > { %v1146_v53 = vmul.f32 %v2397_v51, %v1141_v49  ;;  %v1143_v54 = vpop.f32.mrf.mxu1 }
 0x65e   : > { %v1096_v55 = vpop.f32.mrf.mxu0 }
 0x65f   : > { %v1147_v56 = vpack.c.bf16 %v1146_v53, %v1146_v53  ;;  %v2157_v57 = vpop.f32.mrf.mxu1 }
 0x660   : > { %v2151_v58 = vpop.f32.mrf.mxu0 }
 0x661   : > { %2163 = vmatmul.mubr.msk.bf16.vlgmr.msra.gmra.mxu0 %vm718_vm1, %v1147_v56 }
 0x662   : > { %2175 = vmatpush3.bf16.xpose.msra.mxu0 %v1270_v59  ;;  %2176 = vmatprep.mubr.msk.bf16.mxu0 %vm2663_vm0, %v2662_v6 }
 0x663   : > { %2186 = vmatprep.subr.bf16.mxu0 %v2662_v6 }
 0x669   : > { %2177 = vmatmul.mubr.msk.bf16.vlgmr.msra.gmra.mxu0 %vm718_vm1, %v1263_v44 }
 0x66a   : > { %2188 = vmatprep.mubr.msk.bf16.mxu0 %vm2663_vm0, %v2662_v6 }
 0x68c   : > { %v3095_v60 = vpop.f32.mrf.mxu1 }
 0x68e   : > { %v2172_v61 = vpop.f32.mrf.mxu1 }
 0x690   : > { %v1259_v62 = vpop.f32.mrf.mxu1 }
 0x692   : > { %v2173_v63 = vpop.f32.mrf.mxu1 }
 0x6f2   : > { %v1351_v0 = vpop.f32.mrf.mxu1 }
 0x6f3   : > { %v1360_v1 = vsel %vm812_vm4, %v1351_v0, -inf }
 0x6f4   : > { %1361 = vmax.xlane.f32.xlu0 %v1360_v1  ;;  %v2184_v2 = vpop.f32.mrf.mxu1 }
 0x6f6   : > { %v1354_v3 = vpop.f32.mrf.mxu1 }
 0x6f8   : > { %v2185_v4 = vpop.f32.mrf.mxu1 }
 0x70a   : > { %1380 = vrot.lane.b32.xlu0 %v3013_v21, %s2666_s19 }
 0x721   : > { %v3100_v5 = vpop.f32.mrf.mxu0 }
 0x722   : > { %v1257_v61 = vadd.f32 %v3095_v60, %v3100_v5 }
 0x723   : > { %v2164_v7 = vpop.f32.mrf.mxu0 }
 0x725   : > { %v1204_v8 = vpop.f32.mrf.mxu0 }
 0x727   : > { %v2165_v9 = vpop.f32.mrf.mxu0 }
 0x729   : > { %v1306_v10 = vpop.f32.mrf.mxu0 }
 0x72a   : > { %v1357_v11 = vsel %vm808_vm3, %v1306_v10, -inf }
 0x72b   : > { %1358 = vmax.xlane.f32.xlu1 %v1357_v11  ;;  %v2178_v12 = vpop.f32.mrf.mxu0 }
 0x72d   : > { %v1309_v13 = vpop.f32.mrf.mxu0 }
 0x72f   : > { %v2179_v14 = vpop.f32.mrf.mxu0 }
 0x73c   : > { %1428 = vrot.lane.b32.xlu1 %v3035_v47, %s2666_s19 }
 0x77d   : > { %v1362_v15 = vpop.xlane.xlu0 %1361 }
 0x781   : > { %v1381_v17 = vpop.permute.xlu0 %1380 }
 0x782   : > { %v1386_v20 = vsel %vm836_vm2, %v1381_v17, 0 }
 0x783   : > { %2187 = vmatpush3.bf16.msra.mxu0 %v1386_v20 }
 0x784   : > { %2198 = vmatprep.subr.bf16.mxu0 %v2662_v6 }
 0x7b4   : > { %v1359_v22 = vpop.xlane.xlu1 %1358 }
 0x7b5   : > { %v1363_v23 = vmax.f32 %v1359_v22, %v1362_v15 }
 0x7b7   : > { %v1364_v24 = vsub.f32 %v1306_v10, %v1363_v23  ;;  %v1367_v25 = vsub.f32 %v1351_v0, %v1363_v23 }
 0x7b8   : > { %v1429_v26 = vpop.permute.xlu1 %1428 }
 0x7b9   : > { %v1365_v27 = vmul.f32 1.442695, %v1364_v24  ;;  %v1368_v28 = vmul.f32 1.442695, %v1367_v25  ;;  %2193 = vmatpush3.bf16.msra.mxu1 %v1429_v26  ;;  %v2378_v26 = vld [vmem:[#allocation11 + $0x38] sm:$0xff]  }
 0x7ba   : > { %2206 = vmatprep.subr.bf16.mxu1 %v2662_v6 }
 0x7bb   : > { %2398 = vpow2.f32 %v1365_v27  ;;  %v2379_v27 = vld [vmem:[#allocation11 + $0x30] sm:$0xff]  }
 0x7bc   : > { %2400 = vpow2.f32 %v1368_v28 }
 0x7c8   : > { %v2399_v29 = vpop.eup %2398 }
 0x7c9   : > { %v2401_v30 = vpop.eup %2400  ;;  %v1370_v31 = vsel %vm808_vm3, %v2399_v29, 0.0  ;;  %v1378_v32 = vpack.c.bf16 %v2399_v29, %v2399_v29 }
 0x7ca   : > { %v1373_v33 = vsel %vm812_vm4, %v2401_v30, 0.0  ;;  %1371 = vadd.xlane.f32.xlu1 %v1370_v31  ;;  %v1379_v34 = vpack.c.bf16 %v2401_v30, %v2401_v30 }
 0x7cb   : > { %1374 = vadd.xlane.f32.xlu0 %v1373_v33  ;;  %2195 = vmatmul.mubr.msk.bf16.vlgmr.msra.gmra.mxu1 %vm808_vm3, %v1378_v32 }
 0x7cc   : > { %2189 = vmatmul.mubr.msk.bf16.vlgmr.msra.gmra.mxu0 %vm812_vm4, %v1379_v34  ;;  %2208 = vmatprep.mubr.msk.bf16.mxu1 %vm2663_vm0, %v2662_v6 }
 0x7cd   : > { %2202 = vmatprep.mubr.msk.bf16.mxu0 %vm2663_vm0, %v2662_v6  ;;  %2199 = vmatpush3.bf16.msra.mxu0 %v2376_v35 }
 0x7ce   : > { %2200 = vmatprep.subr.bf16.mxu0 %v2662_v6 }
 0x7d1   : > { %2201 = vmatpush3.bf16.msra.mxu0 %v2377_v36 }
 0x7d2   : > { %2212 = vmatprep.subr.bf16.mxu0 %v2662_v6 }
 0x7db   : > { %1586 = vrot.lane.b32.xlu1 %v3002_v18, %s2667_s30 }
 0x7df   : > { %1536 = vrot.lane.b32.xlu1 %v3004_v19, %s2667_s30 }
 0x7e1   : > { %1538 = vrot.lane.b32.xlu0 %v2997_v16, %s2667_s30 }
 0x853   : > { %v1372_v37 = vpop.xlane.xlu1 %1371 }
 0x854   : > { %v1375_v38 = vpop.xlane.xlu0 %1374 }
 0x855   : > { %v1376_v16 = vadd.f32 %v1375_v38, %v1372_v37 }
 0x857   : > { %v1587_v18 = vpop.permute.xlu1 %1586  ;;  %2402 = vrcp.f32 %v1376_v16 }
 0x858   : > { %v1539_v39 = vpop.permute.xlu0 %1538  ;;  %v1589_v54 = vsel %vm718_vm1, %v1587_v18, 0 }
 0x859   : > { %v1544_v40 = vsel %vm718_vm1, %v1539_v39, 0 }
 0x85a   : > { %2207 = vmatpush3.bf16.xpose.msra.mxu1 %v1544_v40 }
 0x85b   : > { %2218 = vmatprep.subr.bf16.mxu1 %v2662_v6  ;;  %v1537_v19 = vpop.permute.xlu1 %1536 }
 0x861   : > { %2209 = vmatmul.mubr.msk.bf16.vlgmr.msra.gmra.mxu1 %vm718_vm1, %v1537_v19 }
 0x862   : > { %2220 = vmatprep.mubr.msk.bf16.mxu1 %vm2663_vm0, %v2662_v6 }
 0x864   : > { %v2403_v45 = vpop.eup %2402 }
 0x88b   : > { %v1468_v41 = vpop.f32.mrf.mxu1 }
 0x88c   : > { %v1422_v42 = vpop.f32.mrf.mxu0 }
 0x88d   : > { %v1469_v43 = vadd.f32 %v1468_v41, %v1422_v42  ;;  %v2196_v44 = vpop.f32.mrf.mxu1 }
 0x88e   : > { %v2190_v46 = vpop.f32.mrf.mxu0 }
 0x88f   : > { %v1474_v48 = vmul.f32 %v2403_v45, %v1469_v43  ;;  %v1471_v49 = vpop.f32.mrf.mxu1 }
 0x890   : > { %v1425_v50 = vpop.f32.mrf.mxu0 }
 0x891   : > { %v1475_v51 = vpack.c.bf16 %v1474_v48, %v1474_v48  ;;  %v2197_v52 = vpop.f32.mrf.mxu1 }
 0x892   : > { %v2191_v53 = vpop.f32.mrf.mxu0 }
 0x893   : > { %2203 = vmatmul.mubr.msk.bf16.vlgmr.msra.gmra.mxu0 %vm718_vm1, %v1475_v51 }
 0x894   : > { %2213 = vmatpush3.bf16.xpose.msra.mxu0 %v1589_v54  ;;  %2214 = vmatprep.mubr.msk.bf16.mxu0 %vm2663_vm0, %v2662_v6 }
 0x895   : > { %2224 = vmatprep.subr.bf16.mxu0 %v2662_v6 }
 0x89b   : > { %2215 = vmatmul.mubr.msk.bf16.vlgmr.msra.gmra.mxu0 %vm718_vm1, %v1537_v19 }
 0x89c   : > { %2226 = vmatprep.mubr.msk.bf16.mxu0 %vm2663_vm0, %v2662_v6 }
 0x921   : > { %v1580_v55 = vpop.f32.mrf.mxu1 }
 0x922   : > { %v1631_v56 = vsel %vm808_vm3, %v1580_v55, -inf }
 0x923   : > { %1632 = vmax.xlane.f32.xlu1 %v1631_v56  ;;  %v2210_v57 = vpop.f32.mrf.mxu1 }
 0x925   : > { %v1583_v58 = vpop.f32.mrf.mxu1 }
 0x927   : > { %v2211_v59 = vpop.f32.mrf.mxu1 }
 0x934   : > { %1702 = vrot.lane.b32.xlu1 %v3035_v47, %s2667_s30 }
 0x953   : > { %v1529_v62 = vpop.f32.mrf.mxu0 }
 0x954   : > { %v3142_v63 = vadd.f32 %v1529_v62, %v1257_v61 }
 0x955   : > { %v2204_v0 = vpop.f32.mrf.mxu0 }
 0x957   : > { %v1532_v1 = vpop.f32.mrf.mxu0 }
 0x959   : > { %v2205_v2 = vpop.f32.mrf.mxu0 }
 0x95b   : > { %v1625_v3 = vpop.f32.mrf.mxu0 }
 0x95c   : > { %v1634_v4 = vsel %vm812_vm4, %v1625_v3, -inf }
 0x95d   : > { %1635 = vmax.xlane.f32.xlu0 %v1634_v4  ;;  %v2216_v7 = vpop.f32.mrf.mxu0 }
 0x95f   : > { %v1628_v8 = vpop.f32.mrf.mxu0 }
 0x961   : > { %v2217_v9 = vpop.f32.mrf.mxu0 }
 0x973   : > { %1654 = vrot.lane.b32.xlu0 %v3013_v21, %s2667_s30 }
 0x9ac   : > { %v1633_v47 = vpop.xlane.xlu1 %1632 }
 0x9b0   : > { %v1703_v10 = vpop.permute.xlu1 %1702 }
 0x9b1   : > { %2225 = vmatpush3.bf16.msra.mxu0 %v1703_v10 }
 0x9e6   : > { %v1636_v60 = vpop.xlane.xlu0 %1635 }
 0x9e7   : > { %v1637_v5 = vmax.f32 %v1633_v47, %v1636_v60 }
 0x9e9   : > { %v1638_v11 = vsub.f32 %v1580_v55, %v1637_v5  ;;  %v1641_v12 = vsub.f32 %v1625_v3, %v1637_v5 }
 0x9ea   : > { %v1655_v13 = vpop.permute.xlu0 %1654 }
 0x9eb   : > { %v1639_v14 = vmul.f32 1.442695, %v1638_v11  ;;  %v1642_v15 = vmul.f32 1.442695, %v1641_v12  ;;  %v1660_v17 = vsel %vm836_vm2, %v1655_v13, 0 }
 0x9ec   : > { %2219 = vmatpush3.bf16.msra.mxu1 %v1660_v17 }
 0x9ed   : > { %2404 = vpow2.f32 %v1639_v14  ;;  %2230 = vmatprep.subr.bf16.mxu1 %v2662_v6 }
 0x9ee   : > { %2406 = vpow2.f32 %v1642_v15 }
 0x9fa   : > { %v2405_v20 = vpop.eup %2404 }
 0x9fb   : > { %v2407_v22 = vpop.eup %2406  ;;  %v1644_v21 = vsel %vm808_vm3, %v2405_v20, 0.0  ;;  %v1652_v23 = vpack.c.bf16 %v2405_v20, %v2405_v20 }
 0x9fc   : > { %v1647_v24 = vsel %vm812_vm4, %v2407_v22, 0.0  ;;  %1645 = vadd.xlane.f32.xlu1 %v1644_v21  ;;  %v1653_v25 = vpack.c.bf16 %v2407_v22, %v2407_v22 }
 0x9fd   : > { %1648 = vadd.xlane.f32.xlu0 %v1647_v24  ;;  %2227 = vmatmul.mubr.msk.bf16.vlgmr.msra.gmra.mxu0 %vm808_vm3, %v1652_v23 }
 0x9fe   : > { %2221 = vmatmul.mubr.msk.bf16.vlgmr.msra.gmra.mxu1 %vm812_vm4, %v1653_v25 }
 0x9ff   : > { %2234 = vmatprep.mubr.msk.bf16.mxu1 %vm2663_vm0, %v2662_v6  ;;  %2231 = vmatpush3.bf16.msra.mxu1 %v2378_v26 }
 0xa00   : > { %2232 = vmatprep.subr.bf16.mxu1 %v2662_v6 }
 0xa03   : > { %2233 = vmatpush3.bf16.msra.mxu1 %v2379_v27 }
 0xa85   : > { %v1646_v29 = vpop.xlane.xlu1 %1645 }
 0xa86   : > { %v1649_v28 = vpop.xlane.xlu0 %1648 }
 0xa87   : > { %v1650_v30 = vadd.f32 %v1649_v28, %v1646_v29 }
 0xa89   : > { %2408 = vrcp.f32 %v1650_v30 }
 0xa96   : > { %v2409_v35 = vpop.eup %2408 }
 0xabd   : > { %v1742_v31 = vpop.f32.mrf.mxu0 }
 0xabe   : > { %v1696_v32 = vpop.f32.mrf.mxu1 }
 0xabf   : > { %v1743_v33 = vadd.f32 %v1742_v31, %v1696_v32  ;;  %v2228_v34 = vpop.f32.mrf.mxu0 }
 0xac0   : > { %v2222_v36 = vpop.f32.mrf.mxu1 }
 0xac1   : > { %v1748_v37 = vmul.f32 %v2409_v35, %v1743_v33  ;;  %v1745_v38 = vpop.f32.mrf.mxu0 }
 0xac2   : > { %v1699_v39 = vpop.f32.mrf.mxu1 }
 0xac3   : > { %v1749_v40 = vpack.c.bf16 %v1748_v37, %v1748_v37  ;;  %v2229_v6 = vpop.f32.mrf.mxu0 }
 0xac4   : > { %v2223_v18 = vpop.f32.mrf.mxu1 }
 0xac5   : > { %2235 = vmatmul.mubr.msk.bf16.vlgmr.msra.gmra.mxu1 %vm718_vm1, %v1749_v40 }
 0xb85   : > { %v1803_v19 = vpop.f32.mrf.mxu1 }
 0xb86   : > { %v1809_v16 = vadd.f32 %v1803_v19, %v3142_v63 }
 0xb87   : > { %v2236_v41 = vpop.f32.mrf.mxu1 }
 0xb88   : > { %1810 = vst [vmem:[%s362_s12] sm:$0xff] %v1809_v16 }
 0xb89   : > { %v1806_v42 = vpop.f32.mrf.mxu1 }
 0xb8a   : > { %2583 = shalt.err (!%p2580_p10)
}
 0xb8b   : > { %s2584_s18 = scalar_lea.hbm %s3164_s2, 128  ;;  %s2588_s3 = scalar_lea.hbm %s3213_s6, 256 }
 0xb8c   : > { %p2585_p9 = scmp.ne.s32.totalorder %s3164_s2, %s2584_s18  ;;  %p2589_p6 = scmp.lt.s32.totalorder %s3164_s2, %s3213_s6 }
 0xb8d   : > { %p2590_p8 = scmp.lt.s32.totalorder %s2588_s3, %s2584_s18 }
 0xb8e   : > { %p2586_p11 = pnand %p2585_p9, %p3247_p7 }
 0xb8f   : > { %p2591_p3 = por %p2590_p8, %p2589_p6 }
 0xb90   : > { %p2587_p4 = pneg %p2586_p11 }
 0xb92   : > { %p2592_p5 = pnand %p2591_p3, %p2587_p4 }
 0xb94   : > { %2595 = shalt.err (!%p2592_p5)
}
 0xb95   : > { %2258 = dma.vmem_to_hbm [thread:$0]  (%p3247_p7), %s3166_s7, 128, %s3164_s2, %s1812_s25   ;;  %v2237_v43 = vpop.f32.mrf.mxu1 }
 0xb96 PF: > { %s1837_s27 = sand.u32 1, %s2638_s21   ;;  %p3248_p13 = scmp.ne.s32.totalorder %s3225_s28, 0 }
 0xb97   : > { %p3249_p1 = scmp.ge.s32.totalorder %s2650_s24, 2  ;;  %s1838_s19 = scalar_lea.sflag [#allocation4], %s1837_s27 }
 0xb99   : > { %p2281_p0 = pnand %p3249_p1, %p3248_p13 }
 0xb9b   : > { %p2282_p2 = pneg %p2281_p0 }
 0xb9d   : > { %2633 = dma.done.wait (%p2282_p2), %s1838_s19, 128  }
 0xb9e   : > { %2635 = vsyncadd (%p2282_p2), %s1838_s19, 4294967168  ;;  %p24_p12 = scmp.ge.s32.totalorder %s2801_s16, 4   ;;  %s3250_s21 = smov %s2642_s22 }
 0xb9f   : > { %s3251_s22 = smov %s2646_s23  ;;  %s3252_s23 = smov %s2817_s26 }
 0xba0   : > { %s3253_s24 = smov %s2801_s16  ;;  %26 = sbr.rel (!%p24_p12) target bundleno = 14 (0xe), region = 118 }
 0xba5   :  { %1843 = vsyncpa [#allocation3], 1 }
 0xba6   :  { %1845 = vsyncpa [#allocation3 + $0x1], 1 }
 0xba7   :  { %1846 = vsyncpa [#allocation6], 1 }
 0xba8   :  { %1848 = vsyncpa [#allocation6 + $0x1], 1 }
 0xba9   :  { %1849 = vsyncpa [#allocation9], 1 }
 0xbaa   :  { %1850 = vsyncpa [#allocation12], 1 }
 0xbab   :  { %1851 = vsyncpa [#allocation4], 1 }
 0xbac   :  { %1853 = vsyncpa [#allocation4 + $0x1], 1 }

// kernel: tpu_custom_call.1
= control target key start
LH: loop header
LB: loop body
LE: loop exit
PB: predicated region body
PF: predicated region fallthrough
CT: control target
= control target key end

     0   :  { %s3207_s0 = inlined_call_operand.hbm [shape: f32[2,16,128], index: 0, kind: input, shape index: {}]   ;;  %s3208_s1 = inlined_call_operand.hbm [shape: f32[2,8,128], index: 1, kind: input, shape index: {}]   ;;  %s3209_s2 = inlined_call_operand.hbm [shape: f32[4,128], index: 2, kind: input, shape index: {}]   ;;  %s3210_s3 = inlined_call_operand.hbm [shape: bf16[128,128], index: 3, kind: input, shape index: {}]   ;;  %s3211_s4 = inlined_call_operand.hbm [shape: bf16[128,256], index: 4, kind: input, shape index: {}]   ;;  %s3212_s5 = inlined_call_operand.hbm [shape: bf16[128,128], index: 5, kind: input, shape index: {}]   ;;  %s3213_s6 = inlined_call_operand.hbm [shape: f32[2,8,128], index: 6, kind: output, shape index: {}]  }
   0x1   :  { %3220 = sst [smem:[#allocation20_spill]] %s3207_s0 }
   0x2   :  { %3221 = sst [smem:[#allocation21_spill]] %s3209_s2 }
   0x3   :  { %3222 = sst [smem:[#allocation22_spill]] %s3210_s3 }
   0x4   :  { %3223 = sst [smem:[#allocation23_spill]] %s3211_s4 }
   0x5   :  { %11 = vsyncpa [#allocation3], 0 }
   0x6   :  { %13 = vsyncpa [#allocation3 + $0x1], 0 }
   0x7   :  { %14 = vsyncpa [#allocation6], 0 }
   0x8   :  { %16 = vsyncpa [#allocation6 + $0x1], 0 }
   0x9   :  { %17 = vsyncpa [#allocation9], 0 }
   0xa   :  { %18 = vsyncpa [#allocation12], 0 }
   0xb   :  { %19 = vsyncpa [#allocation4], 0 }
   0xc   :  { %21 = vsyncpa [#allocation4 + $0x1], 0  ;;  %s2704_s21 = smov 0   ;;  %s2706_s22 = smov 0  }
   0xd   :  { %s2708_s23 = smov 0   ;;  %s2710_s24 = smov 0  }
   0xe LB: > { %s2725_s25 = sadd.s32 4294967295, %s2650_s24   ;;  %s1956_s26 = sadd.s32 4294967294, %s2650_s24   ;;  %s2650_s24 = sphi %s2710_s24, %s3253_s24   ;;  %s2646_s23 = sphi %s2708_s23, %s3252_s23   ;;  %s2642_s22 = sphi %s2706_s22, %s3251_s22   ;;  %s2638_s21 = sphi %s2704_s21, %s3250_s21  }
   0xf   : > { %p47_p0 = scmp.ne.s32.totalorder %s2642_s22, %s2638_s21  ;;  %p3214_p1 = scmp.eq.s32.totalorder %s2725_s25, 0 }
  0x10   : > { %p187_p3 = scmp.eq.s32.totalorder %s1956_s26, 1  ;;  %p1957_p5 = scmp.ge.s32.totalorder %s2650_s24, 1 }
  0x11   : > { %p2734_p4 = por %p3214_p1, %p47_p0  ;;  %p194_p7 = scmp.lt.s32.totalorder %s2650_s24, 3 }
  0x12   : > { %p2739_p6 = por %p187_p3, %p47_p0  ;;  %s2652_s30 = smov [#allocation7]  }
  0x13   : > { %s3224_s27 = scalar_select %p2734_p4, 1, 0 }
  0x14   : > { %s3225_s28 = scalar_select %p2739_p6, 1, 0 }
  0x15   : > { %p2744_p8 = pnand %p1957_p5, %p194_p7  ;;  %s207_s7 = sshll.u32 %s2652_s30, 4  ;;  %s208_s7 = int_to_ptr.vmem [resolvable:$true] %s207_s7 }
  0x16   : > { %s2653_s8 = smov [#allocation8]   ;;  %s2654_s11 = smov [#allocation10]  }
  0x17   : > { %s3226_s29 = scalar_select %p2744_p8, 1, 0 }
  0x18   : > { %p2260_p10 = pneg %p2744_p8  ;;  %s217_s9 = sshll.u32 %s2653_s8, 4  ;;  %s218_s9 = int_to_ptr.vmem [resolvable:$true] %s217_s9 }
  0x19   : > { %s230_s12 = sshll.u32 %s2654_s11, 4  ;;  %s2421_s13 = scalar_lea.vmem %s208_s7, 64  ;;  %s231_s12 = int_to_ptr.vmem [resolvable:$true] %s230_s12 }
  0x1a   : > { %p2753_p11 = pnand %p2260_p10, %p3214_p1  ;;  %p2422_p13 = scmp.ne.s32.totalorder %s208_s7, %s2421_s13 }
  0x1b   : > { %p2429_p5 = scmp.lt.s32.totalorder %s208_s7, %s208_s7  ;;  %p2430_p7 = scmp.lt.s32.totalorder %s2421_s13, %s2421_s13 }
  0x1c   : > { %p2412_p12 = pneg %p2753_p11 }
  0x1d   : > { %p2431_p9 = por %p2430_p7, %p2429_p5 }
  0x1e   : > { %p2424_p0 = pnand %p2422_p13, %p2412_p12 }
  0x20   : > { %p2425_p3 = pneg %p2424_p0 }
  0x22   : > { %p2432_p10 = pnand %p2431_p9, %p2425_p3 }
  0x24   : > { %2435 = shalt.err (!%p2432_p10)
}
  0x25   : > { %s3228_s2 = sld [smem:[#allocation21_spill]]  ;;  %s2447_s16 = scalar_lea.vmem %s218_s9, 1024 }
  0x26   : > { %p2448_p1 = scmp.ne.s32.totalorder %s218_s9, %s2447_s16  ;;  %p2455_p13 = scmp.lt.s32.totalorder %s218_s9, %s218_s9 }
  0x27   : > { %p2456_p0 = scmp.lt.s32.totalorder %s2447_s16, %s2447_s16 }
  0x28   : > { %p2450_p2 = pnand %p2448_p1, %p2412_p12 }
  0x29   : > { %p2457_p4 = por %p2456_p0, %p2455_p13 }
  0x2a   : > { %p2451_p6 = pneg %p2450_p2 }
  0x2b   : > { %2263 = dma.hbm_to_vmem [thread:$0]  (!%p2753_p11), %s3228_s2, 64, %s208_s7, [#allocation6]  }
  0x2c   : > { %p2458_p8 = pnand %p2457_p4, %p2451_p6 }
  0x2e   : > { %2461 = shalt.err (!%p2458_p8)
}
  0x2f   : > { %s2655_s17 = smov 64   ;;  %s2656_s18 = smov 4  }
  0x30   : > { %s3229_s3 = sld [smem:[#allocation22_spill]]  ;;  %s2473_s26 = scalar_lea.vmem %s231_s12, 2048 }
  0x31   : > { %p2474_p1 = scmp.ne.s32.totalorder %s231_s12, %s2473_s26  ;;  %p2481_p6 = scmp.lt.s32.totalorder %s231_s12, %s231_s12 }
  0x32   : > { %p2482_p8 = scmp.lt.s32.totalorder %s2473_s26, %s2473_s26 }
  0x33   : > { %p2476_p2 = pnand %p2474_p1, %p2412_p12 }
  0x34   : > { %p2483_p9 = por %p2482_p8, %p2481_p6 }
  0x35   : > { %p2477_p4 = pneg %p2476_p2 }
  0x36   : > { %2266 = dma.hbm_to_vmem [thread:$0]  (!%p2753_p11), %s3229_s3, 1024, %s218_s9, [#allocation9], %s2655_s17, %s2655_s17, %s2656_s18  }
  0x37   : > { %p2484_p3 = pnand %p2483_p9, %p2477_p4 }
  0x39   : > { %2487 = shalt.err (!%p2484_p3)
}
  0x3a   : > { %s3217_s30 = smov 128   ;;  %s3218_s7 = smov 8  }
  0x3b   : > { %s3230_s4 = sld [smem:[#allocation23_spill]]  ;;  %s2659_s11 = smov [#allocation11]  }
  0x3c   : > { %s243_s13 = sshll.u32 %s2659_s11, 4  ;;  %s244_s13 = int_to_ptr.vmem [resolvable:$true] %s243_s13 }
  0x3d   : > { %s2499_s14 = scalar_lea.vmem %s244_s13, 1024  ;;  %p2507_p13 = scmp.lt.s32.totalorder %s244_s13, %s244_s13 }
  0x3e   : > { %p2500_p5 = scmp.ne.s32.totalorder %s244_s13, %s2499_s14  ;;  %p2508_p0 = scmp.lt.s32.totalorder %s2499_s14, %s2499_s14 }
  0x40   : > { %p2502_p7 = pnand %p2500_p5, %p2412_p12  ;;  %p2509_p1 = por %p2508_p0, %p2507_p13 }
  0x41   : > { %2269 = dma.hbm_to_vmem [thread:$0]  (!%p2753_p11), %s3230_s4, 2048, %s231_s12, [#allocation9], %s3217_s30, %s3217_s30, %s3218_s7  }
  0x42   : > { %p2503_p10 = pneg %p2502_p7 }
  0x44   : > { %p2510_p2 = pnand %p2509_p1, %p2503_p10 }
  0x46   : > { %2513 = shalt.err (!%p2510_p2)
}
  0x47   : > { %2272 = dma.hbm_to_vmem [thread:$0]  (!%p2753_p11), %s3212_s5, 1024, %s244_s13, [#allocation12], %s2655_s17, %s2655_s17, %s2656_s18  }
  0x48   : > { %s2801_s16 = sadd.s32 1, %s2650_s24   ;;  %s34_s10 = sadd.s32 1, %s2646_s23 }
  0x49   : > { %s31_s19 = ssub.s32 %s2650_s24, %s2801_s16  ;;  %p41_p12 = scmp.ne.s32.totalorder %s2646_s23, %s2642_s22 }
  0x4a   : > { %p32_p4 = scmp.eq.s32.totalorder %s31_s19, 0  ;;  %p42_p6 = scmp.eq.s32.totalorder %s2650_s24, 0 }
  0x4b   : > { %p3231_p8 = scmp.eq.s32.totalorder %s2725_s25, 1  ;;  %p2288_p3 = scmp.lt.s32.totalorder %s2650_s24, 2 }
  0x4c   : > { %s2817_s26 = scalar_select %p32_p4, %s2646_s23, %s34_s10  }
  0x4d   : > { %p2811_p9 = por %p3231_p8, %p41_p12  ;;  %p43_p5 = por %p42_p6, %p41_p12 }
  0x4e   : > { %s2820_s8 = sand.u32 1, %s2646_s23   ;;  %s2036_s18 = sshll.u32 %s2650_s24, 8 }
  0x4f   : > { %s3232_s20 = scalar_select %p2811_p9, 1, 0 }
  0x50   : > { %s1963_s17 = sshll.u32 %s2820_s8, 4  ;;  %s3233_s0 = sld [smem:[#allocation20_spill]] }
  0x51   : > { %s261_s14 = scalar_lea.vmem [#allocation2], %s1963_s17  ;;  %p2831_p11 = pnand %p2288_p3, %p43_p5 }
  0x52   : > { %s268_s12 = sshll.u32 %s261_s14, 4  ;;  %s258_s30 = scalar_lea.sflag [#allocation3], %s2820_s8  ;;  %s2829_s12 = int_to_ptr.vmem [resolvable:$true] %s268_s12 }
  0x53   : > { %p2516_p10 = pneg %p2831_p11 }
  0x56   : > { %s2827_s13 = scalar_lea.hbm %s3233_s0, %s2036_s18  ;;  %s2519_s9 = scalar_lea.hbm %s3233_s0, 512 }
  0x57   : > { %s2514_s7 = scalar_lea.hbm %s2827_s13, 256  ;;  %p2520_p1 = scmp.lt.s32.totalorder %s2827_s13, %s3233_s0 }
  0x58   : > { %p2515_p7 = scmp.ne.s32.totalorder %s2827_s13, %s2514_s7  ;;  %p2521_p2 = scmp.lt.s32.totalorder %s2519_s9, %s2514_s7 }
  0x5a   : > { %p2517_p13 = pnand %p2516_p10, %p2515_p7  ;;  %p2522_p12 = por %p2521_p2, %p2520_p1 }
  0x5c   : > { %p2518_p0 = pneg %p2517_p13 }
  0x5e   : > { %p2523_p4 = pnand %p2522_p12, %p2518_p0 }
  0x60   : > { %2526 = shalt.err (!%p2523_p4)
}
  0x61   : > { %s2527_s10 = scalar_lea.vmem %s2829_s12, 256  ;;  %s2660_s17 = smov [#allocation2]  }
  0x62   : > { %p2528_p6 = scmp.ne.s32.totalorder %s2829_s12, %s2527_s10  ;;  %s2532_s18 = sshll.u32 %s2660_s17, 4  ;;  %s2533_s18 = int_to_ptr.vmem [resolvable:$false] %s2532_s18 }
  0x63   : > { %s2534_s19 = scalar_lea.vmem %s2533_s18, 512  ;;  %p2535_p5 = scmp.lt.s32.totalorder %s2829_s12, %s2533_s18 }
  0x64   : > { %p2530_p8 = pnand %p2528_p6, %p2516_p10  ;;  %p2536_p7 = scmp.lt.s32.totalorder %s2534_s19, %s2527_s10 }
  0x66   : > { %p2531_p3 = pneg %p2530_p8  ;;  %p2537_p13 = por %p2536_p7, %p2535_p5 }
  0x68   : > { %p2538_p1 = pnand %p2537_p13, %p2531_p3 }
  0x6a   : > { %2541 = shalt.err (!%p2538_p1)
}
  0x6b   : > { %s3235_s7 = smov 8   ;;  %s3236_s9 = smov 128  }
  0x6c   : > { %2276 = dma.hbm_to_vmem [thread:$0]  (!%p2831_p11), %s2827_s13, 256, %s2829_s12, %s258_s30, %s3236_s9, %s3236_s9, %s3235_s7  }
  0x6d   : > { %s1967_s11 = sshll.u32 %s2650_s24, 7  ;;  %s3237_s17 = sshll.u32 %s2820_s8, 3 }
  0x6e   : > { %s2871_s19 = scalar_lea.hbm %s3208_s1, %s1967_s11  ;;  %s282_s18 = scalar_lea.vmem [#allocation5], %s3237_s17 }
  0x6f   : > { %s289_s0 = sshll.u32 %s282_s18, 4  ;;  %s3238_s2 = sand.u32 1, %s2650_s24   ;;  %s290_s0 = int_to_ptr.vmem [resolvable:$true] %s289_s0 }
  0x70   : > { %s279_s3 = scalar_lea.sflag [#allocation6], %s3238_s2  ;;  %s2542_s4 = scalar_lea.hbm %s2871_s19, 128 }
  0x71   : > { %p2543_p0 = scmp.ne.s32.totalorder %s2871_s19, %s2542_s4  ;;  %s2547_s12 = scalar_lea.hbm %s3208_s1, 256 }
  0x72   : > { %p2548_p4 = scmp.lt.s32.totalorder %s2871_s19, %s3208_s1  ;;  %p2549_p6 = scmp.lt.s32.totalorder %s2547_s12, %s2542_s4 }
  0x73   : > { %p2545_p2 = pnand %p2543_p0, %p2516_p10 }
  0x74   : > { %p2550_p8 = por %p2549_p6, %p2548_p4 }
  0x75   : > { %p2546_p12 = pneg %p2545_p2 }
  0x77   : > { %p2551_p3 = pnand %p2550_p8, %p2546_p12 }
  0x79   : > { %2554 = shalt.err (!%p2551_p3)
}
  0x7a   : > { %s2555_s9 = scalar_lea.vmem %s290_s0, 128  ;;  %s2661_s2 = smov [#allocation5]  }
  0x7b   : > { %p2556_p5 = scmp.ne.s32.totalorder %s290_s0, %s2555_s9  ;;  %s2560_s11 = sshll.u32 %s2661_s2, 4  ;;  %s2561_s11 = int_to_ptr.vmem [resolvable:$false] %s2560_s11 }
  0x7c   : > { %s2562_s14 = scalar_lea.vmem %s2561_s11, 256  ;;  %p2563_p1 = scmp.lt.s32.totalorder %s290_s0, %s2561_s11 }
  0x7d   : > { %p2558_p7 = pnand %p2556_p5, %p2516_p10  ;;  %p2564_p0 = scmp.lt.s32.totalorder %s2562_s14, %s2555_s9 }
  0x7f   : > { %p2559_p13 = pneg %p2558_p7  ;;  %p2565_p2 = por %p2564_p0, %p2563_p1 }
  0x81   : > { %p2566_p9 = pnand %p2565_p2, %p2559_p13 }
  0x83   : > { %2569 = shalt.err (!%p2566_p9)
}
  0x84   : > { %2279 = dma.hbm_to_vmem [thread:$0]  (!%p2831_p11), %s2871_s19, 128, %s290_s0, %s279_s3  }
  0x85   : > { %p3239_p12 = scmp.ne.s32.totalorder %s3226_s29, 0 }
  0x86   : > { %s2898_s4 = sand.u32 (!%p3239_p12), 1, %s2642_s22   ;;  %p3240_p10 = scmp.ne.s32.totalorder (!%p3239_p12), %s3224_s27, 0 }
  0x87   : > { %298 = sbr.rel (%p3239_p12) target bundleno = 2966 (0xb96), region = 44  ;;  %s1969_s10 = sshll.u32 (!%p3239_p12), %s2898_s4, 4 }
  0x88   : > { %s301_s17 = scalar_lea.sflag (!%p3239_p12), [#allocation3], %s2898_s4  ;;  %s304_s18 = scalar_lea.vmem (!%p3239_p12), [#allocation2], %s1969_s10 }
  0x8c   : > { %2613 = dma.done.wait (%p3240_p10), %s301_s17, 256  }
  0x8d   : > { %2615 = vsyncadd (%p3240_p10), %s301_s17, 4294967040  ;;  %s309_s0 = sand.u32 1, %s2725_s25   ;;  %s1970_s3 = sshll.u32 %s2898_s4, 3 }
  0x8e   : > { %s310_s29 = scalar_lea.sflag [#allocation6], %s309_s0  ;;  %s313_s15 = scalar_lea.vmem [#allocation5], %s1970_s3 }
  0x8f   : > { %2617 = dma.done.wait (%p3240_p10), %s310_s29, 128  }
  0x90   : > { %2619 = vsyncadd (%p3240_p10), %s310_s29, 4294967168  ;;  %p3241_p9 = scmp.eq.s32.totalorder %s2725_s25, 0 }
  0x92   : > { %2621 = dma.done.wait (%p3241_p9), [#allocation6], 64   ;;  %p3242_p11 = pmov %p3241_p9 }
  0x93   : > { %p3243_p4 = pmov %p3241_p9 }
  0x94   : > { %2623 = vsyncadd (%p3242_p11), [#allocation6], 4294967232 }
  0x95   : > { %2625 = dma.done.wait (%p3243_p4), [#allocation9], 3072   ;;  %p3244_p6 = pmov %p3243_p4 }
  0x96   : > { %p3245_p8 = pmov %p3243_p4 }
  0x97   : > { %2627 = vsyncadd (%p3244_p6), [#allocation9], 4294964224 }
  0x98   : > { %2629 = dma.done.wait (%p3245_p8), [#allocation12], 1024   ;;  %p3246_p3 = pmov %p3243_p4 }
  0x99   : > { %v406_v0 = vld [vmem:[%s313_s15] sm:$0xff]  ;;  %v369_v1 = vld [vmem:[%s304_s18 + $0x8] sm:$0xff]  ;;  %v2662_v6 = vmov 0.0   ;;  %vm2663_vm0 = vmmov 0   ;;  %v2664_v35 = vmov 0   ;;  %vm718_vm1 = vcmask 261120  }
  0x9a   : > { %2631 = vsyncadd (%p3246_p3), [#allocation12], 4294966272  ;;  %v368_v2 = vld [vmem:[%s304_s18] sm:$0xff]  ;;  %407 = vadd.xlane.f32.xlu0 %v406_v0  ;;  %372 = vadd.xlane.f32.xlu1 %v369_v1  ;;  %vm836_vm2 = vcmask 1043456   ;;  %vm808_vm3 = vcmask 130048   ;;  %vm812_vm4 = vcmask 64512  }
  0x9b   : > { %v2340_v3 = vld [vmem:[#allocation8 + $0x38] sm:$0xff]   ;;  %2090 = vmatprep.subr.bf16.mxu0 %v2662_v6  ;;  %v2931_v7 = vld [vmem:[#allocation10 + $0x64] ss:$8 sps:$4 sm:$0xff]   ;;  %v2344_v8 = vld [vmem:[#allocation8 + $0x30] sm:$0xff]   ;;  %2106 = vmatprep.mubr.msk.bf16.mxu0 %vm2663_vm0, %v2662_v6  ;;  %s2665_s27 = smov 96   ;;  %s2666_s19 = smov 64  }
  0x9c   : > { %v2926_v4 = vld [vmem:[#allocation10 + $0x74] ss:$8 sps:$4 sm:$0xff]   ;;  %v2928_v5 = vld [vmem:[#allocation10 + $0x70] ss:$8 sps:$4 sm:$0xff]   ;;  %2091 = vmatpush3.bf16.msra.mxu0 %v2340_v3  ;;  %v2936_v9 = vld [vmem:[#allocation10 + $0x60] ss:$8 sps:$4 sm:$0xff]   ;;  %661 = vmatprep.mubr.bf16.mxu1 %v2664_v35 }
  0x9d   : > { %629 = vmatprep.subr.bf16.mxu1 %v2926_v4  ;;  %2092 = vmatprep.subr.bf16.mxu0 %v2662_v6  ;;  %v2348_v22 = vld [vmem:[#allocation8 + $0x28] sm:$0xff]   ;;  %v2953_v23 = vld [vmem:[#allocation10 + $0x54] ss:$8 sps:$4 sm:$0xff]   ;;  %v2955_v24 = vld [vmem:[#allocation10 + $0x50] ss:$8 sps:$4 sm:$0xff]   ;;  %s2667_s30 = smov 32  }
  0x9e   : > { %370 = vadd.xlane.f32.xlu0 %v368_v2  ;;  %630 = vmatpush1.bf16.msra.mxu1 %v2928_v5  ;;  %v2352_v25 = vld [vmem:[#allocation8 + $0x20] sm:$0xff]   ;;  %v2356_v28 = vld [vmem:[#allocation8 + $0x18] sm:$0xff]   ;;  %v2360_v32 = vld [vmem:[#allocation8 + $0x10] sm:$0xff]   ;;  %s2033_s13 = sshll.u32 %s2725_s25, 7  ;;  %s362_s12 = scalar_lea.vmem [#allocation13], %s1970_s3 }
  0x9f   : > { %631 = vmatprep.subr.bf16.mxu1 %v2931_v7  ;;  %v2960_v26 = vld [vmem:[#allocation10 + $0x44] ss:$8 sps:$4 sm:$0xff]   ;;  %v2962_v27 = vld [vmem:[#allocation10 + $0x40] ss:$8 sps:$4 sm:$0xff]   ;;  %v2357_v29 = vld [vmem:[#allocation10 + $0x34] ss:$8 sps:$4 sm:$0xff]   ;;  %s3164_s2 = scalar_lea.hbm %s3213_s6, %s2033_s13 }
  0xa0   : > { %2093 = vmatpush3.bf16.msra.mxu0 %v2344_v8  ;;  %v2967_v30 = vld [vmem:[#allocation10 + $0x30] ss:$8 sps:$4 sm:$0xff]   ;;  %v2969_v31 = vld [vmem:[#allocation10 + $0x24] ss:$8 sps:$4 sm:$0xff]   ;;  %v2363_v33 = vld [vmem:[#allocation10 + $0x20] ss:$8 sps:$4 sm:$0xff]  }
  0xa1   : > { %2094 = vmatprep.subr.bf16.mxu0 %v2662_v6  ;;  %v2365_v34 = vld [vmem:[#allocation10 + $0x14] ss:$8 sps:$4 sm:$0xff]   ;;  %v2364_v36 = vld [vmem:[#allocation8 + $0x8] sm:$0xff]   ;;  %v2367_v37 = vld [vmem:[#allocation10 + $0x10] ss:$8 sps:$4 sm:$0xff]   ;;  %s1825_s7 = sshll.u32 %s362_s12, 4  ;;  %s3166_s7 = int_to_ptr.vmem [resolvable:$true] %s1825_s7 }
  0xa2   : > { %632 = vmatpush1.bf16.msra.mxu1 %v2936_v9  ;;  %v2369_v38 = vld [vmem:[#allocation10 + $0x4] ss:$8 sps:$4 sm:$0xff]   ;;  %v2371_v40 = vld [vmem:[#allocation10] ss:$8 sps:$4 sm:$0xff]   ;;  %v1978_v47 = vld [vmem:[#allocation7 + $0x2] ss:$0 sm:$0xff] }
  0xa3   : > { %633 = vmatprep.subr.bf16.mxu1 %v2953_v23  ;;  %v2368_v39 = vld [vmem:[#allocation8] sm:$0xff]   ;;  %v1979_v50 = vld [vmem:[#allocation7 + $0x3] ss:$0 sm:$0xff]  ;;  %v1976_v61 = vld [vmem:[#allocation7] ss:$0 sm:$0xff]  ;;  %s1812_s25 = scalar_lea.sflag [#allocation4], %s2898_s4 }
  0xa4   : > { %2095 = vmatpush3.bf16.msra.mxu0 %v2348_v22  ;;  %s2570_s11 = scalar_lea.vmem %s3166_s7, 128  ;;  %p3247_p7 = scmp.ne.s32.totalorder %s3232_s20, 0 }
  0xa5   : > { %2096 = vmatprep.subr.bf16.mxu0 %v2662_v6  ;;  %p2571_p5 = scmp.ne.s32.totalorder %s3166_s7, %s2570_s11  ;;  %s2668_s14 = smov [#allocation13]  }
  0xa6   : > { %634 = vmatpush1.bf16.msra.mxu1 %v2955_v24  ;;  %s2574_s10 = sshll.u32 %s2668_s14, 4  ;;  %s2575_s10 = int_to_ptr.vmem [resolvable:$false] %s2574_s10 }
  0xa7   : > { %635 = vmatprep.subr.bf16.mxu1 %v2960_v26  ;;  %p2572_p13 = pnand %p2571_p5, %p3247_p7  ;;  %s2576_s17 = scalar_lea.vmem %s2575_s10, 256 }
  0xa8   : > { %2097 = vmatpush3.bf16.msra.mxu0 %v2352_v25  ;;  %p2577_p0 = scmp.lt.s32.totalorder %s3166_s7, %s2575_s10  ;;  %p2578_p2 = scmp.lt.s32.totalorder %s2576_s17, %s2570_s11 }
  0xa9   : > { %2098 = vmatprep.subr.bf16.mxu0 %v2662_v6  ;;  %p2573_p1 = pneg %p2572_p13 }
  0xaa   : > { %636 = vmatpush1.bf16.msra.mxu1 %v2962_v27  ;;  %p2579_p12 = por %p2578_p2, %p2577_p0 }
  0xab   : > { %637 = vmatprep.subr.bf16.mxu1 %v2357_v29 }
  0xac   : > { %2099 = vmatpush3.bf16.msra.mxu0 %v2356_v28  ;;  %p2580_p10 = pnand %p2579_p12, %p2573_p1 }
  0xad   : > { %2100 = vmatprep.subr.bf16.mxu0 %v2662_v6 }
  0xae   : > { %638 = vmatpush1.bf16.msra.mxu1 %v2967_v30 }
  0xaf   : > { %639 = vmatprep.subr.bf16.mxu1 %v2969_v31 }
  0xb0   : > { %2101 = vmatpush3.bf16.msra.mxu0 %v2360_v32 }
  0xb1   : > { %2102 = vmatprep.subr.bf16.mxu0 %v2662_v6 }
  0xb2   : > { %640 = vmatpush1.bf16.msra.mxu1 %v2363_v33 }
  0xb3   : > { %641 = vmatprep.subr.bf16.mxu1 %v2365_v34 }
  0xb4   : > { %2103 = vmatpush3.bf16.msra.mxu0 %v2364_v36 }
  0xb5   : > { %2104 = vmatprep.subr.bf16.mxu0 %v2662_v6 }
  0xb6   : > { %642 = vmatpush1.bf16.msra.mxu1 %v2367_v37 }
  0xb7   : > { %643 = vmatprep.subr.bf16.mxu1 %v2369_v38 }
  0xb8   : > { %2105 = vmatpush3.bf16.msra.mxu0 %v2368_v39 }
  0xb9   : > { %670 = vmatprep.subr.bf16.mxu0 %v2926_v4 }
  0xba   : > { %644 = vmatpush1.bf16.msra.mxu1 %v2371_v40 }
  0xbb   : > { %2110 = vmatprep.subr.bf16.mxu1 %v2662_v6 }
 0x123   : > { %v408_v10 = vpop.xlane.xlu0 %407  ;;  %v373_v11 = vpop.xlane.xlu1 %372 }
 0x124   : > { %v409_v12 = vmul.f32 0.0078125, %v408_v10  ;;  %v376_v13 = vmul.f32 0.0078125, %v373_v11 }
 0x126   : > { %v2941_v14 = vsub.f32 %v406_v0, %v409_v12  ;;  %v2943_v15 = vsub.f32 %v369_v1, %v376_v13  ;;  %v1977_v0 = vld [vmem:[#allocation7 + $0x1] ss:$0 sm:$0xff] }
 0x127   : > { %v371_v16 = vpop.xlane.xlu0 %370 }
 0x128   : > { %v375_v17 = vmul.f32 0.0078125, %v371_v16  ;;  %v411_v18 = vmul.f32 %v2941_v14, %v2941_v14  ;;  %v380_v20 = vmul.f32 %v2943_v15, %v2943_v15 }
 0x12a   : > { %v2947_v19 = vsub.f32 %v368_v2, %v375_v17  ;;  %412 = vadd.xlane.f32.xlu1 %v411_v18 }
 0x12c   : > { %v379_v21 = vmul.f32 %v2947_v19, %v2947_v19 }
 0x12e   : > { %383 = vadd.xlane.f32.xlu1 %v380_v20  ;;  %381 = vadd.xlane.f32.xlu0 %v379_v21 }
 0x1b3   : > { %v413_v41 = vpop.xlane.xlu1 %412 }
 0x1b4   : > { %v414_v42 = vmul.f32 0.0078125, %v413_v41 }
 0x1b6   : > { %v415_v43 = vadd.f32 1e-05, %v414_v42 }
 0x1b7   : > { %v384_v44 = vpop.xlane.xlu1 %383  ;;  %v382_v46 = vpop.xlane.xlu0 %381 }
 0x1b8   : > { %2380 = vrsqrt.f32 %v415_v43  ;;  %v386_v49 = vmul.f32 0.0078125, %v384_v44  ;;  %v385_v51 = vmul.f32 0.0078125, %v382_v46 }
 0x1ba   : > { %v388_v54 = vadd.f32 1e-05, %v386_v49  ;;  %v387_v55 = vadd.f32 1e-05, %v385_v51 }
 0x1bc   : > { %2382 = vrsqrt.f32 %v388_v54 }
 0x1bd   : > { %2384 = vrsqrt.f32 %v387_v55 }
 0x1c5   : > { %v2381_v45 = vpop.eup %2380 }
 0x1c6   : > { %v417_v48 = vmul.f32 %v2381_v45, %v2941_v14 }
 0x1c8   : > { %v422_v52 = vmul.f32 %v1978_v47, %v417_v48 }
 0x1c9   : > { %v2383_v57 = vpop.eup %2382 }
 0x1ca   : > { %v427_v53 = vadd.f32 %v1979_v50, %v422_v52  ;;  %v2385_v58 = vpop.eup %2384  ;;  %v392_v60 = vmul.f32 %v2383_v57, %v2943_v15 }
 0x1cb   : > { %v391_v59 = vmul.f32 %v2385_v58, %v2947_v19 }
 0x1cc   : > { %v428_v56 = vpack.c.bf16 %v427_v53, %v427_v53  ;;  %v398_v63 = vmul.f32 %v1976_v61, %v392_v60 }
 0x1cd   : > { %v397_v62 = vmul.f32 %v1976_v61, %v391_v59 }
 0x1ce   : > { %2107 = vmatmul.mubr.bf16.vlgmr.msra.gmra.mxu0 %v428_v56  ;;  %662 = vmatmul.mubr.bf16.vlgmr.msra.gmra.mxu1 %v428_v56  ;;  %v404_v2 = vadd.f32 %v1977_v0, %v398_v63 }
 0x1cf   : > { %671 = vmatpush1.bf16.msra.mxu0 %v2928_v5  ;;  %702 = vmatprep.mubr.bf16.mxu0 %v2664_v35  ;;  %v403_v1 = vadd.f32 %v1977_v0, %v397_v62 }
 0x1d0   : > { %672 = vmatprep.subr.bf16.mxu0 %v2931_v7  ;;  %2112 = vmatprep.mubr.msk.bf16.mxu1 %vm2663_vm0, %v2662_v6 }
 0x1d1   : > { %v405_v3 = vpack.c.bf16 %v404_v2, %v403_v1 }
 0x1d3   : > { %673 = vmatpush1.bf16.msra.mxu0 %v2936_v9 }
 0x1d4   : > { %674 = vmatprep.subr.bf16.mxu0 %v2953_v23 }
 0x1d7   : > { %675 = vmatpush1.bf16.msra.mxu0 %v2955_v24 }
 0x1d8   : > { %676 = vmatprep.subr.bf16.mxu0 %v2960_v26 }
 0x1db   : > { %677 = vmatpush1.bf16.msra.mxu0 %v2962_v27 }
 0x1dc   : > { %678 = vmatprep.subr.bf16.mxu0 %v2357_v29 }
 0x1df   : > { %679 = vmatpush1.bf16.msra.mxu0 %v2967_v30 }
 0x1e0   : > { %680 = vmatprep.subr.bf16.mxu0 %v2969_v31 }
 0x1e3   : > { %681 = vmatpush1.bf16.msra.mxu0 %v2363_v33 }
 0x1e4   : > { %682 = vmatprep.subr.bf16.mxu0 %v2365_v34 }
 0x1e7   : > { %683 = vmatpush1.bf16.msra.mxu0 %v2367_v37 }
 0x1e8   : > { %684 = vmatprep.subr.bf16.mxu0 %v2369_v38 }
 0x1eb   : > { %685 = vmatpush1.bf16.msra.mxu0 %v2371_v40 }
 0x1ec   : > { %2134 = vmatprep.subr.bf16.mxu0 %v2662_v6 }
 0x1ee   : > { %703 = vmatmul.mubr.bf16.vlgmr.msra.gmra.mxu0 %v405_v3 }
 0x1ef   : > { %2136 = vmatprep.mubr.msk.bf16.mxu0 %vm2663_vm0, %v2662_v6 }
 0x28e   : > { %v527_v4 = vpop.f32.mrf.mxu0  ;;  %v663_v5 = vpop.f32.mrf.mxu1 }
 0x28f   : > { %v3002_v18 = vpack.c.bf16 %v663_v5, %v663_v5  ;;  %v3004_v19 = vpack.c.bf16 %v527_v4, %v527_v4 }
 0x290   : > { %v2108_v7 = vpop.f32.mrf.mxu0  ;;  %v665_v8 = vpop.f32.mrf.mxu1 }
 0x291   : > { %v766_v20 = vsel %vm718_vm1, %v3002_v18, 0  ;;  %v3013_v21 = vpack.c.bf16 %v665_v8, %v665_v8 }
 0x292   : > { %v530_v9 = vpop.f32.mrf.mxu0  ;;  %v667_v10 = vpop.f32.mrf.mxu1 }
 0x293   : > { %v838_v22 = vsel %vm836_vm2, %v3013_v21, 0 }
 0x294   : > { %v2109_v11 = vpop.f32.mrf.mxu0  ;;  %v668_v12 = vpop.f32.mrf.mxu1 }
 0x2ae   : > { %v704_v13 = vpop.f32.mrf.mxu0 }
 0x2b0   : > { %v706_v14 = vpop.f32.mrf.mxu0 }
 0x2b2   : > { %v708_v15 = vpop.f32.mrf.mxu0 }
 0x2b3   : > { %v2997_v16 = vpack.c.bf16 %v708_v15, %v704_v13 }
 0x2b4   : > { %v710_v44 = vpop.f32.mrf.mxu0 }
 0x2b5   : > { %v723_v17 = vsel %vm718_vm1, %v2997_v16, 0  ;;  %v3035_v47 = vpack.c.bf16 %v710_v44, %v706_v14 }
 0x2b6   : > { %2111 = vmatpush3.bf16.xpose.msra.mxu1 %v723_v17 }
 0x2b7   : > { %2116 = vmatprep.subr.bf16.mxu1 %v2662_v6 }
 0x2bd   : > { %2113 = vmatmul.mubr.msk.bf16.vlgmr.msra.gmra.mxu1 %vm718_vm1, %v3004_v19 }
 0x2be   : > { %2117 = vmatpush3.bf16.xpose.msra.mxu1 %v766_v20  ;;  %2118 = vmatprep.mubr.msk.bf16.mxu1 %vm2663_vm0, %v2662_v6 }
 0x2bf   : > { %2122 = vmatprep.subr.bf16.mxu1 %v2662_v6 }
 0x2c5   : > { %2119 = vmatmul.mubr.msk.bf16.vlgmr.msra.gmra.mxu1 %vm718_vm1, %v3004_v19 }
 0x2c6   : > { %2123 = vmatpush3.bf16.msra.mxu1 %v838_v22  ;;  %2124 = vmatprep.mubr.msk.bf16.mxu1 %vm2663_vm0, %v2662_v6 }
 0x2c7   : > { %2128 = vmatprep.subr.bf16.mxu1 %v2662_v6 }
 0x37d   : > { %v759_v23 = vpop.f32.mrf.mxu1 }
 0x37e   : > { %v809_v24 = vsel %vm808_vm3, %v759_v23, -inf }
 0x37f   : > { %810 = vmax.xlane.f32.xlu0 %v809_v24  ;;  %v2114_v25 = vpop.f32.mrf.mxu1  ;;  %v2372_v24 = vld [vmem:[#allocation11 + $0x8] sm:$0xff]  }
 0x381   : > { %v762_v26 = vpop.f32.mrf.mxu1 }
 0x383   : > { %v2115_v27 = vpop.f32.mrf.mxu1 }
 0x385   : > { %v802_v28 = vpop.f32.mrf.mxu1 }
 0x386   : > { %v813_v29 = vsel %vm812_vm4, %v802_v28, -inf }
 0x387   : > { %814 = vmax.xlane.f32.xlu1 %v813_v29  ;;  %v2120_v30 = vpop.f32.mrf.mxu1  ;;  %v2373_v29 = vld [vmem:[#allocation11] sm:$0xff]  }
 0x389   : > { %v805_v31 = vpop.f32.mrf.mxu1 }
 0x38a   : > { %v2374_v31 = vld [vmem:[#allocation11 + $0x18] sm:$0xff]  }
 0x38b   : > { %v2121_v32 = vpop.f32.mrf.mxu1 }
 0x395   : > { %933 = vrot.lane.b32.xlu0 %v2997_v16, %s2665_s27 }
 0x398   : > { %982 = vrot.lane.b32.xlu1 %v3002_v18, %s2665_s27 }
 0x39c   : > { %930 = vrot.lane.b32.xlu1 %v3004_v19, %s2665_s27 }
 0x408   : > { %v811_v33 = vpop.xlane.xlu0 %810 }
 0x40c   : > { %v934_v34 = vpop.permute.xlu0 %933 }
 0x40d   : > { %v939_v35 = vsel %vm718_vm1, %v934_v34, 0 }
 0x40e   : > { %2135 = vmatpush3.bf16.xpose.msra.mxu0 %v939_v35 }
 0x40f   : > { %2146 = vmatprep.subr.bf16.mxu0 %v2662_v6 }
 0x410   : > { %v815_v36 = vpop.xlane.xlu1 %814 }
 0x411   : > { %v816_v37 = vmax.f32 %v811_v33, %v815_v36 }
 0x413   : > { %v820_v38 = vsub.f32 %v802_v28, %v816_v37  ;;  %v817_v41 = vsub.f32 %v759_v23, %v816_v37 }
 0x414   : > { %v983_v39 = vpop.permute.xlu1 %982 }
 0x415   : > { %v821_v40 = vmul.f32 1.442695, %v820_v38  ;;  %v818_v43 = vmul.f32 1.442695, %v817_v41  ;;  %v985_v50 = vsel %vm718_vm1, %v983_v39, 0  ;;  %v2375_v38 = vld [vmem:[#allocation11 + $0x10] sm:$0xff]  }
 0x417   : > { %2386 = vpow2.f32 %v821_v40 }
 0x418   : > { %v931_v42 = vpop.permute.xlu1 %930  ;;  %2388 = vpow2.f32 %v818_v43 }
 0x419   : > { %2137 = vmatmul.mubr.msk.bf16.vlgmr.msra.gmra.mxu0 %vm718_vm1, %v931_v42 }
 0x41a   : > { %2148 = vmatprep.mubr.msk.bf16.mxu0 %vm2663_vm0, %v2662_v6 }
 0x424   : > { %v2387_v45 = vpop.eup %2386 }
 0x425   : > { %v832_v46 = vpack.c.bf16 %v2387_v45, %v2387_v45  ;;  %v2389_v48 = vpop.eup %2388  ;;  %v826_v8 = vsel %vm812_vm4, %v2387_v45, 0.0 }
 0x426   : > { %v831_v49 = vpack.c.bf16 %v2389_v48, %v2389_v48  ;;  %v823_v7 = vsel %vm808_vm3, %v2389_v48, 0.0 }
 0x427   : > { %2125 = vmatmul.mubr.msk.bf16.vlgmr.msra.gmra.mxu1 %vm812_vm4, %v832_v46 }
 0x428   : > { %2129 = vmatpush3.bf16.msra.mxu1 %v3035_v47  ;;  %2130 = vmatprep.mubr.msk.bf16.mxu1 %vm2663_vm0, %v2662_v6 }
 0x429   : > { %2140 = vmatprep.subr.bf16.mxu1 %v2662_v6 }
 0x42f   : > { %2131 = vmatmul.mubr.msk.bf16.vlgmr.msra.gmra.mxu1 %vm808_vm3, %v831_v49 }
 0x430   : > { %2141 = vmatpush3.bf16.xpose.msra.mxu1 %v985_v50  ;;  %2142 = vmatprep.mubr.msk.bf16.mxu1 %vm2663_vm0, %v2662_v6 }
 0x431   : > { %2152 = vmatprep.subr.bf16.mxu1 %v2662_v6 }
 0x437   : > { %2143 = vmatmul.mubr.msk.bf16.vlgmr.msra.gmra.mxu1 %vm718_vm1, %v931_v42 }
 0x438   : > { %2154 = vmatprep.mubr.msk.bf16.mxu1 %vm2663_vm0, %v2662_v6 }
 0x4d9   : > { %v975_v51 = vpop.f32.mrf.mxu0 }
 0x4da   : > { %v1027_v52 = vsel %vm808_vm3, %v975_v51, -inf }
 0x4db   : > { %1028 = vmax.xlane.f32.xlu1 %v1027_v52  ;;  %v2138_v53 = vpop.f32.mrf.mxu0 }
 0x4dd   : > { %v978_v54 = vpop.f32.mrf.mxu0 }
 0x4df   : > { %v2139_v55 = vpop.f32.mrf.mxu0 }
 0x4e7   : > { %v874_v56 = vpop.f32.mrf.mxu1 }
 0x4e9   : > { %v2126_v57 = vpop.f32.mrf.mxu1 }
 0x4eb   : > { %v877_v58 = vpop.f32.mrf.mxu1 }
 0x4ec   : > { %1100 = vrot.lane.b32.xlu1 %v3035_v47, %s2665_s27 }
 0x4ed   : > { %v2127_v59 = vpop.f32.mrf.mxu1 }
 0x4ef   : > { %v917_v60 = vpop.f32.mrf.mxu1 }
 0x4f0   : > { %v918_v61 = vadd.f32 %v917_v60, %v874_v56 }
 0x4f1   : > { %v2132_v62 = vpop.f32.mrf.mxu1 }
 0x4f3   : > { %v920_v63 = vpop.f32.mrf.mxu1 }
 0x4f5   : > { %v2133_v0 = vpop.f32.mrf.mxu1 }
 0x4f7   : > { %v1021_v1 = vpop.f32.mrf.mxu1 }
 0x4f8   : > { %v1030_v2 = vsel %vm812_vm4, %v1021_v1, -inf }
 0x4f9   : > { %1031 = vmax.xlane.f32.xlu0 %v1030_v2  ;;  %v2144_v3 = vpop.f32.mrf.mxu1 }
 0x4fb   : > { %v1024_v4 = vpop.f32.mrf.mxu1 }
 0x4fd   : > { %v2145_v5 = vpop.f32.mrf.mxu1 }
 0x50f   : > { %1051 = vrot.lane.b32.xlu0 %v3013_v21, %s2665_s27 }
 0x510   : > { %824 = vadd.xlane.f32.xlu1 %v823_v7 }
 0x521   : > { %1264 = vrot.lane.b32.xlu1 %v2997_v16, %s2666_s19 }
 0x525   : > { %1262 = vrot.lane.b32.xlu1 %v3004_v19, %s2666_s19 }
 0x52e   : > { %827 = vadd.xlane.f32.xlu0 %v826_v8 }
 0x564   : > { %v1029_v9 = vpop.xlane.xlu1 %1028 }
 0x568   : > { %v1101_v10 = vpop.permute.xlu1 %1100 }
 0x569   : > { %2153 = vmatpush3.bf16.msra.mxu1 %v1101_v10 }
 0x56a   : > { %2166 = vmatprep.subr.bf16.mxu1 %v2662_v6 }
 0x582   : > { %v1032_v11 = vpop.xlane.xlu0 %1031 }
 0x583   : > { %v1033_v12 = vmax.f32 %v1029_v9, %v1032_v11 }
 0x585   : > { %v1034_v13 = vsub.f32 %v975_v51, %v1033_v12  ;;  %v1037_v14 = vsub.f32 %v1021_v1, %v1033_v12 }
 0x586   : > { %v1052_v15 = vpop.permute.xlu0 %1051 }
 0x587   : > { %v1035_v17 = vmul.f32 1.442695, %v1034_v13  ;;  %v1038_v20 = vmul.f32 1.442695, %v1037_v14  ;;  %v1057_v22 = vsel %vm836_vm2, %v1052_v15, 0 }
 0x588   : > { %2147 = vmatpush3.bf16.msra.mxu0 %v1057_v22 }
 0x589   : > { %2390 = vpow2.f32 %v1035_v17  ;;  %2158 = vmatprep.subr.bf16.mxu0 %v2662_v6 }
 0x58a   : > { %2392 = vpow2.f32 %v1038_v20 }
 0x596   : > { %v2391_v23 = vpop.eup %2390 }
 0x597   : > { %v2393_v25 = vpop.eup %2392  ;;  %v1040_v26 = vsel %vm808_vm3, %v2391_v23, 0.0  ;;  %v1048_v27 = vpack.c.bf16 %v2391_v23, %v2391_v23 }
 0x598   : > { %1041 = vadd.xlane.f32.xlu0 %v1040_v26  ;;  %v1049_v28 = vpack.c.bf16 %v2393_v25, %v2393_v25  ;;  %v1043_v30 = vsel %vm812_vm4, %v2393_v25, 0.0 }
 0x599   : > { %2155 = vmatmul.mubr.msk.bf16.vlgmr.msra.gmra.mxu1 %vm808_vm3, %v1048_v27  ;;  %v825_v32 = vpop.xlane.xlu1 %824 }
 0x59a   : > { %2149 = vmatmul.mubr.msk.bf16.vlgmr.msra.gmra.mxu0 %vm812_vm4, %v1049_v28  ;;  %2167 = vmatpush3.bf16.msra.mxu1 %v2372_v24 }
 0x59b   : > { %2168 = vmatprep.subr.bf16.mxu1 %v2662_v6  ;;  %2170 = vmatprep.mubr.msk.bf16.mxu1 %vm2663_vm0, %v2662_v6 }
 0x59c   : > { %1044 = vadd.xlane.f32.xlu0 %v1043_v30  ;;  %2162 = vmatprep.mubr.msk.bf16.mxu0 %vm2663_vm0, %v2662_v6 }
 0x59d   : > { %2159 = vmatpush3.bf16.msra.mxu0 %v2374_v31  ;;  %v1265_v43 = vpop.permute.xlu1 %1264 }
 0x59e   : > { %2169 = vmatpush3.bf16.msra.mxu1 %v2373_v29  ;;  %2160 = vmatprep.subr.bf16.mxu0 %v2662_v6  ;;  %v1270_v59 = vsel %vm718_vm1, %v1265_v43, 0 }
 0x59f   : > { %2180 = vmatprep.subr.bf16.mxu1 %v2662_v6 }
 0x5a1   : > { %2161 = vmatpush3.bf16.msra.mxu0 %v2375_v38  ;;  %v1263_v44 = vpop.permute.xlu1 %1262 }
 0x5a2   : > { %2174 = vmatprep.subr.bf16.mxu0 %v2662_v6 }
 0x5b2   : > { %1312 = vrot.lane.b32.xlu0 %v3002_v18, %s2666_s19 }
 0x5b7   : > { %v828_v33 = vpop.xlane.xlu0 %827 }
 0x5b8   : > { %v829_v34 = vadd.f32 %v828_v33, %v825_v32 }
 0x5ba   : > { %2394 = vrcp.f32 %v829_v34 }
 0x5c7   : > { %v2395_v35 = vpop.eup %2394 }
 0x5c8   : > { %v923_v36 = vmul.f32 %v2395_v35, %v918_v61  ;;  %v2376_v35 = vld [vmem:[#allocation11 + $0x28] sm:$0xff]  }
 0x5ca   : > { %v924_v37 = vpack.c.bf16 %v923_v36, %v923_v36  ;;  %v2377_v36 = vld [vmem:[#allocation11 + $0x20] sm:$0xff]  }
 0x5cc   : > { %2171 = vmatmul.mubr.msk.bf16.vlgmr.msra.gmra.mxu1 %vm718_vm1, %v924_v37 }
 0x5cd   : > { %2182 = vmatprep.mubr.msk.bf16.mxu1 %vm2663_vm0, %v2662_v6 }
 0x621   : > { %v1042_v39 = vpop.xlane.xlu0 %1041 }
 0x625   : > { %v1045_v40 = vpop.xlane.xlu0 %1044 }
 0x626   : > { %v1046_v45 = vadd.f32 %v1045_v40, %v1042_v39 }
 0x628   : > { %2396 = vrcp.f32 %v1046_v45 }
 0x629   : > { %v1313_v41 = vpop.permute.xlu0 %1312 }
 0x62a   : > { %v1315_v42 = vsel %vm718_vm1, %v1313_v41, 0 }
 0x62b   : > { %2181 = vmatpush3.bf16.xpose.msra.mxu1 %v1315_v42 }
 0x62c   : > { %2192 = vmatprep.subr.bf16.mxu1 %v2662_v6 }
 0x632   : > { %2183 = vmatmul.mubr.msk.bf16.vlgmr.msra.gmra.mxu1 %vm718_vm1, %v1263_v44 }
 0x633   : > { %2194 = vmatprep.mubr.msk.bf16.mxu1 %vm2663_vm0, %v2662_v6 }
 0x635   : > { %v2397_v51 = vpop.eup %2396 }
 0x659   : > { %v1140_v46 = vpop.f32.mrf.mxu1 }
 0x65a   : > { %v1093_v48 = vpop.f32.mrf.mxu0 }
 0x65b   : > { %v1141_v49 = vadd.f32 %v1140_v46, %v1093_v48  ;;  %v2156_v50 = vpop.f32.mrf.mxu1 }
 0x65c   : > { %v2150_v52 = vpop.f32.mrf.mxu0 }
 0x65d   : > { %v1146_v53 = vmul.f32 %v2397_v51, %v1141_v49  ;;  %v1143_v54 = vpop.f32.mrf.mxu1 }
 0x65e   : > { %v1096_v55 = vpop.f32.mrf.mxu0 }
 0x65f   : > { %v1147_v56 = vpack.c.bf16 %v1146_v53, %v1146_v53  ;;  %v2157_v57 = vpop.f32.mrf.mxu1 }
 0x660   : > { %v2151_v58 = vpop.f32.mrf.mxu0 }
 0x661   : > { %2163 = vmatmul.mubr.msk.bf16.vlgmr.msra.gmra.mxu0 %vm718_vm1, %v1147_v56 }
 0x662   : > { %2175 = vmatpush3.bf16.xpose.msra.mxu0 %v1270_v59  ;;  %2176 = vmatprep.mubr.msk.bf16.mxu0 %vm2663_vm0, %v2662_v6 }
 0x663   : > { %2186 = vmatprep.subr.bf16.mxu0 %v2662_v6 }
 0x669   : > { %2177 = vmatmul.mubr.msk.bf16.vlgmr.msra.gmra.mxu0 %vm718_vm1, %v1263_v44 }
 0x66a   : > { %2188 = vmatprep.mubr.msk.bf16.mxu0 %vm2663_vm0, %v2662_v6 }
 0x68c   : > { %v3095_v60 = vpop.f32.mrf.mxu1 }
 0x68e   : > { %v2172_v61 = vpop.f32.mrf.mxu1 }
 0x690   : > { %v1259_v62 = vpop.f32.mrf.mxu1 }
 0x692   : > { %v2173_v63 = vpop.f32.mrf.mxu1 }
 0x6f2   : > { %v1351_v0 = vpop.f32.mrf.mxu1 }
 0x6f3   : > { %v1360_v1 = vsel %vm812_vm4, %v1351_v0, -inf }
 0x6f4   : > { %1361 = vmax.xlane.f32.xlu0 %v1360_v1  ;;  %v2184_v2 = vpop.f32.mrf.mxu1 }
 0x6f6   : > { %v1354_v3 = vpop.f32.mrf.mxu1 }
 0x6f8   : > { %v2185_v4 = vpop.f32.mrf.mxu1 }
 0x70a   : > { %1380 = vrot.lane.b32.xlu0 %v3013_v21, %s2666_s19 }
 0x721   : > { %v3100_v5 = vpop.f32.mrf.mxu0 }
 0x722   : > { %v1257_v61 = vadd.f32 %v3095_v60, %v3100_v5 }
 0x723   : > { %v2164_v7 = vpop.f32.mrf.mxu0 }
 0x725   : > { %v1204_v8 = vpop.f32.mrf.mxu0 }
 0x727   : > { %v2165_v9 = vpop.f32.mrf.mxu0 }
 0x729   : > { %v1306_v10 = vpop.f32.mrf.mxu0 }
 0x72a   : > { %v1357_v11 = vsel %vm808_vm3, %v1306_v10, -inf }
 0x72b   : > { %1358 = vmax.xlane.f32.xlu1 %v1357_v11  ;;  %v2178_v12 = vpop.f32.mrf.mxu0 }
 0x72d   : > { %v1309_v13 = vpop.f32.mrf.mxu0 }
 0x72f   : > { %v2179_v14 = vpop.f32.mrf.mxu0 }
 0x73c   : > { %1428 = vrot.lane.b32.xlu1 %v3035_v47, %s2666_s19 }
 0x77d   : > { %v1362_v15 = vpop.xlane.xlu0 %1361 }
 0x781   : > { %v1381_v17 = vpop.permute.xlu0 %1380 }
 0x782   : > { %v1386_v20 = vsel %vm836_vm2, %v1381_v17, 0 }
 0x783   : > { %2187 = vmatpush3.bf16.msra.mxu0 %v1386_v20 }
 0x784   : > { %2198 = vmatprep.subr.bf16.mxu0 %v2662_v6 }
 0x7b4   : > { %v1359_v22 = vpop.xlane.xlu1 %1358 }
 0x7b5   : > { %v1363_v23 = vmax.f32 %v1359_v22, %v1362_v15 }
 0x7b7   : > { %v1364_v24 = vsub.f32 %v1306_v10, %v1363_v23  ;;  %v1367_v25 = vsub.f32 %v1351_v0, %v1363_v23 }
 0x7b8   : > { %v1429_v26 = vpop.permute.xlu1 %1428 }
 0x7b9   : > { %v1365_v27 = vmul.f32 1.442695, %v1364_v24  ;;  %v1368_v28 = vmul.f32 1.442695, %v1367_v25  ;;  %2193 = vmatpush3.bf16.msra.mxu1 %v1429_v26  ;;  %v2378_v26 = vld [vmem:[#allocation11 + $0x38] sm:$0xff]  }
 0x7ba   : > { %2206 = vmatprep.subr.bf16.mxu1 %v2662_v6 }
 0x7bb   : > { %2398 = vpow2.f32 %v1365_v27  ;;  %v2379_v27 = vld [vmem:[#allocation11 + $0x30] sm:$0xff]  }
 0x7bc   : > { %2400 = vpow2.f32 %v1368_v28 }
 0x7c8   : > { %v2399_v29 = vpop.eup %2398 }
 0x7c9   : > { %v2401_v30 = vpop.eup %2400  ;;  %v1370_v31 = vsel %vm808_vm3, %v2399_v29, 0.0  ;;  %v1378_v32 = vpack.c.bf16 %v2399_v29, %v2399_v29 }
 0x7ca   : > { %v1373_v33 = vsel %vm812_vm4, %v2401_v30, 0.0  ;;  %1371 = vadd.xlane.f32.xlu1 %v1370_v31  ;;  %v1379_v34 = vpack.c.bf16 %v2401_v30, %v2401_v30 }
 0x7cb   : > { %1374 = vadd.xlane.f32.xlu0 %v1373_v33  ;;  %2195 = vmatmul.mubr.msk.bf16.vlgmr.msra.gmra.mxu1 %vm808_vm3, %v1378_v32 }
 0x7cc   : > { %2189 = vmatmul.mubr.msk.bf16.vlgmr.msra.gmra.mxu0 %vm812_vm4, %v1379_v34  ;;  %2208 = vmatprep.mubr.msk.bf16.mxu1 %vm2663_vm0, %v2662_v6 }
 0x7cd   : > { %2202 = vmatprep.mubr.msk.bf16.mxu0 %vm2663_vm0, %v2662_v6  ;;  %2199 = vmatpush3.bf16.msra.mxu0 %v2376_v35 }
 0x7ce   : > { %2200 = vmatprep.subr.bf16.mxu0 %v2662_v6 }
 0x7d1   : > { %2201 = vmatpush3.bf16.msra.mxu0 %v2377_v36 }
 0x7d2   : > { %2212 = vmatprep.subr.bf16.mxu0 %v2662_v6 }
 0x7db   : > { %1586 = vrot.lane.b32.xlu1 %v3002_v18, %s2667_s30 }
 0x7df   : > { %1536 = vrot.lane.b32.xlu1 %v3004_v19, %s2667_s30 }
 0x7e1   : > { %1538 = vrot.lane.b32.xlu0 %v2997_v16, %s2667_s30 }
 0x853   : > { %v1372_v37 = vpop.xlane.xlu1 %1371 }
 0x854   : > { %v1375_v38 = vpop.xlane.xlu0 %1374 }
 0x855   : > { %v1376_v16 = vadd.f32 %v1375_v38, %v1372_v37 }
 0x857   : > { %v1587_v18 = vpop.permute.xlu1 %1586  ;;  %2402 = vrcp.f32 %v1376_v16 }
 0x858   : > { %v1539_v39 = vpop.permute.xlu0 %1538  ;;  %v1589_v54 = vsel %vm718_vm1, %v1587_v18, 0 }
 0x859   : > { %v1544_v40 = vsel %vm718_vm1, %v1539_v39, 0 }
 0x85a   : > { %2207 = vmatpush3.bf16.xpose.msra.mxu1 %v1544_v40 }
 0x85b   : > { %2218 = vmatprep.subr.bf16.mxu1 %v2662_v6  ;;  %v1537_v19 = vpop.permute.xlu1 %1536 }
 0x861   : > { %2209 = vmatmul.mubr.msk.bf16.vlgmr.msra.gmra.mxu1 %vm718_vm1, %v1537_v19 }
 0x862   : > { %2220 = vmatprep.mubr.msk.bf16.mxu1 %vm2663_vm0, %v2662_v6 }
 0x864   : > { %v2403_v45 = vpop.eup %2402 }
 0x88b   : > { %v1468_v41 = vpop.f32.mrf.mxu1 }
 0x88c   : > { %v1422_v42 = vpop.f32.mrf.mxu0 }
 0x88d   : > { %v1469_v43 = vadd.f32 %v1468_v41, %v1422_v42  ;;  %v2196_v44 = vpop.f32.mrf.mxu1 }
 0x88e   : > { %v2190_v46 = vpop.f32.mrf.mxu0 }
 0x88f   : > { %v1474_v48 = vmul.f32 %v2403_v45, %v1469_v43  ;;  %v1471_v49 = vpop.f32.mrf.mxu1 }
 0x890   : > { %v1425_v50 = vpop.f32.mrf.mxu0 }
 0x891   : > { %v1475_v51 = vpack.c.bf16 %v1474_v48, %v1474_v48  ;;  %v2197_v52 = vpop.f32.mrf.mxu1 }
 0x892   : > { %v2191_v53 = vpop.f32.mrf.mxu0 }
 0x893   : > { %2203 = vmatmul.mubr.msk.bf16.vlgmr.msra.gmra.mxu0 %vm718_vm1, %v1475_v51 }
 0x894   : > { %2213 = vmatpush3.bf16.xpose.msra.mxu0 %v1589_v54  ;;  %2214 = vmatprep.mubr.msk.bf16.mxu0 %vm2663_vm0, %v2662_v6 }
 0x895   : > { %2224 = vmatprep.subr.bf16.mxu0 %v2662_v6 }
 0x89b   : > { %2215 = vmatmul.mubr.msk.bf16.vlgmr.msra.gmra.mxu0 %vm718_vm1, %v1537_v19 }
 0x89c   : > { %2226 = vmatprep.mubr.msk.bf16.mxu0 %vm2663_vm0, %v2662_v6 }
 0x921   : > { %v1580_v55 = vpop.f32.mrf.mxu1 }
 0x922   : > { %v1631_v56 = vsel %vm808_vm3, %v1580_v55, -inf }
 0x923   : > { %1632 = vmax.xlane.f32.xlu1 %v1631_v56  ;;  %v2210_v57 = vpop.f32.mrf.mxu1 }
 0x925   : > { %v1583_v58 = vpop.f32.mrf.mxu1 }
 0x927   : > { %v2211_v59 = vpop.f32.mrf.mxu1 }
 0x934   : > { %1702 = vrot.lane.b32.xlu1 %v3035_v47, %s2667_s30 }
 0x953   : > { %v1529_v62 = vpop.f32.mrf.mxu0 }
 0x954   : > { %v3142_v63 = vadd.f32 %v1529_v62, %v1257_v61 }
 0x955   : > { %v2204_v0 = vpop.f32.mrf.mxu0 }
 0x957   : > { %v1532_v1 = vpop.f32.mrf.mxu0 }
 0x959   : > { %v2205_v2 = vpop.f32.mrf.mxu0 }
 0x95b   : > { %v1625_v3 = vpop.f32.mrf.mxu0 }
 0x95c   : > { %v1634_v4 = vsel %vm812_vm4, %v1625_v3, -inf }
 0x95d   : > { %1635 = vmax.xlane.f32.xlu0 %v1634_v4  ;;  %v2216_v7 = vpop.f32.mrf.mxu0 }
 0x95f   : > { %v1628_v8 = vpop.f32.mrf.mxu0 }
 0x961   : > { %v2217_v9 = vpop.f32.mrf.mxu0 }
 0x973   : > { %1654 = vrot.lane.b32.xlu0 %v3013_v21, %s2667_s30 }
 0x9ac   : > { %v1633_v47 = vpop.xlane.xlu1 %1632 }
 0x9b0   : > { %v1703_v10 = vpop.permute.xlu1 %1702 }
 0x9b1   : > { %2225 = vmatpush3.bf16.msra.mxu0 %v1703_v10 }
 0x9e6   : > { %v1636_v60 = vpop.xlane.xlu0 %1635 }
 0x9e7   : > { %v1637_v5 = vmax.f32 %v1633_v47, %v1636_v60 }
 0x9e9   : > { %v1638_v11 = vsub.f32 %v1580_v55, %v1637_v5  ;;  %v1641_v12 = vsub.f32 %v1625_v3, %v1637_v5 }
 0x9ea   : > { %v1655_v13 = vpop.permute.xlu0 %1654 }
 0x9eb   : > { %v1639_v14 = vmul.f32 1.442695, %v1638_v11  ;;  %v1642_v15 = vmul.f32 1.442695, %v1641_v12  ;;  %v1660_v17 = vsel %vm836_vm2, %v1655_v13, 0 }
 0x9ec   : > { %2219 = vmatpush3.bf16.msra.mxu1 %v1660_v17 }
 0x9ed   : > { %2404 = vpow2.f32 %v1639_v14  ;;  %2230 = vmatprep.subr.bf16.mxu1 %v2662_v6 }
 0x9ee   : > { %2406 = vpow2.f32 %v1642_v15 }
 0x9fa   : > { %v2405_v20 = vpop.eup %2404 }
 0x9fb   : > { %v2407_v22 = vpop.eup %2406  ;;  %v1644_v21 = vsel %vm808_vm3, %v2405_v20, 0.0  ;;  %v1652_v23 = vpack.c.bf16 %v2405_v20, %v2405_v20 }
 0x9fc   : > { %v1647_v24 = vsel %vm812_vm4, %v2407_v22, 0.0  ;;  %1645 = vadd.xlane.f32.xlu1 %v1644_v21  ;;  %v1653_v25 = vpack.c.bf16 %v2407_v22, %v2407_v22 }
 0x9fd   : > { %1648 = vadd.xlane.f32.xlu0 %v1647_v24  ;;  %2227 = vmatmul.mubr.msk.bf16.vlgmr.msra.gmra.mxu0 %vm808_vm3, %v1652_v23 }
 0x9fe   : > { %2221 = vmatmul.mubr.msk.bf16.vlgmr.msra.gmra.mxu1 %vm812_vm4, %v1653_v25 }
 0x9ff   : > { %2234 = vmatprep.mubr.msk.bf16.mxu1 %vm2663_vm0, %v2662_v6  ;;  %2231 = vmatpush3.bf16.msra.mxu1 %v2378_v26 }
 0xa00   : > { %2232 = vmatprep.subr.bf16.mxu1 %v2662_v6 }
 0xa03   : > { %2233 = vmatpush3.bf16.msra.mxu1 %v2379_v27 }
 0xa85   : > { %v1646_v29 = vpop.xlane.xlu1 %1645 }
 0xa86   : > { %v1649_v28 = vpop.xlane.xlu0 %1648 }
 0xa87   : > { %v1650_v30 = vadd.f32 %v1649_v28, %v1646_v29 }
 0xa89   : > { %2408 = vrcp.f32 %v1650_v30 }
 0xa96   : > { %v2409_v35 = vpop.eup %2408 }
 0xabd   : > { %v1742_v31 = vpop.f32.mrf.mxu0 }
 0xabe   : > { %v1696_v32 = vpop.f32.mrf.mxu1 }
 0xabf   : > { %v1743_v33 = vadd.f32 %v1742_v31, %v1696_v32  ;;  %v2228_v34 = vpop.f32.mrf.mxu0 }
 0xac0   : > { %v2222_v36 = vpop.f32.mrf.mxu1 }
 0xac1   : > { %v1748_v37 = vmul.f32 %v2409_v35, %v1743_v33  ;;  %v1745_v38 = vpop.f32.mrf.mxu0 }
 0xac2   : > { %v1699_v39 = vpop.f32.mrf.mxu1 }
 0xac3   : > { %v1749_v40 = vpack.c.bf16 %v1748_v37, %v1748_v37  ;;  %v2229_v6 = vpop.f32.mrf.mxu0 }
 0xac4   : > { %v2223_v18 = vpop.f32.mrf.mxu1 }
 0xac5   : > { %2235 = vmatmul.mubr.msk.bf16.vlgmr.msra.gmra.mxu1 %vm718_vm1, %v1749_v40 }
 0xb85   : > { %v1803_v19 = vpop.f32.mrf.mxu1 }
 0xb86   : > { %v1809_v16 = vadd.f32 %v1803_v19, %v3142_v63 }
 0xb87   : > { %v2236_v41 = vpop.f32.mrf.mxu1 }
 0xb88   : > { %1810 = vst [vmem:[%s362_s12] sm:$0xff] %v1809_v16 }
 0xb89   : > { %v1806_v42 = vpop.f32.mrf.mxu1 }
 0xb8a   : > { %2583 = shalt.err (!%p2580_p10)
}
 0xb8b   : > { %s2584_s18 = scalar_lea.hbm %s3164_s2, 128  ;;  %s2588_s3 = scalar_lea.hbm %s3213_s6, 256 }
 0xb8c   : > { %p2585_p9 = scmp.ne.s32.totalorder %s3164_s2, %s2584_s18  ;;  %p2589_p6 = scmp.lt.s32.totalorder %s3164_s2, %s3213_s6 }
 0xb8d   : > { %p2590_p8 = scmp.lt.s32.totalorder %s2588_s3, %s2584_s18 }
 0xb8e   : > { %p2586_p11 = pnand %p2585_p9, %p3247_p7 }
 0xb8f   : > { %p2591_p3 = por %p2590_p8, %p2589_p6 }
 0xb90   : > { %p2587_p4 = pneg %p2586_p11 }
 0xb92   : > { %p2592_p5 = pnand %p2591_p3, %p2587_p4 }
 0xb94   : > { %2595 = shalt.err (!%p2592_p5)
}
 0xb95   : > { %2258 = dma.vmem_to_hbm [thread:$0]  (%p3247_p7), %s3166_s7, 128, %s3164_s2, %s1812_s25   ;;  %v2237_v43 = vpop.f32.mrf.mxu1 }
 0xb96 PF: > { %s1837_s27 = sand.u32 1, %s2638_s21   ;;  %p3248_p13 = scmp.ne.s32.totalorder %s3225_s28, 0 }
 0xb97   : > { %p3249_p1 = scmp.ge.s32.totalorder %s2650_s24, 2  ;;  %s1838_s19 = scalar_lea.sflag [#allocation4], %s1837_s27 }
 0xb99   : > { %p2281_p0 = pnand %p3249_p1, %p3248_p13 }
 0xb9b   : > { %p2282_p2 = pneg %p2281_p0 }
 0xb9d   : > { %2633 = dma.done.wait (%p2282_p2), %s1838_s19, 128  }
 0xb9e   : > { %2635 = vsyncadd (%p2282_p2), %s1838_s19, 4294967168  ;;  %p24_p12 = scmp.ge.s32.totalorder %s2801_s16, 4   ;;  %s3250_s21 = smov %s2642_s22 }
 0xb9f   : > { %s3251_s22 = smov %s2646_s23  ;;  %s3252_s23 = smov %s2817_s26 }
 0xba0   : > { %s3253_s24 = smov %s2801_s16  ;;  %26 = sbr.rel (!%p24_p12) target bundleno = 14 (0xe), region = 118 }
 0xba5   :  { %1843 = vsyncpa [#allocation3], 1 }
 0xba6   :  { %1845 = vsyncpa [#allocation3 + $0x1], 1 }
 0xba7   :  { %1846 = vsyncpa [#allocation6], 1 }
 0xba8   :  { %1848 = vsyncpa [#allocation6 + $0x1], 1 }
 0xba9   :  { %1849 = vsyncpa [#allocation9], 1 }
 0xbaa   :  { %1850 = vsyncpa [#allocation12], 1 }
 0xbab   :  { %1851 = vsyncpa [#allocation4], 1 }
 0xbac   :  { %1853 = vsyncpa [#allocation4 + $0x1], 1 }

</bundles_post_ra>
